<compile_context>
chip_gen: v5e
topology: v5e:2x2
jax: 0.10.0
libtpu: 0.0.40
codegen_flags: <defaults>
</compile_context>

<pallas_src>
import functools

import numpy as np

import jax
import jax.numpy as jnp
from jax.experimental import pallas as pl
from jax.experimental.pallas import tpu as pltpu


# ------------------------------ fused kernel --------------------------------


def _dfe_kernel(x_ref, col_ref, *refs, plans, hw, width, lpad):
    """Whole DFE forward for one batch element.

    x_ref:   (1, Cin, H*W)            input, spatial flattened on lanes
    col_ref: (1, H*W) int32           column index of each flattened pixel
    refs:    for each of the 14 convs: (w_ref, shift_ref), then out_ref last
             w_ref:     (KH*KW*Cout, Cin)   BN-scale-folded, tap-major weights
             shift_ref: (Cout, 1)           folded BN shift
    out_ref: (1, Cout, H*W)
    plans:   static per-conv metadata: (cout, ((lane_offset, dx), ...))
    """
    out_ref = refs[-1]
    conv_refs = refs[:-1]
    col = col_ref[...]                                     # (1, HW) int32

    def conv_bn(idx, x):
        w_ref = conv_refs[2 * idx]
        sh_ref = conv_refs[2 * idx + 1]
        cout, taps = plans[idx]
        w_all = w_ref[...]                                 # (T*Cout, Cin)
        cin = x.shape[0]

        # Zero-extend along lanes so spatial tap shifts become static lane
        # windows; out-of-row reads land in the zero pad, out-of-column reads
        # are masked below.  (Replaces the old jnp.pad + padded HBM arrays.)
        x_ext = None
        if any(off != 0 for off, _ in taps):
            zpad = jnp.zeros((cin, lpad), jnp.float32)
            x_ext = jnp.concatenate([zpad, x, zpad], axis=1)

        acc = None
        for t, (off, dx) in enumerate(taps):
            xs = x if off == 0 else x_ext[:, lpad + off:lpad + off + hw]
            wt = w_all[t * cout:(t + 1) * cout, :]         # (Cout, Cin)
            term = jnp.dot(wt, xs, preferred_element_type=jnp.float32)
            # Only the column bound can be violated by in-range lane reads.
            if dx > 0:
                term = jnp.where(col < width - dx, term, 0.0)
            elif dx < 0:
                term = jnp.where(col >= -dx, term, 0.0)
            acc = term if acc is None else acc + term
        return acc + sh_ref[...]                           # (Cout, HW)

    x = x_ref[0]                                           # (Cin, HW)

    # conv order: 0..2 branch0, 3 conv_res, 4..6 branch1, 7..9 branch2,
    #             10..12 branch3, 13 conv_cat
    b0 = conv_bn(2, conv_bn(1, conv_bn(0, x)))
    res = conv_bn(3, x)                                    # conv_res(x), reused
    b1 = conv_bn(6, conv_bn(5, conv_bn(4, b0 + res)))
    b2 = conv_bn(9, conv_bn(8, conv_bn(7, b1 + res)))
    b3 = conv_bn(12, conv_bn(11, conv_bn(10, b2 + res)))
    xcat = jnp.concatenate([b0, b1, b2, b3], axis=0)       # (4*Cout, HW), in VMEM
    y = conv_bn(13, xcat)
    out_ref[0] = jnp.maximum(y + res, 0.0).astype(out_ref.dtype)


# ----------------------------- host-side packing ----------------------------


def _pack_conv(p, h, w):
    """Fold BN scale into the weights and build static tap metadata."""
    wt = p["w"]                                            # (KH, KW, Cin, Cout)
    kh, kw, cin, cout = wt.shape
    ph, pw = p["pad"]
    dh, dw = p["dil"]
    taps, max_off = [], 0
    for i in range(kh):
        for j in range(kw):
            dy = i * dh - ph
            dx = j * dw - pw
            off = dy * w + dx                              # flattened lane shift
            taps.append((off, dx))
            max_off = max(max_off, abs(off))
    w_sc = wt * p["scale"][None, None, None, :]            # fold gamma/sqrt(var)
    w_mat = jnp.transpose(w_sc.reshape(kh * kw, cin, cout), (0, 2, 1))
    w_mat = w_mat.reshape(kh * kw * cout, cin).astype(jnp.float32)
    shift = p["shift"].reshape(cout, 1).astype(jnp.float32)
    return (cout, tuple(taps)), max_off, w_mat, shift


def dfe_forward(params, x_nchw):
    """x: (N, Cin, H, W) f32 -> (N, Cout, H, W) f32, single fused pallas_call."""
    n, cin, h, w = x_nchw.shape
    hw = h * w
    conv_list = (params["branch0"] + [params["conv_res"]] + params["branch1"]
                 + params["branch2"] + params["branch3"] + [params["conv_cat"]])

    plans, arrays, in_specs = [], [], []
    in_specs.append(pl.BlockSpec((1, cin, hw), lambda b: (b, 0, 0)))
    in_specs.append(pl.BlockSpec((1, hw), lambda b: (0, 0)))
    max_off = 0
    for p in conv_list:
        plan, m_off, w_mat, shift = _pack_conv(p, h, w)
        plans.append(plan)
        max_off = max(max_off, m_off)
        arrays += [w_mat, shift]
        in_specs.append(pl.BlockSpec(w_mat.shape, lambda b: (0, 0)))
        in_specs.append(pl.BlockSpec(shift.shape, lambda b: (0, 0)))

    lpad = max(128, ((max_off + 127) // 128) * 128)        # lane-aligned halo
    cout = plans[-1][0]
    col = jnp.asarray((np.arange(hw, dtype=np.int32) % w).reshape(1, hw))

    kern = functools.partial(_dfe_kernel, plans=tuple(plans),
                             hw=hw, width=w, lpad=lpad)
    out = pl.pallas_call(
        kern,
        out_shape=jax.ShapeDtypeStruct((n, cout, hw), jnp.float32),
        grid=(n,),
        in_specs=in_specs,
        out_specs=pl.BlockSpec((1, cout, hw), lambda b: (b, 0, 0)),
        compiler_params=pltpu.CompilerParams(
            dimension_semantics=("parallel",)),
    )(x_nchw.reshape(n, cin, hw), col, *arrays)
    return out.reshape(n, cout, h, w)


# --------------------------- parameter creation -----------------------------


def _pair(v):
    return (v, v) if isinstance(v, int) else tuple(v)


def init_basic_conv(key, cin, cout, ksize, pad, dil):
    ksize, pad, dil = _pair(ksize), _pair(pad), _pair(dil)
    k1, k2, k3, k4, k5 = jax.random.split(key, 5)
    w = 0.1 * jax.random.normal(k1, (ksize[0], ksize[1], cin, cout), jnp.float32)
    gamma = 1.0 + 0.1 * jax.random.normal(k2, (cout,), jnp.float32)
    beta = 0.1 * jax.random.normal(k3, (cout,), jnp.float32)
    mean = 0.1 * jax.random.normal(k4, (cout,), jnp.float32)
    var = 1.0 + 0.1 * jax.random.uniform(k5, (cout,), jnp.float32)
    eps = 1e-5
    # BatchNorm folded with fixed (inference-mode) statistics.
    scale = gamma / jnp.sqrt(var + eps)
    shift = beta - mean * scale
    return dict(w=w, scale=scale, shift=shift, pad=pad, dil=dil)


def init_dfe(key, in_ch, out_ch):
    keys = jax.random.split(key, 14)
    k = iter(keys)
    return dict(
        branch0=[init_basic_conv(next(k), in_ch, out_ch, 1, 0, 1),
                 init_basic_conv(next(k), out_ch, out_ch, (1, 3), (0, 1), 1),
                 init_basic_conv(next(k), out_ch, out_ch, (3, 1), (1, 0), 1)],
        branch1=[init_basic_conv(next(k), out_ch, out_ch, (1, 3), (0, 1), 1),
                 init_basic_conv(next(k), out_ch, out_ch, (3, 1), (1, 0), 1),
                 init_basic_conv(next(k), out_ch, out_ch, 3, 3, 3)],
        branch2=[init_basic_conv(next(k), out_ch, out_ch, (1, 5), (0, 2), 1),
                 init_basic_conv(next(k), out_ch, out_ch, (5, 1), (2, 0), 1),
                 init_basic_conv(next(k), out_ch, out_ch, 3, 5, 5)],
        branch3=[init_basic_conv(next(k), out_ch, out_ch, (1, 7), (0, 3), 1),
                 init_basic_conv(next(k), out_ch, out_ch, (7, 1), (3, 0), 1),
                 init_basic_conv(next(k), out_ch, out_ch, 3, 7, 7)],
        conv_cat=init_basic_conv(next(k), 4 * out_ch, out_ch, 3, 1, 1),
        conv_res=init_basic_conv(next(k), in_ch, out_ch, 1, 0, 1),
    )


# -------------------------- pure-JAX reference -------------------------------


def _bc_ref(p, x):
    ph, pw = p["pad"]
    y = jax.lax.conv_general_dilated(
        x, p["w"], window_strides=(1, 1),
        padding=[(ph, ph), (pw, pw)], rhs_dilation=p["dil"],
        dimension_numbers=("NCHW", "HWIO", "NCHW"))
    return y * p["scale"][None, :, None, None] + p["shift"][None, :, None, None]


def dfe_ref(params, x):
    def seq(ps, z):
        for p in ps:
            z = _bc_ref(p, z)
        return z
    x0 = seq(params["branch0"], x)
    res = _bc_ref(params["conv_res"], x)
    x1 = seq(params["branch1"], x0 + res)
    x2 = seq(params["branch2"], x1 + res)
    x3 = seq(params["branch3"], x2 + res)
    x_cat = _bc_ref(params["conv_cat"], jnp.concatenate([x0, x1, x2, x3], axis=1))
    return jnp.maximum(x_cat + res, 0.0)


# ---------------------------------- main -------------------------------------


if __name__ == "__main__":
    key = jax.random.PRNGKey(0)
    kp, kx = jax.random.split(key)

    in_channel, out_channel = 4, 8
    N, H, W = 2, 16, 16

    params = init_dfe(kp, in_channel, out_channel)

    # PyTorch-style NCHW input; the kernel works directly on (N, C, H*W).
    x = jax.random.normal(kx, (N, in_channel, H, W), jnp.float32)

    out = dfe_forward(params, x)
    out = jax.block_until_ready(out)

    ref = dfe_ref(params, x)
    assert out.shape == (N, out_channel, H, W)
    assert jnp.allclose(out, ref, atol=1e-3, rtol=1e-3), (
        float(jnp.max(jnp.abs(out - ref))))

    print("KERNEL_OK")
</pallas_src>

<mosaic_0001>
module attributes {stable_mosaic.version = 11 : i64} {
  func.func @_dfe_kernel(%arg0: i32, %arg1: memref<1x4x256xf32, #tpu.memory_space<vmem>>, %arg2: memref<1x256xi32, #tpu.memory_space<vmem>>, %arg3: memref<8x4xf32, #tpu.memory_space<vmem>>, %arg4: memref<8x1xf32, #tpu.memory_space<vmem>>, %arg5: memref<24x8xf32, #tpu.memory_space<vmem>>, %arg6: memref<8x1xf32, #tpu.memory_space<vmem>>, %arg7: memref<24x8xf32, #tpu.memory_space<vmem>>, %arg8: memref<8x1xf32, #tpu.memory_space<vmem>>, %arg9: memref<8x4xf32, #tpu.memory_space<vmem>>, %arg10: memref<8x1xf32, #tpu.memory_space<vmem>>, %arg11: memref<24x8xf32, #tpu.memory_space<vmem>>, %arg12: memref<8x1xf32, #tpu.memory_space<vmem>>, %arg13: memref<24x8xf32, #tpu.memory_space<vmem>>, %arg14: memref<8x1xf32, #tpu.memory_space<vmem>>, %arg15: memref<72x8xf32, #tpu.memory_space<vmem>>, %arg16: memref<8x1xf32, #tpu.memory_space<vmem>>, %arg17: memref<40x8xf32, #tpu.memory_space<vmem>>, %arg18: memref<8x1xf32, #tpu.memory_space<vmem>>, %arg19: memref<40x8xf32, #tpu.memory_space<vmem>>, %arg20: memref<8x1xf32, #tpu.memory_space<vmem>>, %arg21: memref<72x8xf32, #tpu.memory_space<vmem>>, %arg22: memref<8x1xf32, #tpu.memory_space<vmem>>, %arg23: memref<56x8xf32, #tpu.memory_space<vmem>>, %arg24: memref<8x1xf32, #tpu.memory_space<vmem>>, %arg25: memref<56x8xf32, #tpu.memory_space<vmem>>, %arg26: memref<8x1xf32, #tpu.memory_space<vmem>>, %arg27: memref<72x8xf32, #tpu.memory_space<vmem>>, %arg28: memref<8x1xf32, #tpu.memory_space<vmem>>, %arg29: memref<72x32xf32, #tpu.memory_space<vmem>>, %arg30: memref<8x1xf32, #tpu.memory_space<vmem>>, %arg31: memref<1x8x256xf32, #tpu.memory_space<vmem>>) attributes {dimension_semantics = [#tpu.dimension_semantics<parallel>], iteration_bounds = array<i64: 2>, scalar_prefetch = 0 : i64, scratch_operands = 0 : i64, tpu.core_type = #tpu.core_type<tc>, window_params = [{transform_indices = @transform_0, window_bounds = array<i64: 1, 4, 256>}, {pipeline_mode = #tpu.pipeline_mode<synchronous>, transform_indices = @transform_1, window_bounds = array<i64: 1, 256>}, {pipeline_mode = #tpu.pipeline_mode<synchronous>, transform_indices = @transform_2, window_bounds = array<i64: 8, 4>}, {pipeline_mode = #tpu.pipeline_mode<synchronous>, transform_indices = @transform_3, window_bounds = array<i64: 8, 1>}, {pipeline_mode = #tpu.pipeline_mode<synchronous>, transform_indices = @transform_4, window_bounds = array<i64: 24, 8>}, {pipeline_mode = #tpu.pipeline_mode<synchronous>, transform_indices = @transform_5, window_bounds = array<i64: 8, 1>}, {pipeline_mode = #tpu.pipeline_mode<synchronous>, transform_indices = @transform_6, window_bounds = array<i64: 24, 8>}, {pipeline_mode = #tpu.pipeline_mode<synchronous>, transform_indices = @transform_7, window_bounds = array<i64: 8, 1>}, {pipeline_mode = #tpu.pipeline_mode<synchronous>, transform_indices = @transform_8, window_bounds = array<i64: 8, 4>}, {pipeline_mode = #tpu.pipeline_mode<synchronous>, transform_indices = @transform_9, window_bounds = array<i64: 8, 1>}, {pipeline_mode = #tpu.pipeline_mode<synchronous>, transform_indices = @transform_10, window_bounds = array<i64: 24, 8>}, {pipeline_mode = #tpu.pipeline_mode<synchronous>, transform_indices = @transform_11, window_bounds = array<i64: 8, 1>}, {pipeline_mode = #tpu.pipeline_mode<synchronous>, transform_indices = @transform_12, window_bounds = array<i64: 24, 8>}, {pipeline_mode = #tpu.pipeline_mode<synchronous>, transform_indices = @transform_13, window_bounds = array<i64: 8, 1>}, {pipeline_mode = #tpu.pipeline_mode<synchronous>, transform_indices = @transform_14, window_bounds = array<i64: 72, 8>}, {pipeline_mode = #tpu.pipeline_mode<synchronous>, transform_indices = @transform_15, window_bounds = array<i64: 8, 1>}, {pipeline_mode = #tpu.pipeline_mode<synchronous>, transform_indices = @transform_16, window_bounds = array<i64: 40, 8>}, {pipeline_mode = #tpu.pipeline_mode<synchronous>, transform_indices = @transform_17, window_bounds = array<i64: 8, 1>}, {pipeline_mode = #tpu.pipeline_mode<synchronous>, transform_indices = @transform_18, window_bounds = array<i64: 40, 8>}, {pipeline_mode = #tpu.pipeline_mode<synchronous>, transform_indices = @transform_19, window_bounds = array<i64: 8, 1>}, {pipeline_mode = #tpu.pipeline_mode<synchronous>, transform_indices = @transform_20, window_bounds = array<i64: 72, 8>}, {pipeline_mode = #tpu.pipeline_mode<synchronous>, transform_indices = @transform_21, window_bounds = array<i64: 8, 1>}, {pipeline_mode = #tpu.pipeline_mode<synchronous>, transform_indices = @transform_22, window_bounds = array<i64: 56, 8>}, {pipeline_mode = #tpu.pipeline_mode<synchronous>, transform_indices = @transform_23, window_bounds = array<i64: 8, 1>}, {pipeline_mode = #tpu.pipeline_mode<synchronous>, transform_indices = @transform_24, window_bounds = array<i64: 56, 8>}, {pipeline_mode = #tpu.pipeline_mode<synchronous>, transform_indices = @transform_25, window_bounds = array<i64: 8, 1>}, {pipeline_mode = #tpu.pipeline_mode<synchronous>, transform_indices = @transform_26, window_bounds = array<i64: 72, 8>}, {pipeline_mode = #tpu.pipeline_mode<synchronous>, transform_indices = @transform_27, window_bounds = array<i64: 8, 1>}, {pipeline_mode = #tpu.pipeline_mode<synchronous>, transform_indices = @transform_28, window_bounds = array<i64: 72, 32>}, {pipeline_mode = #tpu.pipeline_mode<synchronous>, transform_indices = @transform_29, window_bounds = array<i64: 8, 1>}, {transform_indices = @transform_30, window_bounds = array<i64: 1, 8, 256>}]} {
    %c0 = arith.constant 0 : index
    %c0_0 = arith.constant 0 : index
    %0 = vector.load %arg2[%c0, %c0_0] : memref<1x256xi32, #tpu.memory_space<vmem>>, vector<1x256xi32>
    %c0_1 = arith.constant 0 : index
    %c0_2 = arith.constant 0 : index
    %c0_3 = arith.constant 0 : index
    %1 = vector.load %arg1[%c0_1, %c0_2, %c0_3] : memref<1x4x256xf32, #tpu.memory_space<vmem>>, vector<1x4x256xf32>
    %2 = vector.shape_cast %1 : vector<1x4x256xf32> to vector<4x256xf32>
    %c0_4 = arith.constant 0 : index
    %c0_5 = arith.constant 0 : index
    %3 = vector.load %arg3[%c0_4, %c0_5] : memref<8x4xf32, #tpu.memory_space<vmem>>, vector<8x4xf32>
    %cst = arith.constant dense<0.000000e+00> : vector<8x256xf32>
    %4 = tpu.matmul %3, %2, %cst {dimension_numbers = #tpu.dot_dimension_numbers<[1], [0], [0], [1], [0, 0, 1, 1], [], []>} : vector<8x4xf32>, vector<4x256xf32>, vector<8x256xf32> -> vector<8x256xf32>
    %c0_6 = arith.constant 0 : index
    %c0_7 = arith.constant 0 : index
    %5 = vector.load %arg4[%c0_6, %c0_7] : memref<8x1xf32, #tpu.memory_space<vmem>>, vector<8x1xf32>
    %6 = vector.broadcast %5 : vector<8x1xf32> to vector<8x256xf32>
    %7 = arith.addf %4, %6 : vector<8x256xf32>
    %c0_8 = arith.constant 0 : index
    %c0_9 = arith.constant 0 : index
    %8 = vector.load %arg5[%c0_8, %c0_9] : memref<24x8xf32, #tpu.memory_space<vmem>>, vector<24x8xf32>
    %cst_10 = arith.constant 0.000000e+00 : f32
    %9 = vector.broadcast %cst_10 : f32 to vector<8x128xf32>
    %10 = tpu.concatenate %9, %7, %9 in 1 : vector<8x128xf32>, vector<8x256xf32>, vector<8x128xf32> -> vector<8x512xf32>
    %11 = vector.extract_strided_slice %10 {offsets = [0, 127], sizes = [8, 256], strides = [1, 1]} : vector<8x512xf32> to vector<8x256xf32>
    %12 = vector.extract_strided_slice %8 {offsets = [0, 0], sizes = [8, 8], strides = [1, 1]} : vector<24x8xf32> to vector<8x8xf32>
    %cst_11 = arith.constant dense<0.000000e+00> : vector<8x256xf32>
    %13 = tpu.matmul %12, %11, %cst_11 {dimension_numbers = #tpu.dot_dimension_numbers<[1], [0], [0], [1], [0, 0, 1, 1], [], []>} : vector<8x8xf32>, vector<8x256xf32>, vector<8x256xf32> -> vector<8x256xf32>
    %c1_i32 = arith.constant 1 : i32
    %14 = vector.broadcast %c1_i32 : i32 to vector<1x256xi32>
    %15 = arith.cmpi sge, %0, %14 : vector<1x256xi32>
    %cst_12 = arith.constant 0.000000e+00 : f32
    %16 = vector.shape_cast %15 : vector<1x256xi1> to vector<1x256xi1>
    %17 = vector.broadcast %16 : vector<1x256xi1> to vector<8x256xi1>
    %18 = vector.broadcast %cst_12 : f32 to vector<8x256xf32>
    %19 = arith.select %17, %13, %18 : vector<8x256xi1>, vector<8x256xf32>
    %20 = vector.extract_strided_slice %8 {offsets = [8, 0], sizes = [8, 8], strides = [1, 1]} : vector<24x8xf32> to vector<8x8xf32>
    %cst_13 = arith.constant dense<0.000000e+00> : vector<8x256xf32>
    %21 = tpu.matmul %20, %7, %cst_13 {dimension_numbers = #tpu.dot_dimension_numbers<[1], [0], [0], [1], [0, 0, 1, 1], [], []>} : vector<8x8xf32>, vector<8x256xf32>, vector<8x256xf32> -> vector<8x256xf32>
    %22 = arith.addf %19, %21 : vector<8x256xf32>
    %23 = vector.extract_strided_slice %10 {offsets = [0, 129], sizes = [8, 256], strides = [1, 1]} : vector<8x512xf32> to vector<8x256xf32>
    %24 = vector.extract_strided_slice %8 {offsets = [16, 0], sizes = [8, 8], strides = [1, 1]} : vector<24x8xf32> to vector<8x8xf32>
    %cst_14 = arith.constant dense<0.000000e+00> : vector<8x256xf32>
    %25 = tpu.matmul %24, %23, %cst_14 {dimension_numbers = #tpu.dot_dimension_numbers<[1], [0], [0], [1], [0, 0, 1, 1], [], []>} : vector<8x8xf32>, vector<8x256xf32>, vector<8x256xf32> -> vector<8x256xf32>
    %c15_i32 = arith.constant 15 : i32
    %26 = vector.broadcast %c15_i32 : i32 to vector<1x256xi32>
    %27 = arith.cmpi slt, %0, %26 : vector<1x256xi32>
    %cst_15 = arith.constant 0.000000e+00 : f32
    %28 = vector.shape_cast %27 : vector<1x256xi1> to vector<1x256xi1>
    %29 = vector.broadcast %28 : vector<1x256xi1> to vector<8x256xi1>
    %30 = vector.broadcast %cst_15 : f32 to vector<8x256xf32>
    %31 = arith.select %29, %25, %30 : vector<8x256xi1>, vector<8x256xf32>
    %32 = arith.addf %22, %31 : vector<8x256xf32>
    %c0_16 = arith.constant 0 : index
    %c0_17 = arith.constant 0 : index
    %33 = vector.load %arg6[%c0_16, %c0_17] : memref<8x1xf32, #tpu.memory_space<vmem>>, vector<8x1xf32>
    %34 = vector.broadcast %33 : vector<8x1xf32> to vector<8x256xf32>
    %35 = arith.addf %32, %34 : vector<8x256xf32>
    %c0_18 = arith.constant 0 : index
    %c0_19 = arith.constant 0 : index
    %36 = vector.load %arg7[%c0_18, %c0_19] : memref<24x8xf32, #tpu.memory_space<vmem>>, vector<24x8xf32>
    %cst_20 = arith.constant 0.000000e+00 : f32
    %37 = vector.broadcast %cst_20 : f32 to vector<8x128xf32>
    %38 = tpu.concatenate %37, %35, %37 in 1 : vector<8x128xf32>, vector<8x256xf32>, vector<8x128xf32> -> vector<8x512xf32>
    %39 = vector.extract_strided_slice %38 {offsets = [0, 112], sizes = [8, 256], strides = [1, 1]} : vector<8x512xf32> to vector<8x256xf32>
    %40 = vector.extract_strided_slice %36 {offsets = [0, 0], sizes = [8, 8], strides = [1, 1]} : vector<24x8xf32> to vector<8x8xf32>
    %cst_21 = arith.constant dense<0.000000e+00> : vector<8x256xf32>
    %41 = tpu.matmul %40, %39, %cst_21 {dimension_numbers = #tpu.dot_dimension_numbers<[1], [0], [0], [1], [0, 0, 1, 1], [], []>} : vector<8x8xf32>, vector<8x256xf32>, vector<8x256xf32> -> vector<8x256xf32>
    %42 = vector.extract_strided_slice %36 {offsets = [8, 0], sizes = [8, 8], strides = [1, 1]} : vector<24x8xf32> to vector<8x8xf32>
    %cst_22 = arith.constant dense<0.000000e+00> : vector<8x256xf32>
    %43 = tpu.matmul %42, %35, %cst_22 {dimension_numbers = #tpu.dot_dimension_numbers<[1], [0], [0], [1], [0, 0, 1, 1], [], []>} : vector<8x8xf32>, vector<8x256xf32>, vector<8x256xf32> -> vector<8x256xf32>
    %44 = arith.addf %41, %43 : vector<8x256xf32>
    %45 = vector.extract_strided_slice %38 {offsets = [0, 144], sizes = [8, 256], strides = [1, 1]} : vector<8x512xf32> to vector<8x256xf32>
    %46 = vector.extract_strided_slice %36 {offsets = [16, 0], sizes = [8, 8], strides = [1, 1]} : vector<24x8xf32> to vector<8x8xf32>
    %cst_23 = arith.constant dense<0.000000e+00> : vector<8x256xf32>
    %47 = tpu.matmul %46, %45, %cst_23 {dimension_numbers = #tpu.dot_dimension_numbers<[1], [0], [0], [1], [0, 0, 1, 1], [], []>} : vector<8x8xf32>, vector<8x256xf32>, vector<8x256xf32> -> vector<8x256xf32>
    %48 = arith.addf %44, %47 : vector<8x256xf32>
    %c0_24 = arith.constant 0 : index
    %c0_25 = arith.constant 0 : index
    %49 = vector.load %arg8[%c0_24, %c0_25] : memref<8x1xf32, #tpu.memory_space<vmem>>, vector<8x1xf32>
    %50 = vector.broadcast %49 : vector<8x1xf32> to vector<8x256xf32>
    %51 = arith.addf %48, %50 : vector<8x256xf32>
    %c0_26 = arith.constant 0 : index
    %c0_27 = arith.constant 0 : index
    %52 = vector.load %arg9[%c0_26, %c0_27] : memref<8x4xf32, #tpu.memory_space<vmem>>, vector<8x4xf32>
    %cst_28 = arith.constant dense<0.000000e+00> : vector<8x256xf32>
    %53 = tpu.matmul %52, %2, %cst_28 {dimension_numbers = #tpu.dot_dimension_numbers<[1], [0], [0], [1], [0, 0, 1, 1], [], []>} : vector<8x4xf32>, vector<4x256xf32>, vector<8x256xf32> -> vector<8x256xf32>
    %c0_29 = arith.constant 0 : index
    %c0_30 = arith.constant 0 : index
    %54 = vector.load %arg10[%c0_29, %c0_30] : memref<8x1xf32, #tpu.memory_space<vmem>>, vector<8x1xf32>
    %55 = vector.broadcast %54 : vector<8x1xf32> to vector<8x256xf32>
    %56 = arith.addf %53, %55 : vector<8x256xf32>
    %57 = arith.addf %51, %56 : vector<8x256xf32>
    %c0_31 = arith.constant 0 : index
    %c0_32 = arith.constant 0 : index
    %58 = vector.load %arg11[%c0_31, %c0_32] : memref<24x8xf32, #tpu.memory_space<vmem>>, vector<24x8xf32>
    %cst_33 = arith.constant 0.000000e+00 : f32
    %59 = vector.broadcast %cst_33 : f32 to vector<8x128xf32>
    %60 = tpu.concatenate %59, %57, %59 in 1 : vector<8x128xf32>, vector<8x256xf32>, vector<8x128xf32> -> vector<8x512xf32>
    %61 = vector.extract_strided_slice %60 {offsets = [0, 127], sizes = [8, 256], strides = [1, 1]} : vector<8x512xf32> to vector<8x256xf32>
    %62 = vector.extract_strided_slice %58 {offsets = [0, 0], sizes = [8, 8], strides = [1, 1]} : vector<24x8xf32> to vector<8x8xf32>
    %cst_34 = arith.constant dense<0.000000e+00> : vector<8x256xf32>
    %63 = tpu.matmul %62, %61, %cst_34 {dimension_numbers = #tpu.dot_dimension_numbers<[1], [0], [0], [1], [0, 0, 1, 1], [], []>} : vector<8x8xf32>, vector<8x256xf32>, vector<8x256xf32> -> vector<8x256xf32>
    %c1_i32_35 = arith.constant 1 : i32
    %64 = vector.broadcast %c1_i32_35 : i32 to vector<1x256xi32>
    %65 = arith.cmpi sge, %0, %64 : vector<1x256xi32>
    %cst_36 = arith.constant 0.000000e+00 : f32
    %66 = vector.shape_cast %65 : vector<1x256xi1> to vector<1x256xi1>
    %67 = vector.broadcast %66 : vector<1x256xi1> to vector<8x256xi1>
    %68 = vector.broadcast %cst_36 : f32 to vector<8x256xf32>
    %69 = arith.select %67, %63, %68 : vector<8x256xi1>, vector<8x256xf32>
    %70 = vector.extract_strided_slice %58 {offsets = [8, 0], sizes = [8, 8], strides = [1, 1]} : vector<24x8xf32> to vector<8x8xf32>
    %cst_37 = arith.constant dense<0.000000e+00> : vector<8x256xf32>
    %71 = tpu.matmul %70, %57, %cst_37 {dimension_numbers = #tpu.dot_dimension_numbers<[1], [0], [0], [1], [0, 0, 1, 1], [], []>} : vector<8x8xf32>, vector<8x256xf32>, vector<8x256xf32> -> vector<8x256xf32>
    %72 = arith.addf %69, %71 : vector<8x256xf32>
    %73 = vector.extract_strided_slice %60 {offsets = [0, 129], sizes = [8, 256], strides = [1, 1]} : vector<8x512xf32> to vector<8x256xf32>
    %74 = vector.extract_strided_slice %58 {offsets = [16, 0], sizes = [8, 8], strides = [1, 1]} : vector<24x8xf32> to vector<8x8xf32>
    %cst_38 = arith.constant dense<0.000000e+00> : vector<8x256xf32>
    %75 = tpu.matmul %74, %73, %cst_38 {dimension_numbers = #tpu.dot_dimension_numbers<[1], [0], [0], [1], [0, 0, 1, 1], [], []>} : vector<8x8xf32>, vector<8x256xf32>, vector<8x256xf32> -> vector<8x256xf32>
    %c15_i32_39 = arith.constant 15 : i32
    %76 = vector.broadcast %c15_i32_39 : i32 to vector<1x256xi32>
    %77 = arith.cmpi slt, %0, %76 : vector<1x256xi32>
    %cst_40 = arith.constant 0.000000e+00 : f32
    %78 = vector.shape_cast %77 : vector<1x256xi1> to vector<1x256xi1>
    %79 = vector.broadcast %78 : vector<1x256xi1> to vector<8x256xi1>
    %80 = vector.broadcast %cst_40 : f32 to vector<8x256xf32>
    %81 = arith.select %79, %75, %80 : vector<8x256xi1>, vector<8x256xf32>
    %82 = arith.addf %72, %81 : vector<8x256xf32>
    %c0_41 = arith.constant 0 : index
    %c0_42 = arith.constant 0 : index
    %83 = vector.load %arg12[%c0_41, %c0_42] : memref<8x1xf32, #tpu.memory_space<vmem>>, vector<8x1xf32>
    %84 = vector.broadcast %83 : vector<8x1xf32> to vector<8x256xf32>
    %85 = arith.addf %82, %84 : vector<8x256xf32>
    %c0_43 = arith.constant 0 : index
    %c0_44 = arith.constant 0 : index
    %86 = vector.load %arg13[%c0_43, %c0_44] : memref<24x8xf32, #tpu.memory_space<vmem>>, vector<24x8xf32>
    %cst_45 = arith.constant 0.000000e+00 : f32
    %87 = vector.broadcast %cst_45 : f32 to vector<8x128xf32>
    %88 = tpu.concatenate %87, %85, %87 in 1 : vector<8x128xf32>, vector<8x256xf32>, vector<8x128xf32> -> vector<8x512xf32>
    %89 = vector.extract_strided_slice %88 {offsets = [0, 112], sizes = [8, 256], strides = [1, 1]} : vector<8x512xf32> to vector<8x256xf32>
    %90 = vector.extract_strided_slice %86 {offsets = [0, 0], sizes = [8, 8], strides = [1, 1]} : vector<24x8xf32> to vector<8x8xf32>
    %cst_46 = arith.constant dense<0.000000e+00> : vector<8x256xf32>
    %91 = tpu.matmul %90, %89, %cst_46 {dimension_numbers = #tpu.dot_dimension_numbers<[1], [0], [0], [1], [0, 0, 1, 1], [], []>} : vector<8x8xf32>, vector<8x256xf32>, vector<8x256xf32> -> vector<8x256xf32>
    %92 = vector.extract_strided_slice %86 {offsets = [8, 0], sizes = [8, 8], strides = [1, 1]} : vector<24x8xf32> to vector<8x8xf32>
    %cst_47 = arith.constant dense<0.000000e+00> : vector<8x256xf32>
    %93 = tpu.matmul %92, %85, %cst_47 {dimension_numbers = #tpu.dot_dimension_numbers<[1], [0], [0], [1], [0, 0, 1, 1], [], []>} : vector<8x8xf32>, vector<8x256xf32>, vector<8x256xf32> -> vector<8x256xf32>
    %94 = arith.addf %91, %93 : vector<8x256xf32>
    %95 = vector.extract_strided_slice %88 {offsets = [0, 144], sizes = [8, 256], strides = [1, 1]} : vector<8x512xf32> to vector<8x256xf32>
    %96 = vector.extract_strided_slice %86 {offsets = [16, 0], sizes = [8, 8], strides = [1, 1]} : vector<24x8xf32> to vector<8x8xf32>
    %cst_48 = arith.constant dense<0.000000e+00> : vector<8x256xf32>
    %97 = tpu.matmul %96, %95, %cst_48 {dimension_numbers = #tpu.dot_dimension_numbers<[1], [0], [0], [1], [0, 0, 1, 1], [], []>} : vector<8x8xf32>, vector<8x256xf32>, vector<8x256xf32> -> vector<8x256xf32>
    %98 = arith.addf %94, %97 : vector<8x256xf32>
    %c0_49 = arith.constant 0 : index
    %c0_50 = arith.constant 0 : index
    %99 = vector.load %arg14[%c0_49, %c0_50] : memref<8x1xf32, #tpu.memory_space<vmem>>, vector<8x1xf32>
    %100 = vector.broadcast %99 : vector<8x1xf32> to vector<8x256xf32>
    %101 = arith.addf %98, %100 : vector<8x256xf32>
    %c0_51 = arith.constant 0 : index
    %c0_52 = arith.constant 0 : index
    %102 = vector.load %arg15[%c0_51, %c0_52] : memref<72x8xf32, #tpu.memory_space<vmem>>, vector<72x8xf32>
    %cst_53 = arith.constant 0.000000e+00 : f32
    %103 = vector.broadcast %cst_53 : f32 to vector<8x128xf32>
    %104 = tpu.concatenate %103, %101, %103 in 1 : vector<8x128xf32>, vector<8x256xf32>, vector<8x128xf32> -> vector<8x512xf32>
    %105 = vector.extract_strided_slice %104 {offsets = [0, 77], sizes = [8, 256], strides = [1, 1]} : vector<8x512xf32> to vector<8x256xf32>
    %106 = vector.extract_strided_slice %102 {offsets = [0, 0], sizes = [8, 8], strides = [1, 1]} : vector<72x8xf32> to vector<8x8xf32>
    %cst_54 = arith.constant dense<0.000000e+00> : vector<8x256xf32>
    %107 = tpu.matmul %106, %105, %cst_54 {dimension_numbers = #tpu.dot_dimension_numbers<[1], [0], [0], [1], [0, 0, 1, 1], [], []>} : vector<8x8xf32>, vector<8x256xf32>, vector<8x256xf32> -> vector<8x256xf32>
    %c3_i32 = arith.constant 3 : i32
    %108 = vector.broadcast %c3_i32 : i32 to vector<1x256xi32>
    %109 = arith.cmpi sge, %0, %108 : vector<1x256xi32>
    %cst_55 = arith.constant 0.000000e+00 : f32
    %110 = vector.shape_cast %109 : vector<1x256xi1> to vector<1x256xi1>
    %111 = vector.broadcast %110 : vector<1x256xi1> to vector<8x256xi1>
    %112 = vector.broadcast %cst_55 : f32 to vector<8x256xf32>
    %113 = arith.select %111, %107, %112 : vector<8x256xi1>, vector<8x256xf32>
    %114 = vector.extract_strided_slice %104 {offsets = [0, 80], sizes = [8, 256], strides = [1, 1]} : vector<8x512xf32> to vector<8x256xf32>
    %115 = vector.extract_strided_slice %102 {offsets = [8, 0], sizes = [8, 8], strides = [1, 1]} : vector<72x8xf32> to vector<8x8xf32>
    %cst_56 = arith.constant dense<0.000000e+00> : vector<8x256xf32>
    %116 = tpu.matmul %115, %114, %cst_56 {dimension_numbers = #tpu.dot_dimension_numbers<[1], [0], [0], [1], [0, 0, 1, 1], [], []>} : vector<8x8xf32>, vector<8x256xf32>, vector<8x256xf32> -> vector<8x256xf32>
    %117 = arith.addf %113, %116 : vector<8x256xf32>
    %118 = vector.extract_strided_slice %104 {offsets = [0, 83], sizes = [8, 256], strides = [1, 1]} : vector<8x512xf32> to vector<8x256xf32>
    %119 = vector.extract_strided_slice %102 {offsets = [16, 0], sizes = [8, 8], strides = [1, 1]} : vector<72x8xf32> to vector<8x8xf32>
    %cst_57 = arith.constant dense<0.000000e+00> : vector<8x256xf32>
    %120 = tpu.matmul %119, %118, %cst_57 {dimension_numbers = #tpu.dot_dimension_numbers<[1], [0], [0], [1], [0, 0, 1, 1], [], []>} : vector<8x8xf32>, vector<8x256xf32>, vector<8x256xf32> -> vector<8x256xf32>
    %c13_i32 = arith.constant 13 : i32
    %121 = vector.broadcast %c13_i32 : i32 to vector<1x256xi32>
    %122 = arith.cmpi slt, %0, %121 : vector<1x256xi32>
    %cst_58 = arith.constant 0.000000e+00 : f32
    %123 = vector.shape_cast %122 : vector<1x256xi1> to vector<1x256xi1>
    %124 = vector.broadcast %123 : vector<1x256xi1> to vector<8x256xi1>
    %125 = vector.broadcast %cst_58 : f32 to vector<8x256xf32>
    %126 = arith.select %124, %120, %125 : vector<8x256xi1>, vector<8x256xf32>
    %127 = arith.addf %117, %126 : vector<8x256xf32>
    %128 = vector.extract_strided_slice %104 {offsets = [0, 125], sizes = [8, 256], strides = [1, 1]} : vector<8x512xf32> to vector<8x256xf32>
    %129 = vector.extract_strided_slice %102 {offsets = [24, 0], sizes = [8, 8], strides = [1, 1]} : vector<72x8xf32> to vector<8x8xf32>
    %cst_59 = arith.constant dense<0.000000e+00> : vector<8x256xf32>
    %130 = tpu.matmul %129, %128, %cst_59 {dimension_numbers = #tpu.dot_dimension_numbers<[1], [0], [0], [1], [0, 0, 1, 1], [], []>} : vector<8x8xf32>, vector<8x256xf32>, vector<8x256xf32> -> vector<8x256xf32>
    %c3_i32_60 = arith.constant 3 : i32
    %131 = vector.broadcast %c3_i32_60 : i32 to vector<1x256xi32>
    %132 = arith.cmpi sge, %0, %131 : vector<1x256xi32>
    %cst_61 = arith.constant 0.000000e+00 : f32
    %133 = vector.shape_cast %132 : vector<1x256xi1> to vector<1x256xi1>
    %134 = vector.broadcast %133 : vector<1x256xi1> to vector<8x256xi1>
    %135 = vector.broadcast %cst_61 : f32 to vector<8x256xf32>
    %136 = arith.select %134, %130, %135 : vector<8x256xi1>, vector<8x256xf32>
    %137 = arith.addf %127, %136 : vector<8x256xf32>
    %138 = vector.extract_strided_slice %102 {offsets = [32, 0], sizes = [8, 8], strides = [1, 1]} : vector<72x8xf32> to vector<8x8xf32>
    %cst_62 = arith.constant dense<0.000000e+00> : vector<8x256xf32>
    %139 = tpu.matmul %138, %101, %cst_62 {dimension_numbers = #tpu.dot_dimension_numbers<[1], [0], [0], [1], [0, 0, 1, 1], [], []>} : vector<8x8xf32>, vector<8x256xf32>, vector<8x256xf32> -> vector<8x256xf32>
    %140 = arith.addf %137, %139 : vector<8x256xf32>
    %141 = vector.extract_strided_slice %104 {offsets = [0, 131], sizes = [8, 256], strides = [1, 1]} : vector<8x512xf32> to vector<8x256xf32>
    %142 = vector.extract_strided_slice %102 {offsets = [40, 0], sizes = [8, 8], strides = [1, 1]} : vector<72x8xf32> to vector<8x8xf32>
    %cst_63 = arith.constant dense<0.000000e+00> : vector<8x256xf32>
    %143 = tpu.matmul %142, %141, %cst_63 {dimension_numbers = #tpu.dot_dimension_numbers<[1], [0], [0], [1], [0, 0, 1, 1], [], []>} : vector<8x8xf32>, vector<8x256xf32>, vector<8x256xf32> -> vector<8x256xf32>
    %c13_i32_64 = arith.constant 13 : i32
    %144 = vector.broadcast %c13_i32_64 : i32 to vector<1x256xi32>
    %145 = arith.cmpi slt, %0, %144 : vector<1x256xi32>
    %cst_65 = arith.constant 0.000000e+00 : f32
    %146 = vector.shape_cast %145 : vector<1x256xi1> to vector<1x256xi1>
    %147 = vector.broadcast %146 : vector<1x256xi1> to vector<8x256xi1>
    %148 = vector.broadcast %cst_65 : f32 to vector<8x256xf32>
    %149 = arith.select %147, %143, %148 : vector<8x256xi1>, vector<8x256xf32>
    %150 = arith.addf %140, %149 : vector<8x256xf32>
    %151 = vector.extract_strided_slice %104 {offsets = [0, 173], sizes = [8, 256], strides = [1, 1]} : vector<8x512xf32> to vector<8x256xf32>
    %152 = vector.extract_strided_slice %102 {offsets = [48, 0], sizes = [8, 8], strides = [1, 1]} : vector<72x8xf32> to vector<8x8xf32>
    %cst_66 = arith.constant dense<0.000000e+00> : vector<8x256xf32>
    %153 = tpu.matmul %152, %151, %cst_66 {dimension_numbers = #tpu.dot_dimension_numbers<[1], [0], [0], [1], [0, 0, 1, 1], [], []>} : vector<8x8xf32>, vector<8x256xf32>, vector<8x256xf32> -> vector<8x256xf32>
    %c3_i32_67 = arith.constant 3 : i32
    %154 = vector.broadcast %c3_i32_67 : i32 to vector<1x256xi32>
    %155 = arith.cmpi sge, %0, %154 : vector<1x256xi32>
    %cst_68 = arith.constant 0.000000e+00 : f32
    %156 = vector.shape_cast %155 : vector<1x256xi1> to vector<1x256xi1>
    %157 = vector.broadcast %156 : vector<1x256xi1> to vector<8x256xi1>
    %158 = vector.broadcast %cst_68 : f32 to vector<8x256xf32>
    %159 = arith.select %157, %153, %158 : vector<8x256xi1>, vector<8x256xf32>
    %160 = arith.addf %150, %159 : vector<8x256xf32>
    %161 = vector.extract_strided_slice %104 {offsets = [0, 176], sizes = [8, 256], strides = [1, 1]} : vector<8x512xf32> to vector<8x256xf32>
    %162 = vector.extract_strided_slice %102 {offsets = [56, 0], sizes = [8, 8], strides = [1, 1]} : vector<72x8xf32> to vector<8x8xf32>
    %cst_69 = arith.constant dense<0.000000e+00> : vector<8x256xf32>
    %163 = tpu.matmul %162, %161, %cst_69 {dimension_numbers = #tpu.dot_dimension_numbers<[1], [0], [0], [1], [0, 0, 1, 1], [], []>} : vector<8x8xf32>, vector<8x256xf32>, vector<8x256xf32> -> vector<8x256xf32>
    %164 = arith.addf %160, %163 : vector<8x256xf32>
    %165 = vector.extract_strided_slice %104 {offsets = [0, 179], sizes = [8, 256], strides = [1, 1]} : vector<8x512xf32> to vector<8x256xf32>
    %166 = vector.extract_strided_slice %102 {offsets = [64, 0], sizes = [8, 8], strides = [1, 1]} : vector<72x8xf32> to vector<8x8xf32>
    %cst_70 = arith.constant dense<0.000000e+00> : vector<8x256xf32>
    %167 = tpu.matmul %166, %165, %cst_70 {dimension_numbers = #tpu.dot_dimension_numbers<[1], [0], [0], [1], [0, 0, 1, 1], [], []>} : vector<8x8xf32>, vector<8x256xf32>, vector<8x256xf32> -> vector<8x256xf32>
    %c13_i32_71 = arith.constant 13 : i32
    %168 = vector.broadcast %c13_i32_71 : i32 to vector<1x256xi32>
    %169 = arith.cmpi slt, %0, %168 : vector<1x256xi32>
    %cst_72 = arith.constant 0.000000e+00 : f32
    %170 = vector.shape_cast %169 : vector<1x256xi1> to vector<1x256xi1>
    %171 = vector.broadcast %170 : vector<1x256xi1> to vector<8x256xi1>
    %172 = vector.broadcast %cst_72 : f32 to vector<8x256xf32>
    %173 = arith.select %171, %167, %172 : vector<8x256xi1>, vector<8x256xf32>
    %174 = arith.addf %164, %173 : vector<8x256xf32>
    %c0_73 = arith.constant 0 : index
    %c0_74 = arith.constant 0 : index
    %175 = vector.load %arg16[%c0_73, %c0_74] : memref<8x1xf32, #tpu.memory_space<vmem>>, vector<8x1xf32>
    %176 = vector.broadcast %175 : vector<8x1xf32> to vector<8x256xf32>
    %177 = arith.addf %174, %176 : vector<8x256xf32>
    %178 = arith.addf %177, %56 : vector<8x256xf32>
    %c0_75 = arith.constant 0 : index
    %c0_76 = arith.constant 0 : index
    %179 = vector.load %arg17[%c0_75, %c0_76] : memref<40x8xf32, #tpu.memory_space<vmem>>, vector<40x8xf32>
    %cst_77 = arith.constant 0.000000e+00 : f32
    %180 = vector.broadcast %cst_77 : f32 to vector<8x128xf32>
    %181 = tpu.concatenate %180, %178, %180 in 1 : vector<8x128xf32>, vector<8x256xf32>, vector<8x128xf32> -> vector<8x512xf32>
    %182 = vector.extract_strided_slice %181 {offsets = [0, 126], sizes = [8, 256], strides = [1, 1]} : vector<8x512xf32> to vector<8x256xf32>
    %183 = vector.extract_strided_slice %179 {offsets = [0, 0], sizes = [8, 8], strides = [1, 1]} : vector<40x8xf32> to vector<8x8xf32>
    %cst_78 = arith.constant dense<0.000000e+00> : vector<8x256xf32>
    %184 = tpu.matmul %183, %182, %cst_78 {dimension_numbers = #tpu.dot_dimension_numbers<[1], [0], [0], [1], [0, 0, 1, 1], [], []>} : vector<8x8xf32>, vector<8x256xf32>, vector<8x256xf32> -> vector<8x256xf32>
    %c2_i32 = arith.constant 2 : i32
    %185 = vector.broadcast %c2_i32 : i32 to vector<1x256xi32>
    %186 = arith.cmpi sge, %0, %185 : vector<1x256xi32>
    %cst_79 = arith.constant 0.000000e+00 : f32
    %187 = vector.shape_cast %186 : vector<1x256xi1> to vector<1x256xi1>
    %188 = vector.broadcast %187 : vector<1x256xi1> to vector<8x256xi1>
    %189 = vector.broadcast %cst_79 : f32 to vector<8x256xf32>
    %190 = arith.select %188, %184, %189 : vector<8x256xi1>, vector<8x256xf32>
    %191 = vector.extract_strided_slice %181 {offsets = [0, 127], sizes = [8, 256], strides = [1, 1]} : vector<8x512xf32> to vector<8x256xf32>
    %192 = vector.extract_strided_slice %179 {offsets = [8, 0], sizes = [8, 8], strides = [1, 1]} : vector<40x8xf32> to vector<8x8xf32>
    %cst_80 = arith.constant dense<0.000000e+00> : vector<8x256xf32>
    %193 = tpu.matmul %192, %191, %cst_80 {dimension_numbers = #tpu.dot_dimension_numbers<[1], [0], [0], [1], [0, 0, 1, 1], [], []>} : vector<8x8xf32>, vector<8x256xf32>, vector<8x256xf32> -> vector<8x256xf32>
    %c1_i32_81 = arith.constant 1 : i32
    %194 = vector.broadcast %c1_i32_81 : i32 to vector<1x256xi32>
    %195 = arith.cmpi sge, %0, %194 : vector<1x256xi32>
    %cst_82 = arith.constant 0.000000e+00 : f32
    %196 = vector.shape_cast %195 : vector<1x256xi1> to vector<1x256xi1>
    %197 = vector.broadcast %196 : vector<1x256xi1> to vector<8x256xi1>
    %198 = vector.broadcast %cst_82 : f32 to vector<8x256xf32>
    %199 = arith.select %197, %193, %198 : vector<8x256xi1>, vector<8x256xf32>
    %200 = arith.addf %190, %199 : vector<8x256xf32>
    %201 = vector.extract_strided_slice %179 {offsets = [16, 0], sizes = [8, 8], strides = [1, 1]} : vector<40x8xf32> to vector<8x8xf32>
    %cst_83 = arith.constant dense<0.000000e+00> : vector<8x256xf32>
    %202 = tpu.matmul %201, %178, %cst_83 {dimension_numbers = #tpu.dot_dimension_numbers<[1], [0], [0], [1], [0, 0, 1, 1], [], []>} : vector<8x8xf32>, vector<8x256xf32>, vector<8x256xf32> -> vector<8x256xf32>
    %203 = arith.addf %200, %202 : vector<8x256xf32>
    %204 = vector.extract_strided_slice %181 {offsets = [0, 129], sizes = [8, 256], strides = [1, 1]} : vector<8x512xf32> to vector<8x256xf32>
    %205 = vector.extract_strided_slice %179 {offsets = [24, 0], sizes = [8, 8], strides = [1, 1]} : vector<40x8xf32> to vector<8x8xf32>
    %cst_84 = arith.constant dense<0.000000e+00> : vector<8x256xf32>
    %206 = tpu.matmul %205, %204, %cst_84 {dimension_numbers = #tpu.dot_dimension_numbers<[1], [0], [0], [1], [0, 0, 1, 1], [], []>} : vector<8x8xf32>, vector<8x256xf32>, vector<8x256xf32> -> vector<8x256xf32>
    %c15_i32_85 = arith.constant 15 : i32
    %207 = vector.broadcast %c15_i32_85 : i32 to vector<1x256xi32>
    %208 = arith.cmpi slt, %0, %207 : vector<1x256xi32>
    %cst_86 = arith.constant 0.000000e+00 : f32
    %209 = vector.shape_cast %208 : vector<1x256xi1> to vector<1x256xi1>
    %210 = vector.broadcast %209 : vector<1x256xi1> to vector<8x256xi1>
    %211 = vector.broadcast %cst_86 : f32 to vector<8x256xf32>
    %212 = arith.select %210, %206, %211 : vector<8x256xi1>, vector<8x256xf32>
    %213 = arith.addf %203, %212 : vector<8x256xf32>
    %214 = vector.extract_strided_slice %181 {offsets = [0, 130], sizes = [8, 256], strides = [1, 1]} : vector<8x512xf32> to vector<8x256xf32>
    %215 = vector.extract_strided_slice %179 {offsets = [32, 0], sizes = [8, 8], strides = [1, 1]} : vector<40x8xf32> to vector<8x8xf32>
    %cst_87 = arith.constant dense<0.000000e+00> : vector<8x256xf32>
    %216 = tpu.matmul %215, %214, %cst_87 {dimension_numbers = #tpu.dot_dimension_numbers<[1], [0], [0], [1], [0, 0, 1, 1], [], []>} : vector<8x8xf32>, vector<8x256xf32>, vector<8x256xf32> -> vector<8x256xf32>
    %c14_i32 = arith.constant 14 : i32
    %217 = vector.broadcast %c14_i32 : i32 to vector<1x256xi32>
    %218 = arith.cmpi slt, %0, %217 : vector<1x256xi32>
    %cst_88 = arith.constant 0.000000e+00 : f32
    %219 = vector.shape_cast %218 : vector<1x256xi1> to vector<1x256xi1>
    %220 = vector.broadcast %219 : vector<1x256xi1> to vector<8x256xi1>
    %221 = vector.broadcast %cst_88 : f32 to vector<8x256xf32>
    %222 = arith.select %220, %216, %221 : vector<8x256xi1>, vector<8x256xf32>
    %223 = arith.addf %213, %222 : vector<8x256xf32>
    %c0_89 = arith.constant 0 : index
    %c0_90 = arith.constant 0 : index
    %224 = vector.load %arg18[%c0_89, %c0_90] : memref<8x1xf32, #tpu.memory_space<vmem>>, vector<8x1xf32>
    %225 = vector.broadcast %224 : vector<8x1xf32> to vector<8x256xf32>
    %226 = arith.addf %223, %225 : vector<8x256xf32>
    %c0_91 = arith.constant 0 : index
    %c0_92 = arith.constant 0 : index
    %227 = vector.load %arg19[%c0_91, %c0_92] : memref<40x8xf32, #tpu.memory_space<vmem>>, vector<40x8xf32>
    %cst_93 = arith.constant 0.000000e+00 : f32
    %228 = vector.broadcast %cst_93 : f32 to vector<8x128xf32>
    %229 = tpu.concatenate %228, %226, %228 in 1 : vector<8x128xf32>, vector<8x256xf32>, vector<8x128xf32> -> vector<8x512xf32>
    %230 = vector.extract_strided_slice %229 {offsets = [0, 96], sizes = [8, 256], strides = [1, 1]} : vector<8x512xf32> to vector<8x256xf32>
    %231 = vector.extract_strided_slice %227 {offsets = [0, 0], sizes = [8, 8], strides = [1, 1]} : vector<40x8xf32> to vector<8x8xf32>
    %cst_94 = arith.constant dense<0.000000e+00> : vector<8x256xf32>
    %232 = tpu.matmul %231, %230, %cst_94 {dimension_numbers = #tpu.dot_dimension_numbers<[1], [0], [0], [1], [0, 0, 1, 1], [], []>} : vector<8x8xf32>, vector<8x256xf32>, vector<8x256xf32> -> vector<8x256xf32>
    %233 = vector.extract_strided_slice %229 {offsets = [0, 112], sizes = [8, 256], strides = [1, 1]} : vector<8x512xf32> to vector<8x256xf32>
    %234 = vector.extract_strided_slice %227 {offsets = [8, 0], sizes = [8, 8], strides = [1, 1]} : vector<40x8xf32> to vector<8x8xf32>
    %cst_95 = arith.constant dense<0.000000e+00> : vector<8x256xf32>
    %235 = tpu.matmul %234, %233, %cst_95 {dimension_numbers = #tpu.dot_dimension_numbers<[1], [0], [0], [1], [0, 0, 1, 1], [], []>} : vector<8x8xf32>, vector<8x256xf32>, vector<8x256xf32> -> vector<8x256xf32>
    %236 = arith.addf %232, %235 : vector<8x256xf32>
    %237 = vector.extract_strided_slice %227 {offsets = [16, 0], sizes = [8, 8], strides = [1, 1]} : vector<40x8xf32> to vector<8x8xf32>
    %cst_96 = arith.constant dense<0.000000e+00> : vector<8x256xf32>
    %238 = tpu.matmul %237, %226, %cst_96 {dimension_numbers = #tpu.dot_dimension_numbers<[1], [0], [0], [1], [0, 0, 1, 1], [], []>} : vector<8x8xf32>, vector<8x256xf32>, vector<8x256xf32> -> vector<8x256xf32>
    %239 = arith.addf %236, %238 : vector<8x256xf32>
    %240 = vector.extract_strided_slice %229 {offsets = [0, 144], sizes = [8, 256], strides = [1, 1]} : vector<8x512xf32> to vector<8x256xf32>
    %241 = vector.extract_strided_slice %227 {offsets = [24, 0], sizes = [8, 8], strides = [1, 1]} : vector<40x8xf32> to vector<8x8xf32>
    %cst_97 = arith.constant dense<0.000000e+00> : vector<8x256xf32>
    %242 = tpu.matmul %241, %240, %cst_97 {dimension_numbers = #tpu.dot_dimension_numbers<[1], [0], [0], [1], [0, 0, 1, 1], [], []>} : vector<8x8xf32>, vector<8x256xf32>, vector<8x256xf32> -> vector<8x256xf32>
    %243 = arith.addf %239, %242 : vector<8x256xf32>
    %244 = vector.extract_strided_slice %229 {offsets = [0, 160], sizes = [8, 256], strides = [1, 1]} : vector<8x512xf32> to vector<8x256xf32>
    %245 = vector.extract_strided_slice %227 {offsets = [32, 0], sizes = [8, 8], strides = [1, 1]} : vector<40x8xf32> to vector<8x8xf32>
    %cst_98 = arith.constant dense<0.000000e+00> : vector<8x256xf32>
    %246 = tpu.matmul %245, %244, %cst_98 {dimension_numbers = #tpu.dot_dimension_numbers<[1], [0], [0], [1], [0, 0, 1, 1], [], []>} : vector<8x8xf32>, vector<8x256xf32>, vector<8x256xf32> -> vector<8x256xf32>
    %247 = arith.addf %243, %246 : vector<8x256xf32>
    %c0_99 = arith.constant 0 : index
    %c0_100 = arith.constant 0 : index
    %248 = vector.load %arg20[%c0_99, %c0_100] : memref<8x1xf32, #tpu.memory_space<vmem>>, vector<8x1xf32>
    %249 = vector.broadcast %248 : vector<8x1xf32> to vector<8x256xf32>
    %250 = arith.addf %247, %249 : vector<8x256xf32>
    %c0_101 = arith.constant 0 : index
    %c0_102 = arith.constant 0 : index
    %251 = vector.load %arg21[%c0_101, %c0_102] : memref<72x8xf32, #tpu.memory_space<vmem>>, vector<72x8xf32>
    %cst_103 = arith.constant 0.000000e+00 : f32
    %252 = vector.broadcast %cst_103 : f32 to vector<8x128xf32>
    %253 = tpu.concatenate %252, %250, %252 in 1 : vector<8x128xf32>, vector<8x256xf32>, vector<8x128xf32> -> vector<8x512xf32>
    %254 = vector.extract_strided_slice %253 {offsets = [0, 43], sizes = [8, 256], strides = [1, 1]} : vector<8x512xf32> to vector<8x256xf32>
    %255 = vector.extract_strided_slice %251 {offsets = [0, 0], sizes = [8, 8], strides = [1, 1]} : vector<72x8xf32> to vector<8x8xf32>
    %cst_104 = arith.constant dense<0.000000e+00> : vector<8x256xf32>
    %256 = tpu.matmul %255, %254, %cst_104 {dimension_numbers = #tpu.dot_dimension_numbers<[1], [0], [0], [1], [0, 0, 1, 1], [], []>} : vector<8x8xf32>, vector<8x256xf32>, vector<8x256xf32> -> vector<8x256xf32>
    %c5_i32 = arith.constant 5 : i32
    %257 = vector.broadcast %c5_i32 : i32 to vector<1x256xi32>
    %258 = arith.cmpi sge, %0, %257 : vector<1x256xi32>
    %cst_105 = arith.constant 0.000000e+00 : f32
    %259 = vector.shape_cast %258 : vector<1x256xi1> to vector<1x256xi1>
    %260 = vector.broadcast %259 : vector<1x256xi1> to vector<8x256xi1>
    %261 = vector.broadcast %cst_105 : f32 to vector<8x256xf32>
    %262 = arith.select %260, %256, %261 : vector<8x256xi1>, vector<8x256xf32>
    %263 = vector.extract_strided_slice %253 {offsets = [0, 48], sizes = [8, 256], strides = [1, 1]} : vector<8x512xf32> to vector<8x256xf32>
    %264 = vector.extract_strided_slice %251 {offsets = [8, 0], sizes = [8, 8], strides = [1, 1]} : vector<72x8xf32> to vector<8x8xf32>
    %cst_106 = arith.constant dense<0.000000e+00> : vector<8x256xf32>
    %265 = tpu.matmul %264, %263, %cst_106 {dimension_numbers = #tpu.dot_dimension_numbers<[1], [0], [0], [1], [0, 0, 1, 1], [], []>} : vector<8x8xf32>, vector<8x256xf32>, vector<8x256xf32> -> vector<8x256xf32>
    %266 = arith.addf %262, %265 : vector<8x256xf32>
    %267 = vector.extract_strided_slice %253 {offsets = [0, 53], sizes = [8, 256], strides = [1, 1]} : vector<8x512xf32> to vector<8x256xf32>
    %268 = vector.extract_strided_slice %251 {offsets = [16, 0], sizes = [8, 8], strides = [1, 1]} : vector<72x8xf32> to vector<8x8xf32>
    %cst_107 = arith.constant dense<0.000000e+00> : vector<8x256xf32>
    %269 = tpu.matmul %268, %267, %cst_107 {dimension_numbers = #tpu.dot_dimension_numbers<[1], [0], [0], [1], [0, 0, 1, 1], [], []>} : vector<8x8xf32>, vector<8x256xf32>, vector<8x256xf32> -> vector<8x256xf32>
    %c11_i32 = arith.constant 11 : i32
    %270 = vector.broadcast %c11_i32 : i32 to vector<1x256xi32>
    %271 = arith.cmpi slt, %0, %270 : vector<1x256xi32>
    %cst_108 = arith.constant 0.000000e+00 : f32
    %272 = vector.shape_cast %271 : vector<1x256xi1> to vector<1x256xi1>
    %273 = vector.broadcast %272 : vector<1x256xi1> to vector<8x256xi1>
    %274 = vector.broadcast %cst_108 : f32 to vector<8x256xf32>
    %275 = arith.select %273, %269, %274 : vector<8x256xi1>, vector<8x256xf32>
    %276 = arith.addf %266, %275 : vector<8x256xf32>
    %277 = vector.extract_strided_slice %253 {offsets = [0, 123], sizes = [8, 256], strides = [1, 1]} : vector<8x512xf32> to vector<8x256xf32>
    %278 = vector.extract_strided_slice %251 {offsets = [24, 0], sizes = [8, 8], strides = [1, 1]} : vector<72x8xf32> to vector<8x8xf32>
    %cst_109 = arith.constant dense<0.000000e+00> : vector<8x256xf32>
    %279 = tpu.matmul %278, %277, %cst_109 {dimension_numbers = #tpu.dot_dimension_numbers<[1], [0], [0], [1], [0, 0, 1, 1], [], []>} : vector<8x8xf32>, vector<8x256xf32>, vector<8x256xf32> -> vector<8x256xf32>
    %c5_i32_110 = arith.constant 5 : i32
    %280 = vector.broadcast %c5_i32_110 : i32 to vector<1x256xi32>
    %281 = arith.cmpi sge, %0, %280 : vector<1x256xi32>
    %cst_111 = arith.constant 0.000000e+00 : f32
    %282 = vector.shape_cast %281 : vector<1x256xi1> to vector<1x256xi1>
    %283 = vector.broadcast %282 : vector<1x256xi1> to vector<8x256xi1>
    %284 = vector.broadcast %cst_111 : f32 to vector<8x256xf32>
    %285 = arith.select %283, %279, %284 : vector<8x256xi1>, vector<8x256xf32>
    %286 = arith.addf %276, %285 : vector<8x256xf32>
    %287 = vector.extract_strided_slice %251 {offsets = [32, 0], sizes = [8, 8], strides = [1, 1]} : vector<72x8xf32> to vector<8x8xf32>
    %cst_112 = arith.constant dense<0.000000e+00> : vector<8x256xf32>
    %288 = tpu.matmul %287, %250, %cst_112 {dimension_numbers = #tpu.dot_dimension_numbers<[1], [0], [0], [1], [0, 0, 1, 1], [], []>} : vector<8x8xf32>, vector<8x256xf32>, vector<8x256xf32> -> vector<8x256xf32>
    %289 = arith.addf %286, %288 : vector<8x256xf32>
    %290 = vector.extract_strided_slice %253 {offsets = [0, 133], sizes = [8, 256], strides = [1, 1]} : vector<8x512xf32> to vector<8x256xf32>
    %291 = vector.extract_strided_slice %251 {offsets = [40, 0], sizes = [8, 8], strides = [1, 1]} : vector<72x8xf32> to vector<8x8xf32>
    %cst_113 = arith.constant dense<0.000000e+00> : vector<8x256xf32>
    %292 = tpu.matmul %291, %290, %cst_113 {dimension_numbers = #tpu.dot_dimension_numbers<[1], [0], [0], [1], [0, 0, 1, 1], [], []>} : vector<8x8xf32>, vector<8x256xf32>, vector<8x256xf32> -> vector<8x256xf32>
    %c11_i32_114 = arith.constant 11 : i32
    %293 = vector.broadcast %c11_i32_114 : i32 to vector<1x256xi32>
    %294 = arith.cmpi slt, %0, %293 : vector<1x256xi32>
    %cst_115 = arith.constant 0.000000e+00 : f32
    %295 = vector.shape_cast %294 : vector<1x256xi1> to vector<1x256xi1>
    %296 = vector.broadcast %295 : vector<1x256xi1> to vector<8x256xi1>
    %297 = vector.broadcast %cst_115 : f32 to vector<8x256xf32>
    %298 = arith.select %296, %292, %297 : vector<8x256xi1>, vector<8x256xf32>
    %299 = arith.addf %289, %298 : vector<8x256xf32>
    %300 = vector.extract_strided_slice %253 {offsets = [0, 203], sizes = [8, 256], strides = [1, 1]} : vector<8x512xf32> to vector<8x256xf32>
    %301 = vector.extract_strided_slice %251 {offsets = [48, 0], sizes = [8, 8], strides = [1, 1]} : vector<72x8xf32> to vector<8x8xf32>
    %cst_116 = arith.constant dense<0.000000e+00> : vector<8x256xf32>
    %302 = tpu.matmul %301, %300, %cst_116 {dimension_numbers = #tpu.dot_dimension_numbers<[1], [0], [0], [1], [0, 0, 1, 1], [], []>} : vector<8x8xf32>, vector<8x256xf32>, vector<8x256xf32> -> vector<8x256xf32>
    %c5_i32_117 = arith.constant 5 : i32
    %303 = vector.broadcast %c5_i32_117 : i32 to vector<1x256xi32>
    %304 = arith.cmpi sge, %0, %303 : vector<1x256xi32>
    %cst_118 = arith.constant 0.000000e+00 : f32
    %305 = vector.shape_cast %304 : vector<1x256xi1> to vector<1x256xi1>
    %306 = vector.broadcast %305 : vector<1x256xi1> to vector<8x256xi1>
    %307 = vector.broadcast %cst_118 : f32 to vector<8x256xf32>
    %308 = arith.select %306, %302, %307 : vector<8x256xi1>, vector<8x256xf32>
    %309 = arith.addf %299, %308 : vector<8x256xf32>
    %310 = vector.extract_strided_slice %253 {offsets = [0, 208], sizes = [8, 256], strides = [1, 1]} : vector<8x512xf32> to vector<8x256xf32>
    %311 = vector.extract_strided_slice %251 {offsets = [56, 0], sizes = [8, 8], strides = [1, 1]} : vector<72x8xf32> to vector<8x8xf32>
    %cst_119 = arith.constant dense<0.000000e+00> : vector<8x256xf32>
    %312 = tpu.matmul %311, %310, %cst_119 {dimension_numbers = #tpu.dot_dimension_numbers<[1], [0], [0], [1], [0, 0, 1, 1], [], []>} : vector<8x8xf32>, vector<8x256xf32>, vector<8x256xf32> -> vector<8x256xf32>
    %313 = arith.addf %309, %312 : vector<8x256xf32>
    %314 = vector.extract_strided_slice %253 {offsets = [0, 213], sizes = [8, 256], strides = [1, 1]} : vector<8x512xf32> to vector<8x256xf32>
    %315 = vector.extract_strided_slice %251 {offsets = [64, 0], sizes = [8, 8], strides = [1, 1]} : vector<72x8xf32> to vector<8x8xf32>
    %cst_120 = arith.constant dense<0.000000e+00> : vector<8x256xf32>
    %316 = tpu.matmul %315, %314, %cst_120 {dimension_numbers = #tpu.dot_dimension_numbers<[1], [0], [0], [1], [0, 0, 1, 1], [], []>} : vector<8x8xf32>, vector<8x256xf32>, vector<8x256xf32> -> vector<8x256xf32>
    %c11_i32_121 = arith.constant 11 : i32
    %317 = vector.broadcast %c11_i32_121 : i32 to vector<1x256xi32>
    %318 = arith.cmpi slt, %0, %317 : vector<1x256xi32>
    %cst_122 = arith.constant 0.000000e+00 : f32
    %319 = vector.shape_cast %318 : vector<1x256xi1> to vector<1x256xi1>
    %320 = vector.broadcast %319 : vector<1x256xi1> to vector<8x256xi1>
    %321 = vector.broadcast %cst_122 : f32 to vector<8x256xf32>
    %322 = arith.select %320, %316, %321 : vector<8x256xi1>, vector<8x256xf32>
    %323 = arith.addf %313, %322 : vector<8x256xf32>
    %c0_123 = arith.constant 0 : index
    %c0_124 = arith.constant 0 : index
    %324 = vector.load %arg22[%c0_123, %c0_124] : memref<8x1xf32, #tpu.memory_space<vmem>>, vector<8x1xf32>
    %325 = vector.broadcast %324 : vector<8x1xf32> to vector<8x256xf32>
    %326 = arith.addf %323, %325 : vector<8x256xf32>
    %327 = arith.addf %326, %56 : vector<8x256xf32>
    %c0_125 = arith.constant 0 : index
    %c0_126 = arith.constant 0 : index
    %328 = vector.load %arg23[%c0_125, %c0_126] : memref<56x8xf32, #tpu.memory_space<vmem>>, vector<56x8xf32>
    %cst_127 = arith.constant 0.000000e+00 : f32
    %329 = vector.broadcast %cst_127 : f32 to vector<8x128xf32>
    %330 = tpu.concatenate %329, %327, %329 in 1 : vector<8x128xf32>, vector<8x256xf32>, vector<8x128xf32> -> vector<8x512xf32>
    %331 = vector.extract_strided_slice %330 {offsets = [0, 125], sizes = [8, 256], strides = [1, 1]} : vector<8x512xf32> to vector<8x256xf32>
    %332 = vector.extract_strided_slice %328 {offsets = [0, 0], sizes = [8, 8], strides = [1, 1]} : vector<56x8xf32> to vector<8x8xf32>
    %cst_128 = arith.constant dense<0.000000e+00> : vector<8x256xf32>
    %333 = tpu.matmul %332, %331, %cst_128 {dimension_numbers = #tpu.dot_dimension_numbers<[1], [0], [0], [1], [0, 0, 1, 1], [], []>} : vector<8x8xf32>, vector<8x256xf32>, vector<8x256xf32> -> vector<8x256xf32>
    %c3_i32_129 = arith.constant 3 : i32
    %334 = vector.broadcast %c3_i32_129 : i32 to vector<1x256xi32>
    %335 = arith.cmpi sge, %0, %334 : vector<1x256xi32>
    %cst_130 = arith.constant 0.000000e+00 : f32
    %336 = vector.shape_cast %335 : vector<1x256xi1> to vector<1x256xi1>
    %337 = vector.broadcast %336 : vector<1x256xi1> to vector<8x256xi1>
    %338 = vector.broadcast %cst_130 : f32 to vector<8x256xf32>
    %339 = arith.select %337, %333, %338 : vector<8x256xi1>, vector<8x256xf32>
    %340 = vector.extract_strided_slice %330 {offsets = [0, 126], sizes = [8, 256], strides = [1, 1]} : vector<8x512xf32> to vector<8x256xf32>
    %341 = vector.extract_strided_slice %328 {offsets = [8, 0], sizes = [8, 8], strides = [1, 1]} : vector<56x8xf32> to vector<8x8xf32>
    %cst_131 = arith.constant dense<0.000000e+00> : vector<8x256xf32>
    %342 = tpu.matmul %341, %340, %cst_131 {dimension_numbers = #tpu.dot_dimension_numbers<[1], [0], [0], [1], [0, 0, 1, 1], [], []>} : vector<8x8xf32>, vector<8x256xf32>, vector<8x256xf32> -> vector<8x256xf32>
    %c2_i32_132 = arith.constant 2 : i32
    %343 = vector.broadcast %c2_i32_132 : i32 to vector<1x256xi32>
    %344 = arith.cmpi sge, %0, %343 : vector<1x256xi32>
    %cst_133 = arith.constant 0.000000e+00 : f32
    %345 = vector.shape_cast %344 : vector<1x256xi1> to vector<1x256xi1>
    %346 = vector.broadcast %345 : vector<1x256xi1> to vector<8x256xi1>
    %347 = vector.broadcast %cst_133 : f32 to vector<8x256xf32>
    %348 = arith.select %346, %342, %347 : vector<8x256xi1>, vector<8x256xf32>
    %349 = arith.addf %339, %348 : vector<8x256xf32>
    %350 = vector.extract_strided_slice %330 {offsets = [0, 127], sizes = [8, 256], strides = [1, 1]} : vector<8x512xf32> to vector<8x256xf32>
    %351 = vector.extract_strided_slice %328 {offsets = [16, 0], sizes = [8, 8], strides = [1, 1]} : vector<56x8xf32> to vector<8x8xf32>
    %cst_134 = arith.constant dense<0.000000e+00> : vector<8x256xf32>
    %352 = tpu.matmul %351, %350, %cst_134 {dimension_numbers = #tpu.dot_dimension_numbers<[1], [0], [0], [1], [0, 0, 1, 1], [], []>} : vector<8x8xf32>, vector<8x256xf32>, vector<8x256xf32> -> vector<8x256xf32>
    %c1_i32_135 = arith.constant 1 : i32
    %353 = vector.broadcast %c1_i32_135 : i32 to vector<1x256xi32>
    %354 = arith.cmpi sge, %0, %353 : vector<1x256xi32>
    %cst_136 = arith.constant 0.000000e+00 : f32
    %355 = vector.shape_cast %354 : vector<1x256xi1> to vector<1x256xi1>
    %356 = vector.broadcast %355 : vector<1x256xi1> to vector<8x256xi1>
    %357 = vector.broadcast %cst_136 : f32 to vector<8x256xf32>
    %358 = arith.select %356, %352, %357 : vector<8x256xi1>, vector<8x256xf32>
    %359 = arith.addf %349, %358 : vector<8x256xf32>
    %360 = vector.extract_strided_slice %328 {offsets = [24, 0], sizes = [8, 8], strides = [1, 1]} : vector<56x8xf32> to vector<8x8xf32>
    %cst_137 = arith.constant dense<0.000000e+00> : vector<8x256xf32>
    %361 = tpu.matmul %360, %327, %cst_137 {dimension_numbers = #tpu.dot_dimension_numbers<[1], [0], [0], [1], [0, 0, 1, 1], [], []>} : vector<8x8xf32>, vector<8x256xf32>, vector<8x256xf32> -> vector<8x256xf32>
    %362 = arith.addf %359, %361 : vector<8x256xf32>
    %363 = vector.extract_strided_slice %330 {offsets = [0, 129], sizes = [8, 256], strides = [1, 1]} : vector<8x512xf32> to vector<8x256xf32>
    %364 = vector.extract_strided_slice %328 {offsets = [32, 0], sizes = [8, 8], strides = [1, 1]} : vector<56x8xf32> to vector<8x8xf32>
    %cst_138 = arith.constant dense<0.000000e+00> : vector<8x256xf32>
    %365 = tpu.matmul %364, %363, %cst_138 {dimension_numbers = #tpu.dot_dimension_numbers<[1], [0], [0], [1], [0, 0, 1, 1], [], []>} : vector<8x8xf32>, vector<8x256xf32>, vector<8x256xf32> -> vector<8x256xf32>
    %c15_i32_139 = arith.constant 15 : i32
    %366 = vector.broadcast %c15_i32_139 : i32 to vector<1x256xi32>
    %367 = arith.cmpi slt, %0, %366 : vector<1x256xi32>
    %cst_140 = arith.constant 0.000000e+00 : f32
    %368 = vector.shape_cast %367 : vector<1x256xi1> to vector<1x256xi1>
    %369 = vector.broadcast %368 : vector<1x256xi1> to vector<8x256xi1>
    %370 = vector.broadcast %cst_140 : f32 to vector<8x256xf32>
    %371 = arith.select %369, %365, %370 : vector<8x256xi1>, vector<8x256xf32>
    %372 = arith.addf %362, %371 : vector<8x256xf32>
    %373 = vector.extract_strided_slice %330 {offsets = [0, 130], sizes = [8, 256], strides = [1, 1]} : vector<8x512xf32> to vector<8x256xf32>
    %374 = vector.extract_strided_slice %328 {offsets = [40, 0], sizes = [8, 8], strides = [1, 1]} : vector<56x8xf32> to vector<8x8xf32>
    %cst_141 = arith.constant dense<0.000000e+00> : vector<8x256xf32>
    %375 = tpu.matmul %374, %373, %cst_141 {dimension_numbers = #tpu.dot_dimension_numbers<[1], [0], [0], [1], [0, 0, 1, 1], [], []>} : vector<8x8xf32>, vector<8x256xf32>, vector<8x256xf32> -> vector<8x256xf32>
    %c14_i32_142 = arith.constant 14 : i32
    %376 = vector.broadcast %c14_i32_142 : i32 to vector<1x256xi32>
    %377 = arith.cmpi slt, %0, %376 : vector<1x256xi32>
    %cst_143 = arith.constant 0.000000e+00 : f32
    %378 = vector.shape_cast %377 : vector<1x256xi1> to vector<1x256xi1>
    %379 = vector.broadcast %378 : vector<1x256xi1> to vector<8x256xi1>
    %380 = vector.broadcast %cst_143 : f32 to vector<8x256xf32>
    %381 = arith.select %379, %375, %380 : vector<8x256xi1>, vector<8x256xf32>
    %382 = arith.addf %372, %381 : vector<8x256xf32>
    %383 = vector.extract_strided_slice %330 {offsets = [0, 131], sizes = [8, 256], strides = [1, 1]} : vector<8x512xf32> to vector<8x256xf32>
    %384 = vector.extract_strided_slice %328 {offsets = [48, 0], sizes = [8, 8], strides = [1, 1]} : vector<56x8xf32> to vector<8x8xf32>
    %cst_144 = arith.constant dense<0.000000e+00> : vector<8x256xf32>
    %385 = tpu.matmul %384, %383, %cst_144 {dimension_numbers = #tpu.dot_dimension_numbers<[1], [0], [0], [1], [0, 0, 1, 1], [], []>} : vector<8x8xf32>, vector<8x256xf32>, vector<8x256xf32> -> vector<8x256xf32>
    %c13_i32_145 = arith.constant 13 : i32
    %386 = vector.broadcast %c13_i32_145 : i32 to vector<1x256xi32>
    %387 = arith.cmpi slt, %0, %386 : vector<1x256xi32>
    %cst_146 = arith.constant 0.000000e+00 : f32
    %388 = vector.shape_cast %387 : vector<1x256xi1> to vector<1x256xi1>
    %389 = vector.broadcast %388 : vector<1x256xi1> to vector<8x256xi1>
    %390 = vector.broadcast %cst_146 : f32 to vector<8x256xf32>
    %391 = arith.select %389, %385, %390 : vector<8x256xi1>, vector<8x256xf32>
    %392 = arith.addf %382, %391 : vector<8x256xf32>
    %c0_147 = arith.constant 0 : index
    %c0_148 = arith.constant 0 : index
    %393 = vector.load %arg24[%c0_147, %c0_148] : memref<8x1xf32, #tpu.memory_space<vmem>>, vector<8x1xf32>
    %394 = vector.broadcast %393 : vector<8x1xf32> to vector<8x256xf32>
    %395 = arith.addf %392, %394 : vector<8x256xf32>
    %c0_149 = arith.constant 0 : index
    %c0_150 = arith.constant 0 : index
    %396 = vector.load %arg25[%c0_149, %c0_150] : memref<56x8xf32, #tpu.memory_space<vmem>>, vector<56x8xf32>
    %cst_151 = arith.constant 0.000000e+00 : f32
    %397 = vector.broadcast %cst_151 : f32 to vector<8x128xf32>
    %398 = tpu.concatenate %397, %395, %397 in 1 : vector<8x128xf32>, vector<8x256xf32>, vector<8x128xf32> -> vector<8x512xf32>
    %399 = vector.extract_strided_slice %398 {offsets = [0, 80], sizes = [8, 256], strides = [1, 1]} : vector<8x512xf32> to vector<8x256xf32>
    %400 = vector.extract_strided_slice %396 {offsets = [0, 0], sizes = [8, 8], strides = [1, 1]} : vector<56x8xf32> to vector<8x8xf32>
    %cst_152 = arith.constant dense<0.000000e+00> : vector<8x256xf32>
    %401 = tpu.matmul %400, %399, %cst_152 {dimension_numbers = #tpu.dot_dimension_numbers<[1], [0], [0], [1], [0, 0, 1, 1], [], []>} : vector<8x8xf32>, vector<8x256xf32>, vector<8x256xf32> -> vector<8x256xf32>
    %402 = vector.extract_strided_slice %398 {offsets = [0, 96], sizes = [8, 256], strides = [1, 1]} : vector<8x512xf32> to vector<8x256xf32>
    %403 = vector.extract_strided_slice %396 {offsets = [8, 0], sizes = [8, 8], strides = [1, 1]} : vector<56x8xf32> to vector<8x8xf32>
    %cst_153 = arith.constant dense<0.000000e+00> : vector<8x256xf32>
    %404 = tpu.matmul %403, %402, %cst_153 {dimension_numbers = #tpu.dot_dimension_numbers<[1], [0], [0], [1], [0, 0, 1, 1], [], []>} : vector<8x8xf32>, vector<8x256xf32>, vector<8x256xf32> -> vector<8x256xf32>
    %405 = arith.addf %401, %404 : vector<8x256xf32>
    %406 = vector.extract_strided_slice %398 {offsets = [0, 112], sizes = [8, 256], strides = [1, 1]} : vector<8x512xf32> to vector<8x256xf32>
    %407 = vector.extract_strided_slice %396 {offsets = [16, 0], sizes = [8, 8], strides = [1, 1]} : vector<56x8xf32> to vector<8x8xf32>
    %cst_154 = arith.constant dense<0.000000e+00> : vector<8x256xf32>
    %408 = tpu.matmul %407, %406, %cst_154 {dimension_numbers = #tpu.dot_dimension_numbers<[1], [0], [0], [1], [0, 0, 1, 1], [], []>} : vector<8x8xf32>, vector<8x256xf32>, vector<8x256xf32> -> vector<8x256xf32>
    %409 = arith.addf %405, %408 : vector<8x256xf32>
    %410 = vector.extract_strided_slice %396 {offsets = [24, 0], sizes = [8, 8], strides = [1, 1]} : vector<56x8xf32> to vector<8x8xf32>
    %cst_155 = arith.constant dense<0.000000e+00> : vector<8x256xf32>
    %411 = tpu.matmul %410, %395, %cst_155 {dimension_numbers = #tpu.dot_dimension_numbers<[1], [0], [0], [1], [0, 0, 1, 1], [], []>} : vector<8x8xf32>, vector<8x256xf32>, vector<8x256xf32> -> vector<8x256xf32>
    %412 = arith.addf %409, %411 : vector<8x256xf32>
    %413 = vector.extract_strided_slice %398 {offsets = [0, 144], sizes = [8, 256], strides = [1, 1]} : vector<8x512xf32> to vector<8x256xf32>
    %414 = vector.extract_strided_slice %396 {offsets = [32, 0], sizes = [8, 8], strides = [1, 1]} : vector<56x8xf32> to vector<8x8xf32>
    %cst_156 = arith.constant dense<0.000000e+00> : vector<8x256xf32>
    %415 = tpu.matmul %414, %413, %cst_156 {dimension_numbers = #tpu.dot_dimension_numbers<[1], [0], [0], [1], [0, 0, 1, 1], [], []>} : vector<8x8xf32>, vector<8x256xf32>, vector<8x256xf32> -> vector<8x256xf32>
    %416 = arith.addf %412, %415 : vector<8x256xf32>
    %417 = vector.extract_strided_slice %398 {offsets = [0, 160], sizes = [8, 256], strides = [1, 1]} : vector<8x512xf32> to vector<8x256xf32>
    %418 = vector.extract_strided_slice %396 {offsets = [40, 0], sizes = [8, 8], strides = [1, 1]} : vector<56x8xf32> to vector<8x8xf32>
    %cst_157 = arith.constant dense<0.000000e+00> : vector<8x256xf32>
    %419 = tpu.matmul %418, %417, %cst_157 {dimension_numbers = #tpu.dot_dimension_numbers<[1], [0], [0], [1], [0, 0, 1, 1], [], []>} : vector<8x8xf32>, vector<8x256xf32>, vector<8x256xf32> -> vector<8x256xf32>
    %420 = arith.addf %416, %419 : vector<8x256xf32>
    %421 = vector.extract_strided_slice %398 {offsets = [0, 176], sizes = [8, 256], strides = [1, 1]} : vector<8x512xf32> to vector<8x256xf32>
    %422 = vector.extract_strided_slice %396 {offsets = [48, 0], sizes = [8, 8], strides = [1, 1]} : vector<56x8xf32> to vector<8x8xf32>
    %cst_158 = arith.constant dense<0.000000e+00> : vector<8x256xf32>
    %423 = tpu.matmul %422, %421, %cst_158 {dimension_numbers = #tpu.dot_dimension_numbers<[1], [0], [0], [1], [0, 0, 1, 1], [], []>} : vector<8x8xf32>, vector<8x256xf32>, vector<8x256xf32> -> vector<8x256xf32>
    %424 = arith.addf %420, %423 : vector<8x256xf32>
    %c0_159 = arith.constant 0 : index
    %c0_160 = arith.constant 0 : index
    %425 = vector.load %arg26[%c0_159, %c0_160] : memref<8x1xf32, #tpu.memory_space<vmem>>, vector<8x1xf32>
    %426 = vector.broadcast %425 : vector<8x1xf32> to vector<8x256xf32>
    %427 = arith.addf %424, %426 : vector<8x256xf32>
    %c0_161 = arith.constant 0 : index
    %c0_162 = arith.constant 0 : index
    %428 = vector.load %arg27[%c0_161, %c0_162] : memref<72x8xf32, #tpu.memory_space<vmem>>, vector<72x8xf32>
    %cst_163 = arith.constant 0.000000e+00 : f32
    %429 = vector.broadcast %cst_163 : f32 to vector<8x128xf32>
    %430 = tpu.concatenate %429, %427, %429 in 1 : vector<8x128xf32>, vector<8x256xf32>, vector<8x128xf32> -> vector<8x512xf32>
    %431 = vector.extract_strided_slice %430 {offsets = [0, 9], sizes = [8, 256], strides = [1, 1]} : vector<8x512xf32> to vector<8x256xf32>
    %432 = vector.extract_strided_slice %428 {offsets = [0, 0], sizes = [8, 8], strides = [1, 1]} : vector<72x8xf32> to vector<8x8xf32>
    %cst_164 = arith.constant dense<0.000000e+00> : vector<8x256xf32>
    %433 = tpu.matmul %432, %431, %cst_164 {dimension_numbers = #tpu.dot_dimension_numbers<[1], [0], [0], [1], [0, 0, 1, 1], [], []>} : vector<8x8xf32>, vector<8x256xf32>, vector<8x256xf32> -> vector<8x256xf32>
    %c7_i32 = arith.constant 7 : i32
    %434 = vector.broadcast %c7_i32 : i32 to vector<1x256xi32>
    %435 = arith.cmpi sge, %0, %434 : vector<1x256xi32>
    %cst_165 = arith.constant 0.000000e+00 : f32
    %436 = vector.shape_cast %435 : vector<1x256xi1> to vector<1x256xi1>
    %437 = vector.broadcast %436 : vector<1x256xi1> to vector<8x256xi1>
    %438 = vector.broadcast %cst_165 : f32 to vector<8x256xf32>
    %439 = arith.select %437, %433, %438 : vector<8x256xi1>, vector<8x256xf32>
    %440 = vector.extract_strided_slice %430 {offsets = [0, 16], sizes = [8, 256], strides = [1, 1]} : vector<8x512xf32> to vector<8x256xf32>
    %441 = vector.extract_strided_slice %428 {offsets = [8, 0], sizes = [8, 8], strides = [1, 1]} : vector<72x8xf32> to vector<8x8xf32>
    %cst_166 = arith.constant dense<0.000000e+00> : vector<8x256xf32>
    %442 = tpu.matmul %441, %440, %cst_166 {dimension_numbers = #tpu.dot_dimension_numbers<[1], [0], [0], [1], [0, 0, 1, 1], [], []>} : vector<8x8xf32>, vector<8x256xf32>, vector<8x256xf32> -> vector<8x256xf32>
    %443 = arith.addf %439, %442 : vector<8x256xf32>
    %444 = vector.extract_strided_slice %430 {offsets = [0, 23], sizes = [8, 256], strides = [1, 1]} : vector<8x512xf32> to vector<8x256xf32>
    %445 = vector.extract_strided_slice %428 {offsets = [16, 0], sizes = [8, 8], strides = [1, 1]} : vector<72x8xf32> to vector<8x8xf32>
    %cst_167 = arith.constant dense<0.000000e+00> : vector<8x256xf32>
    %446 = tpu.matmul %445, %444, %cst_167 {dimension_numbers = #tpu.dot_dimension_numbers<[1], [0], [0], [1], [0, 0, 1, 1], [], []>} : vector<8x8xf32>, vector<8x256xf32>, vector<8x256xf32> -> vector<8x256xf32>
    %c9_i32 = arith.constant 9 : i32
    %447 = vector.broadcast %c9_i32 : i32 to vector<1x256xi32>
    %448 = arith.cmpi slt, %0, %447 : vector<1x256xi32>
    %cst_168 = arith.constant 0.000000e+00 : f32
    %449 = vector.shape_cast %448 : vector<1x256xi1> to vector<1x256xi1>
    %450 = vector.broadcast %449 : vector<1x256xi1> to vector<8x256xi1>
    %451 = vector.broadcast %cst_168 : f32 to vector<8x256xf32>
    %452 = arith.select %450, %446, %451 : vector<8x256xi1>, vector<8x256xf32>
    %453 = arith.addf %443, %452 : vector<8x256xf32>
    %454 = vector.extract_strided_slice %430 {offsets = [0, 121], sizes = [8, 256], strides = [1, 1]} : vector<8x512xf32> to vector<8x256xf32>
    %455 = vector.extract_strided_slice %428 {offsets = [24, 0], sizes = [8, 8], strides = [1, 1]} : vector<72x8xf32> to vector<8x8xf32>
    %cst_169 = arith.constant dense<0.000000e+00> : vector<8x256xf32>
    %456 = tpu.matmul %455, %454, %cst_169 {dimension_numbers = #tpu.dot_dimension_numbers<[1], [0], [0], [1], [0, 0, 1, 1], [], []>} : vector<8x8xf32>, vector<8x256xf32>, vector<8x256xf32> -> vector<8x256xf32>
    %c7_i32_170 = arith.constant 7 : i32
    %457 = vector.broadcast %c7_i32_170 : i32 to vector<1x256xi32>
    %458 = arith.cmpi sge, %0, %457 : vector<1x256xi32>
    %cst_171 = arith.constant 0.000000e+00 : f32
    %459 = vector.shape_cast %458 : vector<1x256xi1> to vector<1x256xi1>
    %460 = vector.broadcast %459 : vector<1x256xi1> to vector<8x256xi1>
    %461 = vector.broadcast %cst_171 : f32 to vector<8x256xf32>
    %462 = arith.select %460, %456, %461 : vector<8x256xi1>, vector<8x256xf32>
    %463 = arith.addf %453, %462 : vector<8x256xf32>
    %464 = vector.extract_strided_slice %428 {offsets = [32, 0], sizes = [8, 8], strides = [1, 1]} : vector<72x8xf32> to vector<8x8xf32>
    %cst_172 = arith.constant dense<0.000000e+00> : vector<8x256xf32>
    %465 = tpu.matmul %464, %427, %cst_172 {dimension_numbers = #tpu.dot_dimension_numbers<[1], [0], [0], [1], [0, 0, 1, 1], [], []>} : vector<8x8xf32>, vector<8x256xf32>, vector<8x256xf32> -> vector<8x256xf32>
    %466 = arith.addf %463, %465 : vector<8x256xf32>
    %467 = vector.extract_strided_slice %430 {offsets = [0, 135], sizes = [8, 256], strides = [1, 1]} : vector<8x512xf32> to vector<8x256xf32>
    %468 = vector.extract_strided_slice %428 {offsets = [40, 0], sizes = [8, 8], strides = [1, 1]} : vector<72x8xf32> to vector<8x8xf32>
    %cst_173 = arith.constant dense<0.000000e+00> : vector<8x256xf32>
    %469 = tpu.matmul %468, %467, %cst_173 {dimension_numbers = #tpu.dot_dimension_numbers<[1], [0], [0], [1], [0, 0, 1, 1], [], []>} : vector<8x8xf32>, vector<8x256xf32>, vector<8x256xf32> -> vector<8x256xf32>
    %c9_i32_174 = arith.constant 9 : i32
    %470 = vector.broadcast %c9_i32_174 : i32 to vector<1x256xi32>
    %471 = arith.cmpi slt, %0, %470 : vector<1x256xi32>
    %cst_175 = arith.constant 0.000000e+00 : f32
    %472 = vector.shape_cast %471 : vector<1x256xi1> to vector<1x256xi1>
    %473 = vector.broadcast %472 : vector<1x256xi1> to vector<8x256xi1>
    %474 = vector.broadcast %cst_175 : f32 to vector<8x256xf32>
    %475 = arith.select %473, %469, %474 : vector<8x256xi1>, vector<8x256xf32>
    %476 = arith.addf %466, %475 : vector<8x256xf32>
    %477 = vector.extract_strided_slice %430 {offsets = [0, 233], sizes = [8, 256], strides = [1, 1]} : vector<8x512xf32> to vector<8x256xf32>
    %478 = vector.extract_strided_slice %428 {offsets = [48, 0], sizes = [8, 8], strides = [1, 1]} : vector<72x8xf32> to vector<8x8xf32>
    %cst_176 = arith.constant dense<0.000000e+00> : vector<8x256xf32>
    %479 = tpu.matmul %478, %477, %cst_176 {dimension_numbers = #tpu.dot_dimension_numbers<[1], [0], [0], [1], [0, 0, 1, 1], [], []>} : vector<8x8xf32>, vector<8x256xf32>, vector<8x256xf32> -> vector<8x256xf32>
    %c7_i32_177 = arith.constant 7 : i32
    %480 = vector.broadcast %c7_i32_177 : i32 to vector<1x256xi32>
    %481 = arith.cmpi sge, %0, %480 : vector<1x256xi32>
    %cst_178 = arith.constant 0.000000e+00 : f32
    %482 = vector.shape_cast %481 : vector<1x256xi1> to vector<1x256xi1>
    %483 = vector.broadcast %482 : vector<1x256xi1> to vector<8x256xi1>
    %484 = vector.broadcast %cst_178 : f32 to vector<8x256xf32>
    %485 = arith.select %483, %479, %484 : vector<8x256xi1>, vector<8x256xf32>
    %486 = arith.addf %476, %485 : vector<8x256xf32>
    %487 = vector.extract_strided_slice %430 {offsets = [0, 240], sizes = [8, 256], strides = [1, 1]} : vector<8x512xf32> to vector<8x256xf32>
    %488 = vector.extract_strided_slice %428 {offsets = [56, 0], sizes = [8, 8], strides = [1, 1]} : vector<72x8xf32> to vector<8x8xf32>
    %cst_179 = arith.constant dense<0.000000e+00> : vector<8x256xf32>
    %489 = tpu.matmul %488, %487, %cst_179 {dimension_numbers = #tpu.dot_dimension_numbers<[1], [0], [0], [1], [0, 0, 1, 1], [], []>} : vector<8x8xf32>, vector<8x256xf32>, vector<8x256xf32> -> vector<8x256xf32>
    %490 = arith.addf %486, %489 : vector<8x256xf32>
    %491 = vector.extract_strided_slice %430 {offsets = [0, 247], sizes = [8, 256], strides = [1, 1]} : vector<8x512xf32> to vector<8x256xf32>
    %492 = vector.extract_strided_slice %428 {offsets = [64, 0], sizes = [8, 8], strides = [1, 1]} : vector<72x8xf32> to vector<8x8xf32>
    %cst_180 = arith.constant dense<0.000000e+00> : vector<8x256xf32>
    %493 = tpu.matmul %492, %491, %cst_180 {dimension_numbers = #tpu.dot_dimension_numbers<[1], [0], [0], [1], [0, 0, 1, 1], [], []>} : vector<8x8xf32>, vector<8x256xf32>, vector<8x256xf32> -> vector<8x256xf32>
    %c9_i32_181 = arith.constant 9 : i32
    %494 = vector.broadcast %c9_i32_181 : i32 to vector<1x256xi32>
    %495 = arith.cmpi slt, %0, %494 : vector<1x256xi32>
    %cst_182 = arith.constant 0.000000e+00 : f32
    %496 = vector.shape_cast %495 : vector<1x256xi1> to vector<1x256xi1>
    %497 = vector.broadcast %496 : vector<1x256xi1> to vector<8x256xi1>
    %498 = vector.broadcast %cst_182 : f32 to vector<8x256xf32>
    %499 = arith.select %497, %493, %498 : vector<8x256xi1>, vector<8x256xf32>
    %500 = arith.addf %490, %499 : vector<8x256xf32>
    %c0_183 = arith.constant 0 : index
    %c0_184 = arith.constant 0 : index
    %501 = vector.load %arg28[%c0_183, %c0_184] : memref<8x1xf32, #tpu.memory_space<vmem>>, vector<8x1xf32>
    %502 = vector.broadcast %501 : vector<8x1xf32> to vector<8x256xf32>
    %503 = arith.addf %500, %502 : vector<8x256xf32>
    %504 = tpu.concatenate %51, %177, %326, %503 in 0 : vector<8x256xf32>, vector<8x256xf32>, vector<8x256xf32>, vector<8x256xf32> -> vector<32x256xf32>
    %c0_185 = arith.constant 0 : index
    %c0_186 = arith.constant 0 : index
    %505 = vector.load %arg29[%c0_185, %c0_186] : memref<72x32xf32, #tpu.memory_space<vmem>>, vector<72x32xf32>
    %cst_187 = arith.constant 0.000000e+00 : f32
    %506 = vector.broadcast %cst_187 : f32 to vector<32x128xf32>
    %507 = tpu.concatenate %506, %504, %506 in 1 : vector<32x128xf32>, vector<32x256xf32>, vector<32x128xf32> -> vector<32x512xf32>
    %508 = vector.extract_strided_slice %507 {offsets = [0, 111], sizes = [32, 256], strides = [1, 1]} : vector<32x512xf32> to vector<32x256xf32>
    %509 = vector.extract_strided_slice %505 {offsets = [0, 0], sizes = [8, 32], strides = [1, 1]} : vector<72x32xf32> to vector<8x32xf32>
    %cst_188 = arith.constant dense<0.000000e+00> : vector<8x256xf32>
    %510 = tpu.matmul %509, %508, %cst_188 {dimension_numbers = #tpu.dot_dimension_numbers<[1], [0], [0], [1], [0, 0, 1, 1], [], []>} : vector<8x32xf32>, vector<32x256xf32>, vector<8x256xf32> -> vector<8x256xf32>
    %c1_i32_189 = arith.constant 1 : i32
    %511 = vector.broadcast %c1_i32_189 : i32 to vector<1x256xi32>
    %512 = arith.cmpi sge, %0, %511 : vector<1x256xi32>
    %cst_190 = arith.constant 0.000000e+00 : f32
    %513 = vector.shape_cast %512 : vector<1x256xi1> to vector<1x256xi1>
    %514 = vector.broadcast %513 : vector<1x256xi1> to vector<8x256xi1>
    %515 = vector.broadcast %cst_190 : f32 to vector<8x256xf32>
    %516 = arith.select %514, %510, %515 : vector<8x256xi1>, vector<8x256xf32>
    %517 = vector.extract_strided_slice %507 {offsets = [0, 112], sizes = [32, 256], strides = [1, 1]} : vector<32x512xf32> to vector<32x256xf32>
    %518 = vector.extract_strided_slice %505 {offsets = [8, 0], sizes = [8, 32], strides = [1, 1]} : vector<72x32xf32> to vector<8x32xf32>
    %cst_191 = arith.constant dense<0.000000e+00> : vector<8x256xf32>
    %519 = tpu.matmul %518, %517, %cst_191 {dimension_numbers = #tpu.dot_dimension_numbers<[1], [0], [0], [1], [0, 0, 1, 1], [], []>} : vector<8x32xf32>, vector<32x256xf32>, vector<8x256xf32> -> vector<8x256xf32>
    %520 = arith.addf %516, %519 : vector<8x256xf32>
    %521 = vector.extract_strided_slice %507 {offsets = [0, 113], sizes = [32, 256], strides = [1, 1]} : vector<32x512xf32> to vector<32x256xf32>
    %522 = vector.extract_strided_slice %505 {offsets = [16, 0], sizes = [8, 32], strides = [1, 1]} : vector<72x32xf32> to vector<8x32xf32>
    %cst_192 = arith.constant dense<0.000000e+00> : vector<8x256xf32>
    %523 = tpu.matmul %522, %521, %cst_192 {dimension_numbers = #tpu.dot_dimension_numbers<[1], [0], [0], [1], [0, 0, 1, 1], [], []>} : vector<8x32xf32>, vector<32x256xf32>, vector<8x256xf32> -> vector<8x256xf32>
    %c15_i32_193 = arith.constant 15 : i32
    %524 = vector.broadcast %c15_i32_193 : i32 to vector<1x256xi32>
    %525 = arith.cmpi slt, %0, %524 : vector<1x256xi32>
    %cst_194 = arith.constant 0.000000e+00 : f32
    %526 = vector.shape_cast %525 : vector<1x256xi1> to vector<1x256xi1>
    %527 = vector.broadcast %526 : vector<1x256xi1> to vector<8x256xi1>
    %528 = vector.broadcast %cst_194 : f32 to vector<8x256xf32>
    %529 = arith.select %527, %523, %528 : vector<8x256xi1>, vector<8x256xf32>
    %530 = arith.addf %520, %529 : vector<8x256xf32>
    %531 = vector.extract_strided_slice %507 {offsets = [0, 127], sizes = [32, 256], strides = [1, 1]} : vector<32x512xf32> to vector<32x256xf32>
    %532 = vector.extract_strided_slice %505 {offsets = [24, 0], sizes = [8, 32], strides = [1, 1]} : vector<72x32xf32> to vector<8x32xf32>
    %cst_195 = arith.constant dense<0.000000e+00> : vector<8x256xf32>
    %533 = tpu.matmul %532, %531, %cst_195 {dimension_numbers = #tpu.dot_dimension_numbers<[1], [0], [0], [1], [0, 0, 1, 1], [], []>} : vector<8x32xf32>, vector<32x256xf32>, vector<8x256xf32> -> vector<8x256xf32>
    %c1_i32_196 = arith.constant 1 : i32
    %534 = vector.broadcast %c1_i32_196 : i32 to vector<1x256xi32>
    %535 = arith.cmpi sge, %0, %534 : vector<1x256xi32>
    %cst_197 = arith.constant 0.000000e+00 : f32
    %536 = vector.shape_cast %535 : vector<1x256xi1> to vector<1x256xi1>
    %537 = vector.broadcast %536 : vector<1x256xi1> to vector<8x256xi1>
    %538 = vector.broadcast %cst_197 : f32 to vector<8x256xf32>
    %539 = arith.select %537, %533, %538 : vector<8x256xi1>, vector<8x256xf32>
    %540 = arith.addf %530, %539 : vector<8x256xf32>
    %541 = vector.extract_strided_slice %505 {offsets = [32, 0], sizes = [8, 32], strides = [1, 1]} : vector<72x32xf32> to vector<8x32xf32>
    %cst_198 = arith.constant dense<0.000000e+00> : vector<8x256xf32>
    %542 = tpu.matmul %541, %504, %cst_198 {dimension_numbers = #tpu.dot_dimension_numbers<[1], [0], [0], [1], [0, 0, 1, 1], [], []>} : vector<8x32xf32>, vector<32x256xf32>, vector<8x256xf32> -> vector<8x256xf32>
    %543 = arith.addf %540, %542 : vector<8x256xf32>
    %544 = vector.extract_strided_slice %507 {offsets = [0, 129], sizes = [32, 256], strides = [1, 1]} : vector<32x512xf32> to vector<32x256xf32>
    %545 = vector.extract_strided_slice %505 {offsets = [40, 0], sizes = [8, 32], strides = [1, 1]} : vector<72x32xf32> to vector<8x32xf32>
    %cst_199 = arith.constant dense<0.000000e+00> : vector<8x256xf32>
    %546 = tpu.matmul %545, %544, %cst_199 {dimension_numbers = #tpu.dot_dimension_numbers<[1], [0], [0], [1], [0, 0, 1, 1], [], []>} : vector<8x32xf32>, vector<32x256xf32>, vector<8x256xf32> -> vector<8x256xf32>
    %c15_i32_200 = arith.constant 15 : i32
    %547 = vector.broadcast %c15_i32_200 : i32 to vector<1x256xi32>
    %548 = arith.cmpi slt, %0, %547 : vector<1x256xi32>
    %cst_201 = arith.constant 0.000000e+00 : f32
    %549 = vector.shape_cast %548 : vector<1x256xi1> to vector<1x256xi1>
    %550 = vector.broadcast %549 : vector<1x256xi1> to vector<8x256xi1>
    %551 = vector.broadcast %cst_201 : f32 to vector<8x256xf32>
    %552 = arith.select %550, %546, %551 : vector<8x256xi1>, vector<8x256xf32>
    %553 = arith.addf %543, %552 : vector<8x256xf32>
    %554 = vector.extract_strided_slice %507 {offsets = [0, 143], sizes = [32, 256], strides = [1, 1]} : vector<32x512xf32> to vector<32x256xf32>
    %555 = vector.extract_strided_slice %505 {offsets = [48, 0], sizes = [8, 32], strides = [1, 1]} : vector<72x32xf32> to vector<8x32xf32>
    %cst_202 = arith.constant dense<0.000000e+00> : vector<8x256xf32>
    %556 = tpu.matmul %555, %554, %cst_202 {dimension_numbers = #tpu.dot_dimension_numbers<[1], [0], [0], [1], [0, 0, 1, 1], [], []>} : vector<8x32xf32>, vector<32x256xf32>, vector<8x256xf32> -> vector<8x256xf32>
    %c1_i32_203 = arith.constant 1 : i32
    %557 = vector.broadcast %c1_i32_203 : i32 to vector<1x256xi32>
    %558 = arith.cmpi sge, %0, %557 : vector<1x256xi32>
    %cst_204 = arith.constant 0.000000e+00 : f32
    %559 = vector.shape_cast %558 : vector<1x256xi1> to vector<1x256xi1>
    %560 = vector.broadcast %559 : vector<1x256xi1> to vector<8x256xi1>
    %561 = vector.broadcast %cst_204 : f32 to vector<8x256xf32>
    %562 = arith.select %560, %556, %561 : vector<8x256xi1>, vector<8x256xf32>
    %563 = arith.addf %553, %562 : vector<8x256xf32>
    %564 = vector.extract_strided_slice %507 {offsets = [0, 144], sizes = [32, 256], strides = [1, 1]} : vector<32x512xf32> to vector<32x256xf32>
    %565 = vector.extract_strided_slice %505 {offsets = [56, 0], sizes = [8, 32], strides = [1, 1]} : vector<72x32xf32> to vector<8x32xf32>
    %cst_205 = arith.constant dense<0.000000e+00> : vector<8x256xf32>
    %566 = tpu.matmul %565, %564, %cst_205 {dimension_numbers = #tpu.dot_dimension_numbers<[1], [0], [0], [1], [0, 0, 1, 1], [], []>} : vector<8x32xf32>, vector<32x256xf32>, vector<8x256xf32> -> vector<8x256xf32>
    %567 = arith.addf %563, %566 : vector<8x256xf32>
    %568 = vector.extract_strided_slice %507 {offsets = [0, 145], sizes = [32, 256], strides = [1, 1]} : vector<32x512xf32> to vector<32x256xf32>
    %569 = vector.extract_strided_slice %505 {offsets = [64, 0], sizes = [8, 32], strides = [1, 1]} : vector<72x32xf32> to vector<8x32xf32>
    %cst_206 = arith.constant dense<0.000000e+00> : vector<8x256xf32>
    %570 = tpu.matmul %569, %568, %cst_206 {dimension_numbers = #tpu.dot_dimension_numbers<[1], [0], [0], [1], [0, 0, 1, 1], [], []>} : vector<8x32xf32>, vector<32x256xf32>, vector<8x256xf32> -> vector<8x256xf32>
    %c15_i32_207 = arith.constant 15 : i32
    %571 = vector.broadcast %c15_i32_207 : i32 to vector<1x256xi32>
    %572 = arith.cmpi slt, %0, %571 : vector<1x256xi32>
    %cst_208 = arith.constant 0.000000e+00 : f32
    %573 = vector.shape_cast %572 : vector<1x256xi1> to vector<1x256xi1>
    %574 = vector.broadcast %573 : vector<1x256xi1> to vector<8x256xi1>
    %575 = vector.broadcast %cst_208 : f32 to vector<8x256xf32>
    %576 = arith.select %574, %570, %575 : vector<8x256xi1>, vector<8x256xf32>
    %577 = arith.addf %567, %576 : vector<8x256xf32>
    %c0_209 = arith.constant 0 : index
    %c0_210 = arith.constant 0 : index
    %578 = vector.load %arg30[%c0_209, %c0_210] : memref<8x1xf32, #tpu.memory_space<vmem>>, vector<8x1xf32>
    %579 = vector.broadcast %578 : vector<8x1xf32> to vector<8x256xf32>
    %580 = arith.addf %577, %579 : vector<8x256xf32>
    %581 = arith.addf %580, %56 : vector<8x256xf32>
    %cst_211 = arith.constant 0.000000e+00 : f32
    %582 = vector.broadcast %cst_211 : f32 to vector<8x256xf32>
    %583 = arith.maximumf %581, %582 : vector<8x256xf32>
    %c0_212 = arith.constant 0 : index
    %c0_213 = arith.constant 0 : index
    %c0_214 = arith.constant 0 : index
    %584 = vector.load %arg31[%c0_212, %c0_213, %c0_214] : memref<1x8x256xf32, #tpu.memory_space<vmem>>, vector<1x8x256xf32>
    %585 = vector.shape_cast %584 : vector<1x8x256xf32> to vector<8x256xf32>
    %586 = vector.shape_cast %583 : vector<8x256xf32> to vector<1x8x256xf32>
    tpu.vector_store %arg31[%c0_212, %c0_213, %c0_214], %586 {strides = array<i32>} : memref<1x8x256xf32, #tpu.memory_space<vmem>>, vector<1x8x256xf32>,
    return
  }
  func.func @transform_0(%arg0: i32) -> (i32, i32, i32) {
    %c0_i32 = arith.constant 0 : i32
    %c0_i32_0 = arith.constant 0 : i32
    %c0_i32_1 = arith.constant 0 : i32
    return %arg0, %c0_i32, %c0_i32_0 : i32, i32, i32
  }
  func.func @transform_1(%arg0: i32) -> (i32, i32) {
    %c0_i32 = arith.constant 0 : i32
    %c0_i32_0 = arith.constant 0 : i32
    %c0_i32_1 = arith.constant 0 : i32
    return %c0_i32, %c0_i32_0 : i32, i32
  }
  func.func @transform_2(%arg0: i32) -> (i32, i32) {
    %c0_i32 = arith.constant 0 : i32
    %c0_i32_0 = arith.constant 0 : i32
    %c0_i32_1 = arith.constant 0 : i32
    return %c0_i32, %c0_i32_0 : i32, i32
  }
  func.func @transform_3(%arg0: i32) -> (i32, i32) {
    %c0_i32 = arith.constant 0 : i32
    %c0_i32_0 = arith.constant 0 : i32
    %c0_i32_1 = arith.constant 0 : i32
    return %c0_i32, %c0_i32_0 : i32, i32
  }
  func.func @transform_4(%arg0: i32) -> (i32, i32) {
    %c0_i32 = arith.constant 0 : i32
    %c0_i32_0 = arith.constant 0 : i32
    %c0_i32_1 = arith.constant 0 : i32
    return %c0_i32, %c0_i32_0 : i32, i32
  }
  func.func @transform_5(%arg0: i32) -> (i32, i32) {
    %c0_i32 = arith.constant 0 : i32
    %c0_i32_0 = arith.constant 0 : i32
    %c0_i32_1 = arith.constant 0 : i32
    return %c0_i32, %c0_i32_0 : i32, i32
  }
  func.func @transform_6(%arg0: i32) -> (i32, i32) {
    %c0_i32 = arith.constant 0 : i32
    %c0_i32_0 = arith.constant 0 : i32
    %c0_i32_1 = arith.constant 0 : i32
    return %c0_i32, %c0_i32_0 : i32, i32
  }
  func.func @transform_7(%arg0: i32) -> (i32, i32) {
    %c0_i32 = arith.constant 0 : i32
    %c0_i32_0 = arith.constant 0 : i32
    %c0_i32_1 = arith.constant 0 : i32
    return %c0_i32, %c0_i32_0 : i32, i32
  }
  func.func @transform_8(%arg0: i32) -> (i32, i32) {
    %c0_i32 = arith.constant 0 : i32
    %c0_i32_0 = arith.constant 0 : i32
    %c0_i32_1 = arith.constant 0 : i32
    return %c0_i32, %c0_i32_0 : i32, i32
  }
  func.func @transform_9(%arg0: i32) -> (i32, i32) {
    %c0_i32 = arith.constant 0 : i32
    %c0_i32_0 = arith.constant 0 : i32
    %c0_i32_1 = arith.constant 0 : i32
    return %c0_i32, %c0_i32_0 : i32, i32
  }
  func.func @transform_10(%arg0: i32) -> (i32, i32) {
    %c0_i32 = arith.constant 0 : i32
    %c0_i32_0 = arith.constant 0 : i32
    %c0_i32_1 = arith.constant 0 : i32
    return %c0_i32, %c0_i32_0 : i32, i32
  }
  func.func @transform_11(%arg0: i32) -> (i32, i32) {
    %c0_i32 = arith.constant 0 : i32
    %c0_i32_0 = arith.constant 0 : i32
    %c0_i32_1 = arith.constant 0 : i32
    return %c0_i32, %c0_i32_0 : i32, i32
  }
  func.func @transform_12(%arg0: i32) -> (i32, i32) {
    %c0_i32 = arith.constant 0 : i32
    %c0_i32_0 = arith.constant 0 : i32
    %c0_i32_1 = arith.constant 0 : i32
    return %c0_i32, %c0_i32_0 : i32, i32
  }
  func.func @transform_13(%arg0: i32) -> (i32, i32) {
    %c0_i32 = arith.constant 0 : i32
    %c0_i32_0 = arith.constant 0 : i32
    %c0_i32_1 = arith.constant 0 : i32
    return %c0_i32, %c0_i32_0 : i32, i32
  }
  func.func @transform_14(%arg0: i32) -> (i32, i32) {
    %c0_i32 = arith.constant 0 : i32
    %c0_i32_0 = arith.constant 0 : i32
    %c0_i32_1 = arith.constant 0 : i32
    return %c0_i32, %c0_i32_0 : i32, i32
  }
  func.func @transform_15(%arg0: i32) -> (i32, i32) {
    %c0_i32 = arith.constant 0 : i32
    %c0_i32_0 = arith.constant 0 : i32
    %c0_i32_1 = arith.constant 0 : i32
    return %c0_i32, %c0_i32_0 : i32, i32
  }
  func.func @transform_16(%arg0: i32) -> (i32, i32) {
    %c0_i32 = arith.constant 0 : i32
    %c0_i32_0 = arith.constant 0 : i32
    %c0_i32_1 = arith.constant 0 : i32
    return %c0_i32, %c0_i32_0 : i32, i32
  }
  func.func @transform_17(%arg0: i32) -> (i32, i32) {
    %c0_i32 = arith.constant 0 : i32
    %c0_i32_0 = arith.constant 0 : i32
    %c0_i32_1 = arith.constant 0 : i32
    return %c0_i32, %c0_i32_0 : i32, i32
  }
  func.func @transform_18(%arg0: i32) -> (i32, i32) {
    %c0_i32 = arith.constant 0 : i32
    %c0_i32_0 = arith.constant 0 : i32
    %c0_i32_1 = arith.constant 0 : i32
    return %c0_i32, %c0_i32_0 : i32, i32
  }
  func.func @transform_19(%arg0: i32) -> (i32, i32) {
    %c0_i32 = arith.constant 0 : i32
    %c0_i32_0 = arith.constant 0 : i32
    %c0_i32_1 = arith.constant 0 : i32
    return %c0_i32, %c0_i32_0 : i32, i32
  }
  func.func @transform_20(%arg0: i32) -> (i32, i32) {
    %c0_i32 = arith.constant 0 : i32
    %c0_i32_0 = arith.constant 0 : i32
    %c0_i32_1 = arith.constant 0 : i32
    return %c0_i32, %c0_i32_0 : i32, i32
  }
  func.func @transform_21(%arg0: i32) -> (i32, i32) {
    %c0_i32 = arith.constant 0 : i32
    %c0_i32_0 = arith.constant 0 : i32
    %c0_i32_1 = arith.constant 0 : i32
    return %c0_i32, %c0_i32_0 : i32, i32
  }
  func.func @transform_22(%arg0: i32) -> (i32, i32) {
    %c0_i32 = arith.constant 0 : i32
    %c0_i32_0 = arith.constant 0 : i32
    %c0_i32_1 = arith.constant 0 : i32
    return %c0_i32, %c0_i32_0 : i32, i32
  }
  func.func @transform_23(%arg0: i32) -> (i32, i32) {
    %c0_i32 = arith.constant 0 : i32
    %c0_i32_0 = arith.constant 0 : i32
    %c0_i32_1 = arith.constant 0 : i32
    return %c0_i32, %c0_i32_0 : i32, i32
  }
  func.func @transform_24(%arg0: i32) -> (i32, i32) {
    %c0_i32 = arith.constant 0 : i32
    %c0_i32_0 = arith.constant 0 : i32
    %c0_i32_1 = arith.constant 0 : i32
    return %c0_i32, %c0_i32_0 : i32, i32
  }
  func.func @transform_25(%arg0: i32) -> (i32, i32) {
    %c0_i32 = arith.constant 0 : i32
    %c0_i32_0 = arith.constant 0 : i32
    %c0_i32_1 = arith.constant 0 : i32
    return %c0_i32, %c0_i32_0 : i32, i32
  }
  func.func @transform_26(%arg0: i32) -> (i32, i32) {
    %c0_i32 = arith.constant 0 : i32
    %c0_i32_0 = arith.constant 0 : i32
    %c0_i32_1 = arith.constant 0 : i32
    return %c0_i32, %c0_i32_0 : i32, i32
  }
  func.func @transform_27(%arg0: i32) -> (i32, i32) {
    %c0_i32 = arith.constant 0 : i32
    %c0_i32_0 = arith.constant 0 : i32
    %c0_i32_1 = arith.constant 0 : i32
    return %c0_i32, %c0_i32_0 : i32, i32
  }
  func.func @transform_28(%arg0: i32) -> (i32, i32) {
    %c0_i32 = arith.constant 0 : i32
    %c0_i32_0 = arith.constant 0 : i32
    %c0_i32_1 = arith.constant 0 : i32
    return %c0_i32, %c0_i32_0 : i32, i32
  }
  func.func @transform_29(%arg0: i32) -> (i32, i32) {
    %c0_i32 = arith.constant 0 : i32
    %c0_i32_0 = arith.constant 0 : i32
    %c0_i32_1 = arith.constant 0 : i32
    return %c0_i32, %c0_i32_0 : i32, i32
  }
  func.func @transform_30(%arg0: i32) -> (i32, i32, i32) {
    %c0_i32 = arith.constant 0 : i32
    %c0_i32_0 = arith.constant 0 : i32
    %c0_i32_1 = arith.constant 0 : i32
    return %arg0, %c0_i32, %c0_i32_0 : i32, i32, i32
  }
}

</mosaic_0001>

<bundles_post_ra>
// kernel: tpu_custom_call.1
= control target key start
LH: loop header
LB: loop body
LE: loop exit
PB: predicated region body
PF: predicated region fallthrough
CT: control target
= control target key end

     0   :  { %s6235_s6 = smov 1   ;;  %s6236_s10 = smov 2   ;;  %s7576_s0 = inlined_call_operand.smem [shape: u32[31], index: -1, kind: input, shape index: {}] }
   0x1   :  { %s6307_s5 = sld [smem:[%s7576_s0]]   ;;  %s6237_s14 = smov 3  }
   0x2   :  { %s6312_s9 = sld [smem:[%s7576_s0 + %s6235_s6]]   ;;  %s6238_s18 = smov 4  }
   0x3   :  { %s6317_s13 = sld [smem:[%s7576_s0 + %s6236_s10]]   ;;  %s6239_s22 = smov 5  }
   0x4   :  { %s6322_s17 = sld [smem:[%s7576_s0 + %s6237_s14]]   ;;  %s6240_s26 = smov 6  }
   0x5   :  { %s6327_s21 = sld [smem:[%s7576_s0 + %s6238_s18]]   ;;  %s6241_s30 = smov 7  }
   0x6   :  { %s6332_s25 = sld [smem:[%s7576_s0 + %s6239_s22]]   ;;  %s6242_s4 = smov 8  }
   0x7   :  { %7622 = sst [smem:[#allocation5_spill]] %s6307_s5  ;;  %s6243_s10 = smov 9  }
   0x8   :  { %s6337_s29 = sld [smem:[%s7576_s0 + %s6240_s26]]   ;;  %s6244_s15 = smov 10  }
   0x9   :  { %7623 = sst [smem:[#allocation6_spill]] %s6317_s13  ;;  %s6245_s20 = smov 11  }
   0xa   :  { %7624 = sst [smem:[#allocation7_spill]] %s6322_s17  ;;  %s6246_s26 = smov 12  }
   0xb   :  { %7625 = sst [smem:[#allocation8_spill]] %s6327_s21  ;;  %s6247_s1 = smov 13  }
   0xc   :  { %s6342_s3 = sld [smem:[%s7576_s0 + %s6241_s30]]   ;;  %s6248_s7 = smov 14  }
   0xd   :  { %s6347_s8 = sld [smem:[%s7576_s0 + %s6242_s4]]   ;;  %s6250_s22 = smov 16  }
   0xe   :  { %s6352_s14 = sld [smem:[%s7576_s0 + %s6243_s10]]   ;;  %s6251_s28 = smov 17  }
   0xf   :  { %s6357_s19 = sld [smem:[%s7576_s0 + %s6244_s15]]   ;;  %s6249_s15 = smov 15  }
  0x10   :  { %s6362_s24 = sld [smem:[%s7576_s0 + %s6245_s20]]  }
  0x11   :  { %s6367_s30 = sld [smem:[%s7576_s0 + %s6246_s26]]  }
  0x12   :  { %7626 = sst [smem:[#allocation9_spill]] %s6342_s3 }
  0x13   :  { %7627 = sst [smem:[#allocation10_spill]] %s6347_s8 }
  0x14   :  { %7628 = sst [smem:[#allocation11_spill]] %s6352_s14 }
  0x15   :  { %7629 = sst [smem:[#allocation12_spill]] %s6357_s19 }
  0x16   :  { %7630 = sst [smem:[#allocation13_spill]] %s6362_s24 }
  0x17   :  { %s6372_s6 = sld [smem:[%s7576_s0 + %s6247_s1]]  }
  0x18   :  { %s6377_s12 = sld [smem:[%s7576_s0 + %s6248_s7]]   ;;  %s6252_s7 = smov 18  }
  0x19   :  { %s6382_s20 = sld [smem:[%s7576_s0 + %s6249_s15]]   ;;  %s6253_s15 = smov 19  }
  0x1a   :  { %s6387_s27 = sld [smem:[%s7576_s0 + %s6250_s22]]   ;;  %s6254_s22 = smov 20  }
  0x1b   :  { %s6392_s4 = sld [smem:[%s7576_s0 + %s6251_s28]]   ;;  %s6255_s28 = smov 21  }
  0x1d   :  { %7631 = sst [smem:[#allocation14_spill]] %s6372_s6 }
  0x1e   :  { %7632 = sst [smem:[#allocation15_spill]] %s6377_s12 }
  0x1f   :  { %7633 = sst [smem:[#allocation16_spill]] %s6382_s20 }
  0x20   :  { %7634 = sst [smem:[#allocation17_spill]] %s6387_s27 }
  0x21   :  { %7635 = sst [smem:[#allocation18_spill]] %s6392_s4 }
  0x22   :  { %s6397_s12 = sld [smem:[%s7576_s0 + %s6252_s7]]   ;;  %s6256_s7 = smov 22  }
  0x23   :  { %s6402_s20 = sld [smem:[%s7576_s0 + %s6253_s15]]   ;;  %s6257_s15 = smov 23  }
  0x24   :  { %s6407_s27 = sld [smem:[%s7576_s0 + %s6254_s22]]   ;;  %s6258_s22 = smov 24  }
  0x25   :  { %s6412_s4 = sld [smem:[%s7576_s0 + %s6255_s28]]   ;;  %s6259_s28 = smov 25  }
  0x28   :  { %7636 = sst [smem:[#allocation19_spill]] %s6397_s12 }
  0x29   :  { %7637 = sst [smem:[#allocation20_spill]] %s6402_s20 }
  0x2a   :  { %7638 = sst [smem:[#allocation21_spill]] %s6407_s27 }
  0x2b   :  { %7639 = sst [smem:[#allocation22_spill]] %s6412_s4 }
  0x2c   :  { %s6417_s12 = sld [smem:[%s7576_s0 + %s6256_s7]]   ;;  %s6260_s7 = smov 26  }
  0x2d   :  { %s6422_s20 = sld [smem:[%s7576_s0 + %s6257_s15]]   ;;  %s6261_s15 = smov 27  }
  0x2e   :  { %s6427_s27 = sld [smem:[%s7576_s0 + %s6258_s22]]   ;;  %s6262_s22 = smov 28  }
  0x2f   :  { %s6432_s4 = sld [smem:[%s7576_s0 + %s6259_s28]]   ;;  %s6263_s28 = smov 29  }
  0x32   :  { %7640 = sst [smem:[#allocation23_spill]] %s6417_s12 }
  0x33   :  { %7641 = sst [smem:[#allocation24_spill]] %s6422_s20 }
  0x34   :  { %7642 = sst [smem:[#allocation25_spill]] %s6427_s27 }
  0x35   :  { %7643 = sst [smem:[#allocation26_spill]] %s6432_s4 }
  0x36   :  { %s6437_s12 = sld [smem:[%s7576_s0 + %s6260_s7]]   ;;  %s6264_s7 = smov 30  }
  0x37   :  { %s6442_s20 = sld [smem:[%s7576_s0 + %s6261_s15]]  }
  0x38   :  { %s6447_s27 = sld [smem:[%s7576_s0 + %s6262_s22]]  }
  0x39   :  { %s6452_s4 = sld [smem:[%s7576_s0 + %s6263_s28]]  }
  0x3c   :  { %7644 = sst [smem:[#allocation27_spill]] %s6437_s12 }
  0x3d   :  { %s6457_s12 = sld [smem:[%s7576_s0 + %s6264_s7]]  }
  0x3e   :  { %66 = vsyncpa [#allocation3], 0 }
  0x3f   :  { %68 = vsyncpa [#allocation3 + $0x1], 0  ;;  %s6459_s15 = smov 0   ;;  %s6461_s16 = smov 0  }
  0x40   :  { %s6463_s18 = smov 0   ;;  %s6465_s22 = smov 0  }
  0x41 LB: > { %s7645_s21 = sld [smem:[#allocation8_spill]]  ;;  %s6480_s0 = sadd.s32 4294967295, %s6233_s22   ;;  %s6225_s16 = sphi %s6461_s16, %s7849_s16   ;;  %s6221_s15 = sphi %s6459_s15, %s7848_s15   ;;  %s6233_s22 = sphi %s6465_s22, %s7851_s22   ;;  %s6229_s18 = sphi %s6463_s18, %s7850_s18  }
  0x42   : > { %s7646_s19 = sld [smem:[#allocation12_spill]]  ;;  %s5478_s23 = sadd.s32 4294967294, %s6233_s22  }
  0x43   : > { %s6484_s26 = sadd.s32 1, %s6233_s22   ;;  %s716_s28 = sadd.s32 1, %s6229_s18 }
  0x44   : > { %s713_s1 = ssub.s32 %s6233_s22, %s6484_s26  ;;  %p726_p0 = scmp.ne.s32.totalorder %s6229_s18, %s6225_s16 }
  0x45   : > { %p714_p1 = scmp.eq.s32.totalorder %s713_s1, 0  ;;  %p727_p2 = scmp.eq.s32.totalorder %s6480_s0, 1 }
  0x46   : > { %p732_p3 = scmp.ne.s32.totalorder %s6225_s16, %s6221_s15  ;;  %p733_p4 = scmp.eq.s32.totalorder %s5478_s23, 1 }
  0x47   : > { %s6495_s2 = scalar_select %p714_p1, %s6229_s18, %s716_s28  }
  0x48   : > { %p6497_p5 = por %p727_p2, %p726_p0  ;;  %p6501_p6 = por %p733_p4, %p732_p3 }
  0x49   : > { %p5481_p7 = scmp.ge.s32.totalorder %s6233_s22, 1  ;;  %p846_p8 = scmp.lt.s32.totalorder %s6233_s22, 3 }
  0x4b   : > { %p847_p9 = pnand %p5481_p7, %p846_p8 }
  0x4c   : > { %s7649_s17 = sld [smem:[#allocation7_spill]] (!%p847_p9)  ;;  %p924_p10 = scmp.lt.s32.totalorder (!%p847_p9), %s6480_s0, 1 }
  0x4d   : > { %850 = sbr.rel (%p847_p9) target bundleno = 3551 (0xddf), region = 140  ;;  %s7650_s5 = sld [smem:[#allocation5_spill]] (!%p847_p9) }
  0x4e   : > { %s7651_s13 = sld [smem:[#allocation6_spill]] (!%p847_p9)  ;;  %s7588_s1 = smov (!%p847_p9), 127  }
  0x4f   : > { %s7660_s14 = sld [smem:[#allocation11_spill]] (!%p847_p9) }
  0x50   : > { %s7661_s24 = sld [smem:[#allocation13_spill]] (!%p847_p9) }
  0x51   : > { %s7662_s6 = sld [smem:[#allocation14_spill]] (!%p847_p9) }
  0x52   : > { %v932_v0 = vld [vmem:[%s7649_s17] sm:$0xff]  ;;  %v6265_v1 = vmov 0   ;;  %s925_s11 = scalar_select %p924_p10, %s6480_s0, 1  ;;  %vm946_vm0 = vcmask 1043456   ;;  %vm942_vm1 = vcmask 31744   ;;  %v6266_v6 = vmov 0.0  }
  0x53   : > { %5747 = vset.pattern.permute.xlu0 %v6265_v1  ;;  %5758 = vset.pattern.permute.xlu2 %v6265_v1  ;;  %vm7619_vm2 = vcmask 64512   ;;  %v992_v14 = vld [vmem:[%s7645_s21 + $0x8] sm:$0xff]  ;;  %v1169_v15 = vld [vmem:[%s6332_s25] sm:$0xff]  ;;  %vm7601_vm3 = vcmask 7168   ;;  %vm7604_vm4 = vcmask 1039360   ;;  %v993_v29 = vld [vmem:[%s7645_s21 + $0x10] sm:$0xff] }
  0x54   : > { %935 = vperm.xlu0 %5747, %v932_v0   ;;  %5769 = vset.pattern.permute.xlu1 %v6265_v1  ;;  %s5642_s23 = sshll.u32 %s925_s11, 3  ;;  %v931_v3 = vld [vmem:[%s7651_s13] sm:$0xff]  ;;  %s7590_s11 = smov 1   ;;  %v1178_v63 = vld [vmem:[%s6337_s29 + $0x8] sm:$0xff]  ;;  %vm7609_vm11 = vcmask 916480   ;;  %vm7610_vm12 = vcmask 130048  }
  0x55   : > { %s928_s28 = scalar_lea.vmem %s7650_s5, %s5642_s23  ;;  %1109 = vrot.lane.b32.xlu2 %v6266_v6, %s7588_s1  ;;  %v991_v20 = vld [vmem:[%s7645_s21] sm:$0xff]  ;;  %s7586_s23 = smov 16   ;;  %vm7600_vm13 = vcmask 392192   ;;  %vm1745_vm14 = vcmask 416768   ;;  %vm1863_vm15 = vcmask 367616  }
  0x56   : > { %v930_v2 = vld [vmem:[%s928_s28] sm:$0xff]  ;;  %s7584_s28 = smov 112   ;;  %s7663_s3 = sld [smem:[#allocation9_spill]] }
  0x57   : > { %939 = vst [vmem:[#allocation1] ss:$2 sm:$0xff] %v930_v2  ;;  %v6546_v30 = vld [vmem:[%s6312_s9] sm:$0x3]  ;;  %s7664_s8 = sld [smem:[#allocation10_spill]]  ;;  %s7595_s5 = smov 125  }
  0x58   : > { %vm1052_vm5 = vcmp.ge.s32.totalorder %v6546_v30, 1  ;;  %vm1159_vm6 = vcmp.lt.s32.totalorder %v6546_v30, 15  ;;  %v1344_v60 = vld [vmem:[%s7660_s14] sm:$0xff]  ;;  %s7690_s13 = smov 112   ;;  %s6285_s14 = smov 5  }
  0x59   : > { %v1053_v31 = vsel %vm1052_vm5, 1, %v6265_v1  ;;  %v1160_v34 = vsel %vm1159_vm6, 1, %v6265_v1  ;;  %v1560_v61 = vld [vmem:[%s7661_s24] sm:$0xff]  ;;  %vm2088_vm5 = vcmask 678912   ;;  %vm2202_vm6 = vcmask 629760   ;;  %s6286_s17 = smov 53  }
  0x5a   : > { %v1054_v32 = vperm.slane %v1053_v31, 0  ;;  %v1055_v33 = vperm.slane %v1053_v31, 1  ;;  %v1161_v39 = vperm.slane %v1160_v34, 0  ;;  %v1162_v40 = vperm.slane %v1160_v34, 1  ;;  %v1720_v62 = vld [vmem:[%s7662_s6] sm:$0xff]  ;;  %s6278_s6 = smov 77  }
  0x5b   : > { %s6287_s21 = smov 123   ;;  %s6288_s24 = smov 43  }
  0x5c   : > { %vm6552_vm7 = vcmp.eq.s32.totalorder %v1054_v32, 1  ;;  %vm6556_vm8 = vcmp.eq.s32.totalorder %v1055_v33, 1  ;;  %vm6564_vm9 = vcmp.eq.s32.totalorder %v1161_v39, 1  ;;  %vm6568_vm10 = vcmp.eq.s32.totalorder %v1162_v40, 1 }
  0x5d   : > { %1172 = vperm.xlu2 %5758, %v1169_v15  }
  0x5e   : > { %v940_v4 = vld.sshfl [vmem:[#allocation1] sm:$0xff pattern:$0x75316420]  ;;  %v941_v5 = vld.sshfl [vmem:[#allocation1 + $0x8] sm:$0xff pattern:$0x75316420] }
  0x5f   : > { %5485 = vmatpush.msk.msra.mxu0 %vm946_vm0, %v940_v4  ;;  %5487 = vmatpush.msk.msra.mxu1 %vm946_vm0, %v941_v5  ;;  %1350 = vst [vmem:[#allocation1] ss:$2 sm:$0xff] %v930_v2  ;;  %v1179_v5 = vld [vmem:[%s6337_s29 + $0x10] sm:$0xff] }
  0x60   : > { %5486 = vmatmul.msk.f32.vlgmr.msra.gmra.mxu0 %vm942_vm1, %v931_v3  ;;  %5488 = vmatmul.msk.f32.vlgmr.msra.gmra.mxu1 %vm942_vm1, %v931_v3 }
  0x66   : > { %v1351_v15 = vld.sshfl [vmem:[#allocation1] sm:$0xff pattern:$0x75316420] }
  0xaf   : > { %v6537_v24 = vpop.permute.xlu2 %1109 }
  0xb7   : > { %v1173_v53 = vpop.permute.xlu2 %1172 }
  0xc6   : > { %v936_v7 = vpop.permute.xlu0 %935 }
  0xdd   : > { %v968_v8 = vpop.f32.mrf.mxu0  ;;  %v988_v9 = vpop.f32.mrf.mxu1 }
  0xde   : > { %v969_v10 = vadd.f32 %v968_v8, %v936_v7  ;;  %v989_v11 = vadd.f32 %v988_v9, %v936_v7  ;;  %v1335_v7 = vld [vmem:[%s7663_s3] sm:$0xff]  ;;  %s7596_s3 = smov 3  }
  0xe0   : > { %1001 = vrot.lane.b32.xlu1 %v989_v11, %s7590_s11  ;;  %1078 = vmatpush.msrb.mxu0 %v969_v10  ;;  %v5748_v12 = vpack.i.bf16 %v969_v10, %v6266_v6  ;;  %v5753_v13 = vpack.i.bf16 %v989_v11, %v969_v10 }
  0xe1   : > { %1098 = vmatpush.msrb.mxu1 %v989_v11  ;;  %5491 = vmatmul.msk.f32.vlgmr.msrb.gmra.mxu0 %vm7619_vm2, %v992_v14 }
  0xe2   : > { %5749 = vrot.lane.b32.xlu0 %v5748_v12, %s7590_s11  ;;  %5492 = vmatmul.msk.f32.vlgmr.msrb.gmra.mxu1 %vm7619_vm2, %v992_v14  ;;  %v1177_v12 = vld [vmem:[%s6337_s29] sm:$0xff] }
  0xe8   : > { %5754 = vrot.lane.b32.xlu1 %v5753_v13, %s7588_s1 }
 0x152   : > { %v1002_v16 = vpop.permute.xlu1 %1001 }
 0x154   : > { %v5750_v17 = vpop.permute.xlu0 %5749 }
 0x155   : > { %v5752_v18 = vunpack.i.h.bf16 %v5750_v17  ;;  %v6529_v19 = vunpack.i.l.bf16 %v5750_v17 }
 0x157   : > { %v1004_v21 = vsel %vm7601_vm3, %v6529_v19, %v5752_v18  ;;  %v1005_v22 = vsel %vm7601_vm3, %v5752_v18, %v1002_v16  ;;  %v1352_v16 = vld.sshfl [vmem:[#allocation1 + $0x8] sm:$0xff pattern:$0x75316420] }
 0x158   : > { %1027 = vmatpush.msra.mxu2 %v1004_v21  ;;  %1047 = vmatpush.msra.mxu3 %v1005_v22 }
 0x159   : > { %5489 = vmatmul.msk.f32.vlgmr.msra.gmra.mxu2 %vm7619_vm2, %v991_v20  ;;  %5490 = vmatmul.msk.f32.vlgmr.msra.gmra.mxu3 %vm7619_vm2, %v991_v20  ;;  %v1343_v20 = vld [vmem:[%s7664_s8] sm:$0xff]  ;;  %s7689_s8 = smov 16  }
 0x15a   : > { %v5755_v23 = vpop.permute.xlu1 %5754 }
 0x15b   : > { %v5757_v25 = vunpack.i.h.bf16 %v5755_v23  ;;  %v5756_v26 = vunpack.i.l.bf16 %v5755_v23 }
 0x15d   : > { %v1112_v27 = vsel %vm7604_vm4, %v5756_v26, %v5757_v25  ;;  %v1113_v28 = vsel %vm7604_vm4, %v5757_v25, %v6537_v24 }
 0x15e   : > { %1134 = vmatpush.msrb.mxu2 %v1112_v27  ;;  %1154 = vmatpush.msrb.mxu3 %v1113_v28  ;;  %v1080_v43 = vpop.f32.mrf.mxu0 }
 0x15f   : > { %v1100_v44 = vpop.f32.mrf.mxu1 }
 0x161   : > { %5493 = vmatmul.msk.f32.vlgmr.msrb.gmra.mxu2 %vm7619_vm2, %v993_v29  ;;  %5494 = vmatmul.msk.f32.vlgmr.msrb.gmra.mxu3 %vm7619_vm2, %v993_v29 }
 0x1dc   : > { %v1029_v35 = vpop.f32.mrf.mxu2  ;;  %v1049_v36 = vpop.f32.mrf.mxu3 }
 0x1dd   : > { %v1058_v41 = vsel %vm6552_vm7, %v1029_v35, 0.0  ;;  %v1059_v42 = vsel %vm6556_vm8, %v1049_v36, 0.0 }
 0x1de   : > { %v1103_v47 = vadd.f32 %v1080_v43, %v1058_v41  ;;  %v1104_v48 = vadd.f32 %v1100_v44, %v1059_v42 }
 0x1e4   : > { %v1136_v49 = vpop.f32.mrf.mxu2  ;;  %v1156_v50 = vpop.f32.mrf.mxu3 }
 0x1e5   : > { %v1165_v51 = vsel %vm6564_vm9, %v1136_v49, 0.0  ;;  %v1166_v52 = vsel %vm6568_vm10, %v1156_v50, 0.0 }
 0x1e6   : > { %v1167_v54 = vadd.f32 %v1165_v51, %v1103_v47  ;;  %v1168_v55 = vadd.f32 %v1166_v52, %v1104_v48  ;;  %v1403_v47 = vld [vmem:[%s7646_s19 + $0x8] sm:$0xff] }
 0x1e8   : > { %v1175_v56 = vadd.f32 %v1173_v53, %v1167_v54  ;;  %v1176_v57 = vadd.f32 %v1173_v53, %v1168_v55  ;;  %v1402_v55 = vld [vmem:[%s7646_s19] sm:$0xff] }
 0x1ea   : > { %1229 = vrot.lane.b32.xlu1 %v1176_v57, %s7586_s23  ;;  %1198 = vmatpush.msra.mxu0 %v1175_v56  ;;  %v5764_v58 = vpack.i.bf16 %v1176_v57, %v1175_v56  ;;  %v5759_v59 = vpack.i.bf16 %v1175_v56, %v6266_v6 }
 0x1eb   : > { %1218 = vmatpush.msra.mxu1 %v1176_v57  ;;  %5495 = vmatmul.msk.f32.vlgmr.msra.gmra.mxu0 %vm7619_vm2, %v1178_v63 }
 0x1ec   : > { %5765 = vrot.lane.b32.xlu2 %v5764_v58, %s7584_s28  ;;  %5760 = vrot.lane.b32.xlu0 %v5759_v59, %s7586_s23 }
 0x1ed   : > { %5496 = vmatmul.msk.f32.vlgmr.msra.gmra.mxu1 %vm7619_vm2, %v1178_v63 }
 0x1f2   : > { %1338 = vperm.xlu1 %5769, %v1335_v7  }
 0x1f4   : > { %1347 = vperm.xlu2 %5758, %v1344_v60   ;;  %1283 = vrot.lane.b32.xlu0 %v6266_v6, %s7584_s28  ;;  %v1404_v60 = vld [vmem:[%s7646_s19 + $0x10] sm:$0xff]  ;;  %s7695_s19 = sld [smem:[#allocation21_spill]] }
 0x1fc   : > { %1563 = vperm.xlu2 %5758, %v1560_v61  }
 0x204   : > { %1723 = vperm.xlu2 %5758, %v1720_v62  }
 0x246   : > { %v5766_v0 = vpop.permute.xlu2 %5765 }
 0x247   : > { %v5768_v2 = vunpack.i.h.bf16 %v5766_v0  ;;  %v5767_v3 = vunpack.i.l.bf16 %v5766_v0 }
 0x249   : > { %v1286_v4 = vsel %vm7609_vm11, %v5767_v3, %v5768_v2 }
 0x24a   : > { %1308 = vmatpush.msrb.mxu0 %v1286_v4 }
 0x24b   : > { %5499 = vmatmul.msk.f32.vlgmr.msrb.gmra.mxu0 %vm7619_vm2, %v1179_v5 }
 0x24e   : > { %v1348_v34 = vpop.permute.xlu2 %1347 }
 0x25c   : > { %v1230_v11 = vpop.permute.xlu1 %1229 }
 0x25e   : > { %v5761_v8 = vpop.permute.xlu0 %5760 }
 0x25f   : > { %v5763_v9 = vunpack.i.h.bf16 %v5761_v8  ;;  %v6592_v10 = vunpack.i.l.bf16 %v5761_v8 }
 0x261   : > { %v1232_v13 = vsel %vm7610_vm12, %v6592_v10, %v5763_v9  ;;  %v1233_v14 = vsel %vm7610_vm12, %v5763_v9, %v1230_v11 }
 0x262   : > { %1254 = vmatpush.msra.mxu2 %v1232_v13  ;;  %1274 = vmatpush.msra.mxu3 %v1233_v14  ;;  %v1564_v14 = vpop.permute.xlu2 %1563 }
 0x263   : > { %5497 = vmatmul.msk.f32.vlgmr.msra.gmra.mxu2 %vm7619_vm2, %v1177_v12  ;;  %5498 = vmatmul.msk.f32.vlgmr.msra.gmra.mxu3 %vm7619_vm2, %v1177_v12 }
 0x264   : > { %5501 = vmatpush.msk.msrb.mxu2 %vm946_vm0, %v1351_v15  ;;  %5503 = vmatpush.msk.msrb.mxu3 %vm946_vm0, %v1352_v16  ;;  %v1339_v33 = vpop.permute.xlu1 %1338  ;;  %vm7599_vm0 = vcmask 23552  }
 0x266   : > { %v6602_v17 = vpop.permute.xlu0 %1283 }
 0x267   : > { %v1287_v18 = vsel %vm7609_vm11, %v5768_v2, %v6602_v17 }
 0x268   : > { %1328 = vmatpush.msrb.mxu1 %v1287_v18  ;;  %v1200_v21 = vpop.f32.mrf.mxu0  ;;  %v1569_v18 = vld [vmem:[%s6367_s30 + $0x8] sm:$0xff] }
 0x269   : > { %5500 = vmatmul.msk.f32.vlgmr.msrb.gmra.mxu1 %vm7619_vm2, %v1179_v5 }
 0x26a   : > { %v1220_v22 = vpop.f32.mrf.mxu1 }
 0x26b   : > { %5502 = vmatmul.msk.f32.vlgmr.msrb.gmra.mxu2 %vm942_vm1, %v1343_v20  ;;  %5504 = vmatmul.msk.f32.vlgmr.msrb.gmra.mxu3 %vm942_vm1, %v1343_v20  ;;  %vm7594_vm1 = vcmask 1022976  }
 0x2c8   : > { %v1310_v28 = vpop.f32.mrf.mxu0 }
 0x2e6   : > { %v1256_v23 = vpop.f32.mrf.mxu2  ;;  %v1276_v25 = vpop.f32.mrf.mxu3 }
 0x2e7   : > { %v1257_v26 = vadd.f32 %v1256_v23, %v1200_v21  ;;  %v1277_v27 = vadd.f32 %v1276_v25, %v1220_v22  ;;  %v1330_v29 = vpop.f32.mrf.mxu1 }
 0x2e9   : > { %v1333_v31 = vadd.f32 %v1310_v28, %v1257_v26  ;;  %v1334_v32 = vadd.f32 %v1330_v29, %v1277_v27 }
 0x2eb   : > { %v6610_v39 = vadd.f32 %v1339_v33, %v1333_v31  ;;  %v6612_v40 = vadd.f32 %v1339_v33, %v1334_v32  ;;  %v1568_v33 = vld [vmem:[%s6367_s30] sm:$0xff] }
 0x2ee   : > { %v1377_v35 = vpop.f32.mrf.mxu2  ;;  %v1397_v36 = vpop.f32.mrf.mxu3 }
 0x2ef   : > { %v6614_v41 = vadd.f32 %v1377_v35, %v1348_v34  ;;  %v6616_v42 = vadd.f32 %v1397_v36, %v1348_v34  ;;  %v1570_v34 = vld [vmem:[%s6367_s30 + $0x10] sm:$0xff] }
 0x2f1   : > { %v1400_v43 = vadd.f32 %v6614_v41, %v6610_v39  ;;  %v1401_v44 = vadd.f32 %v6616_v42, %v6612_v40 }
 0x2f3   : > { %1478 = vmatpush.msra.mxu2 %v1400_v43  ;;  %1498 = vmatpush.msra.mxu3 %v1401_v44  ;;  %v5775_v48 = vpack.i.bf16 %v1401_v44, %v1400_v43 }
 0x2f4   : > { %5508 = vmatmul.msk.f32.vlgmr.msra.gmra.mxu3 %vm7619_vm2, %v1403_v47  ;;  %5507 = vmatmul.msk.f32.vlgmr.msra.gmra.mxu2 %vm7619_vm2, %v1403_v47 }
 0x2f5   : > { %5776 = vrot.lane.b32.xlu1 %v5775_v48, %s7588_s1  ;;  %5771 = vrot.lane.b32.xlu0 %v5775_v48, %s7590_s11  ;;  %s6273_s1 = smov 45   ;;  %s7665_s11 = sld [smem:[#allocation16_spill]] }
 0x367   : > { %v5777_v49 = vpop.permute.xlu1 %5776  ;;  %v5772_v50 = vpop.permute.xlu0 %5771 }
 0x368   : > { %v5779_v51 = vunpack.i.h.bf16 %v5777_v49  ;;  %v5778_v52 = vunpack.i.l.bf16 %v5777_v49  ;;  %v5774_v53 = vunpack.i.h.bf16 %v5772_v50  ;;  %v5773_v54 = vunpack.i.l.bf16 %v5772_v50 }
 0x36a   : > { %v1411_v56 = vsel %vm7601_vm3, %v6529_v19, %v5773_v54  ;;  %v1412_v57 = vsel %vm7601_vm3, %v5773_v54, %v5774_v53  ;;  %v1509_v58 = vsel %vm7604_vm4, %v5778_v52, %v5779_v51  ;;  %v1510_v59 = vsel %vm7604_vm4, %v5779_v51, %v6537_v24  ;;  %v1724_v52 = vpop.permute.xlu2 %1723 }
 0x36b   : > { %1433 = vmatpush.msra.mxu0 %v1411_v56  ;;  %1453 = vmatpush.msra.mxu1 %v1412_v57 }
 0x36c   : > { %5505 = vmatmul.msk.f32.vlgmr.msra.gmra.mxu0 %vm7619_vm2, %v1402_v55  ;;  %5506 = vmatmul.msk.f32.vlgmr.msra.gmra.mxu1 %vm7619_vm2, %v1402_v55 }
 0x36d   : > { %1531 = vmatpush.msrb.mxu0 %v1509_v58  ;;  %1551 = vmatpush.msrb.mxu1 %v1510_v59  ;;  %v2254_v58 = vld [vmem:[%s7665_s11] sm:$0xff]  ;;  %s7606_s11 = smov 2  }
 0x374   : > { %5509 = vmatmul.msk.f32.vlgmr.msrb.gmra.mxu0 %vm7619_vm2, %v1404_v60  ;;  %5510 = vmatmul.msk.f32.vlgmr.msrb.gmra.mxu1 %vm7619_vm2, %v1404_v60 }
 0x377   : > { %v1480_v2 = vpop.f32.mrf.mxu2  ;;  %v1500_v3 = vpop.f32.mrf.mxu3 }
 0x3e9   : > { %v1435_v61 = vpop.f32.mrf.mxu0  ;;  %v1455_v62 = vpop.f32.mrf.mxu1 }
 0x3ea   : > { %v1458_v63 = vsel %vm6552_vm7, %v1435_v61, 0.0  ;;  %v1459_v0 = vsel %vm6556_vm8, %v1455_v62, 0.0 }
 0x3eb   : > { %v1503_v4 = vadd.f32 %v1480_v2, %v1458_v63  ;;  %v1504_v5 = vadd.f32 %v1500_v3, %v1459_v0 }
 0x3f1   : > { %v1533_v7 = vpop.f32.mrf.mxu0  ;;  %v1553_v8 = vpop.f32.mrf.mxu1 }
 0x3f2   : > { %v1556_v9 = vsel %vm6564_vm9, %v1533_v7, 0.0  ;;  %v1557_v11 = vsel %vm6568_vm10, %v1553_v8, 0.0 }
 0x3f3   : > { %v1558_v12 = vadd.f32 %v1556_v9, %v1503_v4  ;;  %v1559_v13 = vadd.f32 %v1557_v11, %v1504_v5 }
 0x3f5   : > { %v1566_v15 = vadd.f32 %v1564_v14, %v1558_v12  ;;  %v1567_v16 = vadd.f32 %v1564_v14, %v1559_v13 }
 0x3f7   : > { %1589 = vmatpush.msrb.mxu2 %v1566_v15  ;;  %1609 = vmatpush.msrb.mxu3 %v1567_v16  ;;  %v5785_v20 = vpack.i.bf16 %v1567_v16, %v1566_v15 }
 0x3f8   : > { %5511 = vmatmul.msk.f32.vlgmr.msrb.gmra.mxu2 %vm7619_vm2, %v1569_v18  ;;  %5512 = vmatmul.msk.f32.vlgmr.msrb.gmra.mxu3 %vm7619_vm2, %v1569_v18 }
 0x3f9   : > { %5786 = vrot.lane.b32.xlu1 %v5785_v20, %s7586_s23  ;;  %5781 = vrot.lane.b32.xlu0 %v5785_v20, %s7584_s28  ;;  %s6271_s28 = smov 51   ;;  %s7592_s23 = smov 48  }
 0x46b   : > { %v5787_v21 = vpop.permute.xlu1 %5786  ;;  %v5782_v22 = vpop.permute.xlu0 %5781 }
 0x46c   : > { %v5789_v23 = vunpack.i.h.bf16 %v5787_v21  ;;  %v5788_v25 = vunpack.i.l.bf16 %v5787_v21  ;;  %v5784_v26 = vunpack.i.h.bf16 %v5782_v22  ;;  %v5783_v27 = vunpack.i.l.bf16 %v5782_v22 }
 0x46e   : > { %v1620_v28 = vsel %vm7610_vm12, %v6592_v10, %v5788_v25  ;;  %v1621_v29 = vsel %vm7610_vm12, %v5788_v25, %v5789_v23  ;;  %v1671_v31 = vsel %vm7609_vm11, %v5783_v27, %v5784_v26  ;;  %v1672_v32 = vsel %vm7609_vm11, %v5784_v26, %v6602_v17 }
 0x46f   : > { %1642 = vmatpush.msra.mxu0 %v1620_v28  ;;  %1662 = vmatpush.msra.mxu1 %v1621_v29  ;;  %vm7617_vm11 = vcmask 785408  }
 0x470   : > { %1693 = vmatpush.msra.mxu2 %v1671_v31  ;;  %1713 = vmatpush.msra.mxu3 %v1672_v32 }
 0x471   : > { %5513 = vmatmul.msk.f32.vlgmr.msra.gmra.mxu0 %vm7619_vm2, %v1568_v33  ;;  %5515 = vmatmul.msk.f32.vlgmr.msra.gmra.mxu2 %vm7619_vm2, %v1570_v34 }
 0x472   : > { %5516 = vmatmul.msk.f32.vlgmr.msra.gmra.mxu3 %vm7619_vm2, %v1570_v34  ;;  %5514 = vmatmul.msk.f32.vlgmr.msra.gmra.mxu1 %vm7619_vm2, %v1568_v33 }
 0x47b   : > { %v1591_v35 = vpop.f32.mrf.mxu2  ;;  %v1611_v36 = vpop.f32.mrf.mxu3 }
 0x4ee   : > { %v1644_v43 = vpop.f32.mrf.mxu0 }
 0x4ef   : > { %v1664_v44 = vpop.f32.mrf.mxu1  ;;  %v1645_v47 = vadd.f32 %v1644_v43, %v1591_v35 }
 0x4f0   : > { %v1665_v48 = vadd.f32 %v1664_v44, %v1611_v36 }
 0x4f4   : > { %v1695_v49 = vpop.f32.mrf.mxu2 }
 0x4f5   : > { %v1718_v50 = vadd.f32 %v1695_v49, %v1645_v47  ;;  %v1715_v51 = vpop.f32.mrf.mxu3 }
 0x4f6   : > { %v1719_v53 = vadd.f32 %v1715_v51, %v1665_v48 }
 0x4f7   : > { %v6664_v54 = vadd.f32 %v1724_v52, %v1718_v50 }
 0x4f8   : > { %v6666_v55 = vadd.f32 %v1724_v52, %v1719_v53 }
 0x4f9   : > { %v5795_v56 = vpack.i.bf16 %v6664_v54, %v6266_v6 }
 0x4fa   : > { %1743 = vrot.lane.b32.xlu1 %v6666_v55, %s6271_s28  ;;  %v5810_v57 = vpack.i.bf16 %v6666_v55, %v6664_v54 }
 0x4fb   : > { %5796 = vrot.lane.b32.xlu2 %v5795_v56, %s7592_s23  ;;  %5791 = vrot.lane.b32.xlu0 %v5795_v56, %s6271_s28  ;;  %s6276_s28 = smov 83  }
 0x502   : > { %5801 = vrot.lane.b32.xlu1 %v5795_v56, %s6273_s1 }
 0x503   : > { %1861 = vrot.lane.b32.xlu2 %v6666_v55, %s6273_s1  ;;  %1805 = vrot.lane.b32.xlu0 %v6666_v55, %s7592_s23  ;;  %s7666_s1 = sld [smem:[#allocation15_spill]]  ;;  %s7597_s23 = smov 80  }
 0x509   : > { %v1729_v63 = vld [vmem:[%s7666_s1 + $0x8] sm:$0xff]  ;;  %v1728_v8 = vld [vmem:[%s7666_s1] sm:$0xff]  ;;  %v1730_v22 = vld [vmem:[%s7666_s1 + $0x10] sm:$0xff] }
 0x50a   : > { %1925 = vrot.lane.b32.xlu1 %v6666_v55, %s7596_s3  ;;  %v1731_v31 = vld [vmem:[%s7666_s1 + $0x18] sm:$0xff]  ;;  %v1732_v34 = vld [vmem:[%s7666_s1 + $0x20] sm:$0xff] }
 0x50b   : > { %5811 = vrot.lane.b32.xlu2 %v5810_v57, %s7595_s5  ;;  %5806 = vrot.lane.b32.xlu0 %v5795_v56, %s7596_s3  ;;  %v1734_v56 = vld [vmem:[%s7666_s1 + $0x30] sm:$0xff]  ;;  %s7605_s3 = smov 126  }
 0x512   : > { %5816 = vrot.lane.b32.xlu1 %v5810_v57, %s6276_s28 }
 0x513   : > { %2086 = vrot.lane.b32.xlu2 %v6266_v6, %s6276_s28  ;;  %2028 = vrot.lane.b32.xlu0 %v6266_v6, %s7595_s5  ;;  %s7676_s28 = sld [smem:[#allocation17_spill]]  ;;  %s7677_s5 = smov 1  }
 0x51a   : > { %2144 = vrot.lane.b32.xlu1 %v6266_v6, %s7597_s23 }
 0x51b   : > { %5826 = vrot.lane.b32.xlu2 %v5810_v57, %s6278_s6  ;;  %5821 = vrot.lane.b32.xlu0 %v5810_v57, %s7597_s23  ;;  %s7678_s23 = smov 127  }
 0x522   : > { %2257 = vperm.xlu1 %5769, %v2254_v58  }
 0x523   : > { %2200 = vrot.lane.b32.xlu0 %v6266_v6, %s6278_s6  ;;  %s7675_s6 = sld [smem:[#allocation18_spill]] }
 0x555   : > { %v5797_v59 = vpop.permute.xlu2 %5796 }
 0x556   : > { %v5799_v60 = vunpack.i.h.bf16 %v5797_v59  ;;  %v6689_v61 = vunpack.i.l.bf16 %v5797_v59 }
 0x558   : > { %v1808_v62 = vsel %vm7600_vm13, %v6689_v61, %v5799_v60 }
 0x559   : > { %1830 = vmatpush.msrb.mxu2 %v1808_v62  ;;  %v1735_v62 = vld [vmem:[%s7666_s1 + $0x38] sm:$0xff] }
 0x55a   : > { %5519 = vmatmul.msk.f32.vlgmr.msrb.gmra.mxu2 %vm7619_vm2, %v1729_v63 }
 0x55d   : > { %v1862_v0 = vpop.permute.xlu2 %1861 }
 0x565   : > { %v5812_v3 = vpop.permute.xlu2 %5811 }
 0x566   : > { %v5814_v26 = vunpack.i.h.bf16 %v5812_v3  ;;  %v5813_v27 = vunpack.i.l.bf16 %v5812_v3 }
 0x568   : > { %v2031_v36 = vsel %vm7594_vm1, %v5813_v27, %v5814_v26  ;;  %v7671_v27 = vmov 0 }
 0x56c   : > { %v1744_v2 = vpop.permute.xlu1 %1743 }
 0x56d   : > { %v5792_v4 = vpop.permute.xlu0 %5791  ;;  %v2087_v18 = vpop.permute.xlu2 %2086 }
 0x56e   : > { %v5794_v5 = vunpack.i.h.bf16 %v5792_v4  ;;  %v5793_v7 = vunpack.i.l.bf16 %v5792_v4 }
 0x570   : > { %v1746_v9 = vsel %vm1745_vm14, %v5793_v7, %v5794_v5  ;;  %v1747_v11 = vsel %vm1745_vm14, %v5794_v5, %v1744_v2  ;;  %vm7608_vm14 = vcmask 654336   ;;  %v1736_v2 = vld [vmem:[%s7666_s1 + $0x40] sm:$0xff] }
 0x571   : > { %1768 = vmatpush.msrb.mxu0 %v1746_v9  ;;  %1788 = vmatpush.msrb.mxu1 %v1747_v11 }
 0x572   : > { %5518 = vmatmul.msk.f32.vlgmr.msrb.gmra.mxu1 %vm7619_vm2, %v1728_v8  ;;  %5517 = vmatmul.msk.f32.vlgmr.msrb.gmra.mxu0 %vm7619_vm2, %v1728_v8 }
 0x574   : > { %v5802_v12 = vpop.permute.xlu1 %5801 }
 0x575   : > { %v5804_v13 = vunpack.i.h.bf16 %v5802_v12  ;;  %v5803_v14 = vunpack.i.l.bf16 %v5802_v12  ;;  %v1806_v15 = vpop.permute.xlu0 %1805  ;;  %v5827_v35 = vpop.permute.xlu2 %5826 }
 0x576   : > { %v1809_v16 = vsel %vm7600_vm13, %v5799_v60, %v1806_v15  ;;  %v5829_v43 = vunpack.i.h.bf16 %v5827_v35  ;;  %v5828_v44 = vunpack.i.l.bf16 %v5827_v35  ;;  %vm7602_vm13 = vcmask 1031168  }
 0x577   : > { %1850 = vmatpush.msrb.mxu3 %v1809_v16  ;;  %v1864_v20 = vsel %vm1863_vm15, %v5803_v14, %v5804_v13  ;;  %v1865_v21 = vsel %vm1863_vm15, %v5804_v13, %v1862_v0  ;;  %vm1793_vm15 = vcmp.ge.s32.totalorder %v6546_v30, 3 }
 0x578   : > { %1886 = vmatpush.msra.mxu0 %v1864_v20  ;;  %1906 = vmatpush.msra.mxu1 %v1865_v21  ;;  %v1794_v9 = vsel %vm1793_vm15, 1, %v6265_v1 }
 0x579   : > { %5520 = vmatmul.msk.f32.vlgmr.msrb.gmra.mxu3 %vm7619_vm2, %v1729_v63  ;;  %v1795_v11 = vperm.slane %v1794_v9, 0  ;;  %v1796_v15 = vperm.slane %v1794_v9, 1 }
 0x57a   : > { %1997 = vmatpush.msrb.mxu0 %v6664_v54  ;;  %2017 = vmatpush.msrb.mxu1 %v6666_v55  ;;  %v1733_v54 = vld [vmem:[%s7666_s1 + $0x28] sm:$0xff]  ;;  %v2203_v55 = vsel %vm2202_vm6, %v5828_v44, %v5829_v43  ;;  %s7612_s1 = smov 96  }
 0x57b   : > { %5521 = vmatmul.msk.f32.vlgmr.msra.gmra.mxu0 %vm7619_vm2, %v1730_v22  ;;  %5522 = vmatmul.msk.f32.vlgmr.msra.gmra.mxu1 %vm7619_vm2, %v1730_v22 }
 0x57c   : > { %v1926_v23 = vpop.permute.xlu1 %1925 }
 0x57d   : > { %v6705_v25 = vpop.permute.xlu0 %5806 }
 0x57e   : > { %v5809_v28 = vunpack.i.h.bf16 %v6705_v25  ;;  %v5808_v29 = vunpack.i.l.bf16 %v6705_v25 }
 0x580   : > { %v1928_v32 = vsel %vm7599_vm0, %v5808_v29, %v5809_v28  ;;  %v1929_v33 = vsel %vm7599_vm0, %v5809_v28, %v1926_v23  ;;  %v7673_v28 = vmov 0  ;;  %vm7603_vm0 = vcmask 15360  }
 0x581   : > { %1950 = vmatpush.msra.mxu2 %v1928_v32  ;;  %1970 = vmatpush.msra.mxu3 %v1929_v33 }
 0x582   : > { %5523 = vmatmul.msk.f32.vlgmr.msra.gmra.mxu2 %vm7619_vm2, %v1731_v31  ;;  %5524 = vmatmul.msk.f32.vlgmr.msra.gmra.mxu3 %vm7619_vm2, %v1731_v31 }
 0x583   : > { %2053 = vmatpush.msrb.mxu2 %v2031_v36  ;;  %5525 = vmatmul.msk.f32.vlgmr.msrb.gmra.mxu0 %vm7619_vm2, %v1732_v34 }
 0x584   : > { %v5817_v47 = vpop.permute.xlu1 %5816  ;;  %5526 = vmatmul.msk.f32.vlgmr.msrb.gmra.mxu1 %vm7619_vm2, %v1732_v34 }
 0x585   : > { %v5819_v48 = vunpack.i.h.bf16 %v5817_v47  ;;  %v5818_v49 = vunpack.i.l.bf16 %v5817_v47  ;;  %v6720_v50 = vpop.permute.xlu0 %2028 }
 0x586   : > { %v2032_v51 = vsel %vm7594_vm1, %v5814_v26, %v6720_v50  ;;  %vm6751_vm1 = vcmp.eq.s32.totalorder %v1796_v15, 1 }
 0x587   : > { %2073 = vmatpush.msrb.mxu3 %v2032_v51  ;;  %v2089_v52 = vsel %vm2088_vm5, %v5818_v49, %v5819_v48  ;;  %v2090_v53 = vsel %vm2088_vm5, %v5819_v48, %v2087_v18  ;;  %vm1911_vm5 = vcmp.lt.s32.totalorder %v6546_v30, 13 }
 0x588   : > { %2111 = vmatpush.msra.mxu0 %v2089_v52  ;;  %2131 = vmatpush.msra.mxu1 %v2090_v53  ;;  %v1912_v13 = vsel %vm1911_vm5, 1, %v6265_v1 }
 0x589   : > { %v1914_v20 = vperm.slane %v1912_v13, 1  ;;  %v1913_v21 = vperm.slane %v1912_v13, 0 }
 0x58a   : > { %2225 = vmatpush.msrb.mxu0 %v2203_v55  ;;  %5527 = vmatmul.msk.f32.vlgmr.msrb.gmra.mxu2 %vm7619_vm2, %v1733_v54 }
 0x58b   : > { %5528 = vmatmul.msk.f32.vlgmr.msrb.gmra.mxu3 %vm7619_vm2, %v1733_v54  ;;  %5529 = vmatmul.msk.f32.vlgmr.msra.gmra.mxu0 %vm7619_vm2, %v1734_v56  ;;  %vm6757_vm15 = vcmp.eq.s32.totalorder %v1914_v20, 1  ;;  %vm6761_vm5 = vcmp.eq.s32.totalorder %v1913_v21, 1 }
 0x58c   : > { %5530 = vmatmul.msk.f32.vlgmr.msra.gmra.mxu1 %vm7619_vm2, %v1734_v56  ;;  %v6731_v60 = vpop.permute.xlu1 %2144  ;;  %v7672_v27 = vsel %vm6757_vm15, 4294967295, %v7671_v27  ;;  %v7674_v28 = vsel %vm6761_vm5, 4294967295, %v7673_v28 }
 0x58d   : > { %v5822_v57 = vpop.permute.xlu0 %5821 }
 0x58e   : > { %v5824_v58 = vunpack.i.h.bf16 %v5822_v57  ;;  %v5823_v59 = vunpack.i.l.bf16 %v5822_v57 }
 0x590   : > { %v2147_v63 = vsel %vm7608_vm14, %v5823_v59, %v5824_v58  ;;  %v2148_v0 = vsel %vm7608_vm14, %v5824_v58, %v6731_v60  ;;  %vm7611_vm14 = vcmask 261120  }
 0x591   : > { %2169 = vmatpush.msra.mxu2 %v2147_v63  ;;  %2189 = vmatpush.msra.mxu3 %v2148_v0 }
 0x592   : > { %5531 = vmatmul.msk.f32.vlgmr.msra.gmra.mxu2 %vm7619_vm2, %v1735_v62 }
 0x593   : > { %5532 = vmatmul.msk.f32.vlgmr.msra.gmra.mxu3 %vm7619_vm2, %v1735_v62  ;;  %5533 = vmatmul.msk.f32.vlgmr.msrb.gmra.mxu0 %vm7619_vm2, %v1736_v2 }
 0x595   : > { %v2201_v3 = vpop.permute.xlu0 %2200 }
 0x596   : > { %v2204_v4 = vsel %vm2202_vm6, %v5829_v43, %v2201_v3  ;;  %vm6747_vm6 = vcmp.eq.s32.totalorder %v1795_v11, 1 }
 0x597   : > { %2245 = vmatpush.msrb.mxu1 %v2204_v4 }
 0x598   : > { %5534 = vmatmul.msk.f32.vlgmr.msrb.gmra.mxu1 %vm7619_vm2, %v1736_v2 }
 0x5dd   : > { %v1832_v14 = vpop.f32.mrf.mxu2 }
 0x5ef   : > { %v1770_v5 = vpop.f32.mrf.mxu0  ;;  %v1790_v7 = vpop.f32.mrf.mxu1 }
 0x5f0   : > { %v1799_v26 = vsel %vm6747_vm6, %v1770_v5, 0.0  ;;  %v1800_v32 = vsel %vm6751_vm1, %v1790_v7, 0.0 }
 0x5f1   : > { %v1855_v34 = vadd.f32 %v1832_v14, %v1799_v26 }
 0x5f8   : > { %v1888_v8 = vpop.f32.mrf.mxu0  ;;  %v1908_v12 = vpop.f32.mrf.mxu1 }
 0x5f9   : > { %v1918_v35 = vsel %vm6757_vm15, %v1908_v12, 0.0  ;;  %v1917_v36 = vsel %vm6761_vm5, %v1888_v8, 0.0 }
 0x5fa   : > { %v1919_v51 = vadd.f32 %v1917_v36, %v1855_v34  ;;  %v2552_v36 = vld [vmem:[%s7675_s6] sm:$0xff]  ;;  %s7687_s6 = sld [smem:[#allocation20_spill]] }
 0x5fc   : > { %v1852_v16 = vpop.f32.mrf.mxu3 }
 0x5fd   : > { %v1856_v33 = vadd.f32 %v1852_v16, %v1800_v32 }
 0x5ff   : > { %v1920_v49 = vadd.f32 %v1918_v35, %v1856_v33 }
 0x600   : > { %v1999_v23 = vpop.f32.mrf.mxu0 }
 0x601   : > { %v2019_v31 = vpop.f32.mrf.mxu1 }
 0x605   : > { %v1952_v43 = vpop.f32.mrf.mxu2  ;;  %v1972_v44 = vpop.f32.mrf.mxu3 }
 0x606   : > { %v1975_v47 = vsel %vm6747_vm6, %v1952_v43, 0.0  ;;  %v1976_v48 = vsel %vm6751_vm1, %v1972_v44, 0.0 }
 0x607   : > { %v1977_v53 = vadd.f32 %v1975_v47, %v1919_v51  ;;  %v1978_v54 = vadd.f32 %v1976_v48, %v1920_v49  ;;  %v2264_v49 = vld [vmem:[%s7676_s28] sm:$0xff] }
 0x608   : > { %v2113_v52 = vpop.f32.mrf.mxu0 }
 0x609   : > { %v2133_v55 = vpop.f32.mrf.mxu1  ;;  %v2022_v58 = vadd.f32 %v1999_v23, %v1977_v53  ;;  %v2023_v59 = vadd.f32 %v2019_v31, %v1978_v54  ;;  %v2136_v3 = vsel %vm6747_vm6, %v2113_v52, 0.0  ;;  %v2258_v23 = vpop.permute.xlu1 %2257 }
 0x60a   : > { %v2137_v4 = vsel %vm6751_vm1, %v2133_v55, 0.0  ;;  %v2266_v55 = vld [vmem:[%s7676_s28 + $0x10] sm:$0xff] }
 0x60d   : > { %v2055_v56 = vpop.f32.mrf.mxu2 }
 0x60e   : > { %v2075_v57 = vpop.f32.mrf.mxu3  ;;  %v2078_v62 = vsel %vm6761_vm5, %v2055_v56, 0.0  ;;  %v2268_v56 = vld [vmem:[%s7676_s28 + $0x20] sm:$0xff] }
 0x60f   : > { %v2079_v63 = vsel %vm6757_vm15, %v2075_v57, 0.0  ;;  %v2080_v0 = vadd.f32 %v2078_v62, %v2022_v58 }
 0x610   : > { %v2081_v2 = vadd.f32 %v2079_v63, %v2023_v59  ;;  %v2227_v5 = vpop.f32.mrf.mxu0 }
 0x611   : > { %v2138_v7 = vadd.f32 %v2136_v3, %v2080_v0  ;;  %v2250_v12 = vsel %vm6761_vm5, %v2227_v5, 0.0  ;;  %v2265_v0 = vld [vmem:[%s7676_s28 + $0x8] sm:$0xff] }
 0x612   : > { %v2139_v8 = vadd.f32 %v2137_v4, %v2081_v2 }
 0x615   : > { %v2171_v9 = vpop.f32.mrf.mxu2  ;;  %v2247_v15 = vpop.f32.mrf.mxu1 }
 0x616   : > { %v2191_v11 = vpop.f32.mrf.mxu3  ;;  %v2194_v13 = vadd.f32 %v2171_v9, %v2138_v7  ;;  %v2251_v16 = vsel %vm6757_vm15, %v2247_v15, 0.0  ;;  %vm2966_vm15 = vcmask 613376  }
 0x617   : > { %v2195_v14 = vadd.f32 %v2191_v11, %v2139_v8  ;;  %v2267_v11 = vld [vmem:[%s7676_s28 + $0x18] sm:$0xff] }
 0x618   : > { %v2252_v20 = vadd.f32 %v2250_v12, %v2194_v13 }
 0x619   : > { %v2253_v21 = vadd.f32 %v2251_v16, %v2195_v14 }
 0x61a   : > { %v6787_v26 = vadd.f32 %v2258_v23, %v2252_v20 }
 0x61b   : > { %v6789_v31 = vadd.f32 %v2258_v23, %v2253_v21 }
 0x61c   : > { %v2262_v33 = vadd.f32 %v6787_v26, %v6614_v41 }
 0x61d   : > { %v2263_v32 = vadd.f32 %v6789_v31, %v6616_v42 }
 0x61e   : > { %v5830_v35 = vpack.i.bf16 %v2262_v33, %v6266_v6 }
 0x61f   : > { %2275 = vrot.lane.b32.xlu0 %v2263_v32, %s7606_s11  ;;  %v5835_v34 = vpack.i.bf16 %v2263_v32, %v2262_v33 }
 0x620   : > { %5831 = vrot.lane.b32.xlu2 %v5830_v35, %s7606_s11  ;;  %s7688_s11 = sld [smem:[#allocation19_spill]] }
 0x621   : > { %5836 = vrot.lane.b32.xlu1 %v5835_v34, %s7677_s5 }
 0x627   : > { %2492 = vrot.lane.b32.xlu0 %v6266_v6, %s7605_s3 }
 0x628   : > { %5841 = vrot.lane.b32.xlu2 %v5835_v34, %s7605_s3  ;;  %s7613_s3 = smov 32  }
 0x629   : > { %5846 = vrot.lane.b32.xlu1 %v5835_v34, %s7678_s23 }
 0x630   : > { %2555 = vperm.xlu2 %5758, %v2552_v36  }
 0x67a   : > { %v6804_v43 = vpop.permute.xlu2 %5831 }
 0x67b   : > { %v5834_v44 = vunpack.i.h.bf16 %v6804_v43  ;;  %v5833_v47 = vunpack.i.l.bf16 %v6804_v43 }
 0x67d   : > { %v2278_v48 = vsel %vm7603_vm0, %v5833_v47, %v5834_v44 }
 0x67e   : > { %2300 = vmatpush.msrb.mxu2 %v2278_v48 }
 0x67f   : > { %5535 = vmatmul.msk.f32.vlgmr.msrb.gmra.mxu2 %vm7619_vm2, %v2264_v49 }
 0x680   : > { %2406 = vmatpush.msra.mxu2 %v2262_v33 }
 0x682   : > { %v5842_v51 = vpop.permute.xlu2 %5841 }
 0x683   : > { %v5844_v52 = vunpack.i.h.bf16 %v5842_v51  ;;  %v5843_v53 = vunpack.i.l.bf16 %v5842_v51 }
 0x685   : > { %v2495_v54 = vsel %vm7602_vm13, %v5843_v53, %v5844_v52 }
 0x686   : > { %2517 = vmatpush.msrb.mxu2 %v2495_v54 }
 0x687   : > { %5539 = vmatmul.msk.f32.vlgmr.msra.gmra.mxu2 %vm7619_vm2, %v2266_v55 }
 0x68f   : > { %5543 = vmatmul.msk.f32.vlgmr.msrb.gmra.mxu2 %vm7619_vm2, %v2268_v56 }
 0x691   : > { %v2276_v57 = vpop.permute.xlu0 %2275 }
 0x692   : > { %v2279_v58 = vsel %vm7603_vm0, %v5834_v44, %v2276_v57 }
 0x693   : > { %v5837_v59 = vpop.permute.xlu1 %5836  ;;  %2320 = vmatpush.msrb.mxu3 %v2279_v58 }
 0x694   : > { %v5839_v62 = vunpack.i.h.bf16 %v5837_v59  ;;  %v5838_v63 = vunpack.i.l.bf16 %v5837_v59  ;;  %5536 = vmatmul.msk.f32.vlgmr.msrb.gmra.mxu3 %vm7619_vm2, %v2264_v49 }
 0x695   : > { %2426 = vmatpush.msra.mxu3 %v2263_v32 }
 0x696   : > { %v2337_v2 = vsel %vm7601_vm3, %v6529_v19, %v5838_v63  ;;  %v2338_v3 = vsel %vm7601_vm3, %v5838_v63, %v5839_v62  ;;  %vm2325_vm3 = vcmp.ge.s32.totalorder %v6546_v30, 2 }
 0x697   : > { %2359 = vmatpush.msra.mxu0 %v2337_v2  ;;  %2379 = vmatpush.msra.mxu1 %v2338_v3  ;;  %v2326_v15 = vsel %vm2325_vm3, 1, %v6265_v1 }
 0x698   : > { %5537 = vmatmul.msk.f32.vlgmr.msra.gmra.mxu0 %vm7619_vm2, %v2265_v0  ;;  %5538 = vmatmul.msk.f32.vlgmr.msra.gmra.mxu1 %vm7619_vm2, %v2265_v0  ;;  %v2327_v16 = vperm.slane %v2326_v15, 0  ;;  %v2328_v36 = vperm.slane %v2326_v15, 1 }
 0x699   : > { %v6826_v4 = vpop.permute.xlu0 %2492 }
 0x69a   : > { %v2496_v5 = vsel %vm7602_vm13, %v5844_v52, %v6826_v4  ;;  %vm2542_vm13 = vcmp.lt.s32.totalorder %v6546_v30, 14  ;;  %vm6841_vm0 = vcmp.eq.s32.totalorder %v2327_v16, 1  ;;  %vm6850_vm3 = vcmp.eq.s32.totalorder %v2328_v36, 1 }
 0x69b   : > { %v5847_v7 = vpop.permute.xlu1 %5846  ;;  %2537 = vmatpush.msrb.mxu3 %v2496_v5  ;;  %v2543_v23 = vsel %vm2542_vm13, 1, %v6265_v1  ;;  %v2556_v5 = vpop.permute.xlu2 %2555 }
 0x69c   : > { %v5849_v8 = vunpack.i.h.bf16 %v5847_v7  ;;  %v5848_v9 = vunpack.i.l.bf16 %v5847_v7  ;;  %5540 = vmatmul.msk.f32.vlgmr.msra.gmra.mxu3 %vm7619_vm2, %v2266_v55  ;;  %v2544_v48 = vperm.slane %v2543_v23, 0  ;;  %v2545_v3 = vperm.slane %v2543_v23, 1 }
 0x69e   : > { %v2437_v12 = vsel %vm7604_vm4, %v5848_v9, %v5849_v8  ;;  %v2438_v13 = vsel %vm7604_vm4, %v5849_v8, %v6537_v24  ;;  %vm6854_vm4 = vcmp.eq.s32.totalorder %v2544_v48, 1  ;;  %vm6868_vm13 = vcmp.eq.s32.totalorder %v2545_v3, 1 }
 0x69f   : > { %2459 = vmatpush.msrb.mxu0 %v2437_v12  ;;  %2479 = vmatpush.msrb.mxu1 %v2438_v13 }
 0x6a0   : > { %5541 = vmatmul.msk.f32.vlgmr.msrb.gmra.mxu0 %vm7619_vm2, %v2267_v11  ;;  %5542 = vmatmul.msk.f32.vlgmr.msrb.gmra.mxu1 %vm7619_vm2, %v2267_v11  ;;  %v7685_v11 = vmov 0 }
 0x6a1   : > { %v7686_v11 = vsel %vm6868_vm13, 4294967295, %v7685_v11 }
 0x6a4   : > { %5544 = vmatmul.msk.f32.vlgmr.msrb.gmra.mxu3 %vm7619_vm2, %v2268_v56 }
 0x702   : > { %v2302_v14 = vpop.f32.mrf.mxu2 }
 0x703   : > { %v2331_v33 = vsel %vm6841_vm0, %v2302_v14, 0.0 }
 0x70a   : > { %v2408_v20 = vpop.f32.mrf.mxu2 }
 0x712   : > { %v2519_v51 = vpop.f32.mrf.mxu2 }
 0x713   : > { %v2548_v58 = vsel %vm6854_vm4, %v2519_v51, 0.0 }
 0x715   : > { %v2361_v32 = vpop.f32.mrf.mxu0  ;;  %v2381_v44 = vpop.f32.mrf.mxu1 }
 0x716   : > { %v2384_v34 = vsel %vm6552_vm7, %v2361_v32, 0.0  ;;  %v2385_v56 = vsel %vm6556_vm8, %v2381_v44, 0.0  ;;  %v2826_v32 = vld [vmem:[%s7687_s6] sm:$0xff]  ;;  %s6283_s6 = smov 85  }
 0x717   : > { %v2322_v35 = vpop.f32.mrf.mxu3  ;;  %v2386_v49 = vadd.f32 %v2384_v34, %v2331_v33  ;;  %v2560_v44 = vld [vmem:[%s7688_s11] sm:$0xff] }
 0x718   : > { %v2332_v55 = vsel %vm6850_vm3, %v2322_v35, 0.0 }
 0x719   : > { %v2431_v53 = vadd.f32 %v2408_v20, %v2386_v49  ;;  %v2387_v63 = vadd.f32 %v2385_v56, %v2332_v55 }
 0x71d   : > { %v2461_v54 = vpop.f32.mrf.mxu0  ;;  %v2481_v2 = vpop.f32.mrf.mxu1 }
 0x71e   : > { %v2484_v57 = vsel %vm6564_vm9, %v2461_v54, 0.0  ;;  %v2485_v9 = vsel %vm6568_vm10, %v2481_v2, 0.0 }
 0x71f   : > { %v2486_v59 = vadd.f32 %v2484_v57, %v2431_v53  ;;  %v2428_v62 = vpop.f32.mrf.mxu3 }
 0x720   : > { %v2432_v7 = vadd.f32 %v2428_v62, %v2387_v63 }
 0x721   : > { %v2550_v0 = vadd.f32 %v2548_v58, %v2486_v59  ;;  %v2561_v58 = vld [vmem:[%s7688_s11 + $0x8] sm:$0xff] }
 0x722   : > { %v2487_v13 = vadd.f32 %v2485_v9, %v2432_v7  ;;  %v2562_v9 = vld [vmem:[%s7688_s11 + $0x10] sm:$0xff] }
 0x723   : > { %v2558_v8 = vadd.f32 %v2556_v5, %v2550_v0 }
 0x725   : > { %v5855_v12 = vpack.i.bf16 %v2558_v8, %v6266_v6 }
 0x727   : > { %v2539_v14 = vpop.f32.mrf.mxu3  ;;  %5856 = vrot.lane.b32.xlu1 %v5855_v12, %s7613_s3 }
 0x728   : > { %v2549_v15 = vsel %vm6868_vm13, %v2539_v14, 0.0  ;;  %v2563_v14 = vld [vmem:[%s7688_s11 + $0x18] sm:$0xff] }
 0x729   : > { %v2551_v16 = vadd.f32 %v2549_v15, %v2487_v13 }
 0x72b   : > { %v2559_v20 = vadd.f32 %v2556_v5, %v2551_v16 }
 0x72d   : > { %2622 = vrot.lane.b32.xlu2 %v2559_v20, %s7613_s3  ;;  %v5865_v23 = vpack.i.bf16 %v2559_v20, %v2558_v8  ;;  %s7693_s3 = sld [smem:[#allocation22_spill]] }
 0x72f   : > { %5866 = vrot.lane.b32.xlu1 %v5865_v23, %s7612_s1  ;;  %5851 = vrot.lane.b32.xlu0 %v5865_v23, %s7689_s8 }
 0x735   : > { %2774 = vrot.lane.b32.xlu2 %v6266_v6, %s7612_s1  ;;  %s6284_s1 = smov 75  }
 0x737   : > { %5861 = vrot.lane.b32.xlu0 %v5865_v23, %s7690_s13 }
 0x73f   : > { %2829 = vperm.xlu0 %5747, %v2826_v32  }
 0x787   : > { %v2623_v36 = vpop.permute.xlu2 %2622 }
 0x78f   : > { %v6895_v59 = vpop.permute.xlu2 %2774 }
 0x799   : > { %v6883_v33 = vpop.permute.xlu1 %5856 }
 0x79a   : > { %v5859_v34 = vunpack.i.h.bf16 %v6883_v33  ;;  %v5858_v35 = vunpack.i.l.bf16 %v6883_v33 }
 0x79c   : > { %v2625_v48 = vsel %vm7611_vm14, %v5858_v35, %v5859_v34  ;;  %v2626_v49 = vsel %vm7611_vm14, %v5859_v34, %v2623_v36 }
 0x79d   : > { %2647 = vmatpush.msra.mxu2 %v2625_v48  ;;  %2667 = vmatpush.msra.mxu3 %v2626_v49 }
 0x79e   : > { %5547 = vmatmul.msk.f32.vlgmr.msra.gmra.mxu2 %vm7619_vm2, %v2560_v44  ;;  %5548 = vmatmul.msk.f32.vlgmr.msra.gmra.mxu3 %vm7619_vm2, %v2560_v44 }
 0x7a1   : > { %v5867_v51 = vpop.permute.xlu1 %5866  ;;  %v5852_v53 = vpop.permute.xlu0 %5851 }
 0x7a2   : > { %v5854_v54 = vunpack.i.h.bf16 %v5852_v53  ;;  %v5853_v55 = vunpack.i.l.bf16 %v5852_v53  ;;  %v5869_v56 = vunpack.i.h.bf16 %v5867_v51  ;;  %v5868_v57 = vunpack.i.l.bf16 %v5867_v51 }
 0x7a4   : > { %v2571_v62 = vsel %vm7610_vm12, %v6592_v10, %v5853_v55  ;;  %v2572_v63 = vsel %vm7610_vm12, %v5853_v55, %v5854_v54  ;;  %v2778_v0 = vsel %vm7617_vm11, %v5869_v56, %v6895_v59  ;;  %v2777_v2 = vsel %vm7617_vm11, %v5868_v57, %v5869_v56 }
 0x7a5   : > { %2593 = vmatpush.msra.mxu0 %v2571_v62  ;;  %2613 = vmatpush.msra.mxu1 %v2572_v63  ;;  %vm7691_vm12 = vcmask 916480   ;;  %vm2851_vm11 = vcmask 695296  }
 0x7a6   : > { %5545 = vmatmul.msk.f32.vlgmr.msra.gmra.mxu0 %vm7619_vm2, %v2561_v58  ;;  %5546 = vmatmul.msk.f32.vlgmr.msra.gmra.mxu1 %vm7619_vm2, %v2561_v58  ;;  %vm7692_vm14 = vmmov %vm7691_vm12 }
 0x7a7   : > { %2690 = vmatpush.msrb.mxu0 %v2558_v8  ;;  %2710 = vmatpush.msrb.mxu1 %v2559_v20  ;;  %v2564_v8 = vld [vmem:[%s7688_s11 + $0x20] sm:$0xff]  ;;  %s7694_s11 = smov 80  }
 0x7a9   : > { %2799 = vmatpush.msra.mxu0 %v2777_v2  ;;  %2819 = vmatpush.msra.mxu1 %v2778_v0  ;;  %v5862_v3 = vpop.permute.xlu0 %5861 }
 0x7aa   : > { %v5864_v5 = vunpack.i.h.bf16 %v5862_v3  ;;  %v5863_v7 = vunpack.i.l.bf16 %v5862_v3 }
 0x7ac   : > { %v2721_v12 = vsel %vm7691_vm12, %v5863_v7, %v5864_v5  ;;  %v2722_v13 = vsel %vm7692_vm14, %v5864_v5, %v6602_v17  ;;  %v3354_v7 = vld [vmem:[%s7693_s3] sm:$0xff]  ;;  %vm7697_vm12 = vcmask 654336   ;;  %s7711_s3 = smov 2  }
 0x7ad   : > { %2743 = vmatpush.msrb.mxu2 %v2721_v12  ;;  %2763 = vmatpush.msrb.mxu3 %v2722_v13  ;;  %vm7698_vm14 = vmmov %vm7697_vm12 }
 0x7ae   : > { %5549 = vmatmul.msk.f32.vlgmr.msrb.gmra.mxu0 %vm7619_vm2, %v2562_v9  ;;  %5550 = vmatmul.msk.f32.vlgmr.msrb.gmra.mxu1 %vm7619_vm2, %v2562_v9 }
 0x7af   : > { %5551 = vmatmul.msk.f32.vlgmr.msrb.gmra.mxu2 %vm7619_vm2, %v2563_v14  ;;  %5552 = vmatmul.msk.f32.vlgmr.msrb.gmra.mxu3 %vm7619_vm2, %v2563_v14 }
 0x7b1   : > { %v2830_v63 = vpop.permute.xlu0 %2829 }
 0x7b6   : > { %5553 = vmatmul.msk.f32.vlgmr.msra.gmra.mxu0 %vm7619_vm2, %v2564_v8  ;;  %5554 = vmatmul.msk.f32.vlgmr.msra.gmra.mxu1 %vm7619_vm2, %v2564_v8  ;;  %v2835_v8 = vld [vmem:[%s7695_s19 + $0x8] sm:$0xff] }
 0x821   : > { %v2669_v20 = vpop.f32.mrf.mxu3  ;;  %v2649_v23 = vpop.f32.mrf.mxu2 }
 0x823   : > { %v2595_v15 = vpop.f32.mrf.mxu0  ;;  %v2615_v16 = vpop.f32.mrf.mxu1 }
 0x824   : > { %v2670_v32 = vadd.f32 %v2669_v20, %v2615_v16  ;;  %v2650_v44 = vadd.f32 %v2649_v23, %v2595_v15 }
 0x82b   : > { %v2692_v34 = vpop.f32.mrf.mxu0  ;;  %v2712_v36 = vpop.f32.mrf.mxu1 }
 0x82c   : > { %v2716_v48 = vadd.f32 %v2712_v36, %v2670_v32  ;;  %v2715_v49 = vadd.f32 %v2692_v34, %v2650_v44 }
 0x832   : > { %v2745_v51 = vpop.f32.mrf.mxu2  ;;  %v2765_v53 = vpop.f32.mrf.mxu3 }
 0x833   : > { %v2768_v54 = vadd.f32 %v2745_v51, %v2715_v49  ;;  %v2769_v55 = vadd.f32 %v2765_v53, %v2716_v48  ;;  %v2801_v56 = vpop.f32.mrf.mxu0  ;;  %v2821_v57 = vpop.f32.mrf.mxu1  ;;  %v2834_v48 = vld [vmem:[%s7695_s19] sm:$0xff] }
 0x835   : > { %v2824_v58 = vadd.f32 %v2801_v56, %v2768_v54  ;;  %v2825_v62 = vadd.f32 %v2821_v57, %v2769_v55 }
 0x837   : > { %v2832_v0 = vadd.f32 %v2830_v63, %v2824_v58  ;;  %v6917_v2 = vadd.f32 %v2830_v63, %v2825_v62 }
 0x839   : > { %2849 = vrot.lane.b32.xlu2 %v6917_v2, %s6283_s6  ;;  %v5875_v3 = vpack.i.bf16 %v2832_v0, %v6266_v6  ;;  %v5880_v5 = vpack.i.bf16 %v6917_v2, %v2832_v0 }
 0x83b   : > { %5876 = vrot.lane.b32.xlu0 %v5875_v3, %s6284_s1  ;;  %5871 = vrot.lane.b32.xlu1 %v5875_v3, %s6283_s6  ;;  %s7696_s6 = smov 48  }
 0x841   : > { %5881 = vrot.lane.b32.xlu2 %v5880_v5, %s7694_s11 }
 0x843   : > { %5886 = vrot.lane.b32.xlu0 %v5875_v3, %s6285_s14  ;;  %2964 = vrot.lane.b32.xlu1 %v6917_v2, %s6284_s1  ;;  %s7714_s1 = smov 126  }
 0x849   : > { %5891 = vrot.lane.b32.xlu2 %v5880_v5, %s6286_s17 }
 0x84b   : > { %3189 = vrot.lane.b32.xlu0 %v6266_v6, %s6286_s17  ;;  %3028 = vrot.lane.b32.xlu1 %v6917_v2, %s6285_s14  ;;  %s7709_s17 = sld [smem:[#allocation24_spill]]  ;;  %s7712_s14 = smov 3  }
 0x851   : > { %3131 = vrot.lane.b32.xlu2 %v6266_v6, %s6287_s21 }
 0x853   : > { %5901 = vrot.lane.b32.xlu0 %v5880_v5, %s6288_s24  ;;  %5896 = vrot.lane.b32.xlu1 %v5880_v5, %s6287_s21  ;;  %s7710_s21 = sld [smem:[#allocation23_spill]] }
 0x859   : > { %5906 = vrot.lane.b32.xlu2 %v5880_v5, %s7696_s6  ;;  %v2836_v5 = vld [vmem:[%s7695_s19 + $0x10] sm:$0xff] }
 0x85b   : > { %3357 = vperm.xlu0 %5747, %v3354_v7   ;;  %3300 = vrot.lane.b32.xlu1 %v6266_v6, %s6288_s24  ;;  %s7713_s24 = smov 125  }
 0x893   : > { %v2850_v9 = vpop.permute.xlu2 %2849 }
 0x89b   : > { %v5882_v12 = vpop.permute.xlu2 %5881 }
 0x89c   : > { %v5884_v13 = vunpack.i.h.bf16 %v5882_v12  ;;  %v5883_v14 = vunpack.i.l.bf16 %v5882_v12 }
 0x89e   : > { %v2911_v15 = vsel %vm7697_vm12, %v6731_v60, %v5883_v14  ;;  %v2912_v16 = vsel %vm7698_vm14, %v5883_v14, %v5884_v13  ;;  %vm3030_vm12 = vcmask 39936   ;;  %vm3302_vm14 = vcmask 351232  }
 0x89f   : > { %2933 = vmatpush.msrb.mxu0 %v2911_v15  ;;  %2953 = vmatpush.msrb.mxu1 %v2912_v16 }
 0x8a0   : > { %5557 = vmatmul.msk.f32.vlgmr.msrb.gmra.mxu0 %vm7619_vm2, %v2835_v8  ;;  %5558 = vmatmul.msk.f32.vlgmr.msrb.gmra.mxu1 %vm7619_vm2, %v2835_v8 }
 0x8a3   : > { %v5892_v49 = vpop.permute.xlu2 %5891 }
 0x8a4   : > { %v5894_v55 = vunpack.i.h.bf16 %v5892_v49  ;;  %v5893_v58 = vunpack.i.l.bf16 %v5892_v49 }
 0x8ad   : > { %v5877_v20 = vpop.permute.xlu0 %5876  ;;  %v5872_v23 = vpop.permute.xlu1 %5871 }
 0x8ae   : > { %v5879_v32 = vunpack.i.h.bf16 %v5877_v20  ;;  %v5878_v34 = vunpack.i.l.bf16 %v5877_v20  ;;  %v5874_v36 = vunpack.i.h.bf16 %v5872_v23  ;;  %v5873_v44 = vunpack.i.l.bf16 %v5872_v23 }
 0x8b0   : > { %v2852_v51 = vsel %vm2851_vm11, %v5873_v44, %v5874_v36  ;;  %v2853_v53 = vsel %vm2851_vm11, %v5874_v36, %v2850_v9  ;;  %v2967_v54 = vsel %vm2966_vm15, %v5878_v34, %v5879_v32  ;;  %vm3191_vm11 = vcmask 433152   ;;  %v2837_v9 = vld [vmem:[%s7695_s19 + $0x18] sm:$0xff] }
 0x8b1   : > { %2874 = vmatpush.msra.mxu2 %v2852_v51  ;;  %2894 = vmatpush.msra.mxu3 %v2853_v53  ;;  %v3192_v12 = vsel %vm3191_vm11, %v5893_v58, %v5894_v55  ;;  %v2839_v51 = vld [vmem:[%s7695_s19 + $0x28] sm:$0xff] }
 0x8b2   : > { %5555 = vmatmul.msk.f32.vlgmr.msra.gmra.mxu2 %vm7619_vm2, %v2834_v48  ;;  %5556 = vmatmul.msk.f32.vlgmr.msra.gmra.mxu3 %vm7619_vm2, %v2834_v48 }
 0x8b3   : > { %2989 = vmatpush.msrb.mxu2 %v2967_v54 }
 0x8b5   : > { %3100 = vmatpush.msra.mxu2 %v2832_v0  ;;  %v5887_v56 = vpop.permute.xlu0 %5886  ;;  %v2965_v57 = vpop.permute.xlu1 %2964 }
 0x8b6   : > { %v5889_v62 = vunpack.i.h.bf16 %v5887_v56  ;;  %v5888_v63 = vunpack.i.l.bf16 %v5887_v56  ;;  %v2968_v3 = vsel %vm2966_vm15, %v5879_v32, %v2965_v57  ;;  %v3132_v0 = vpop.permute.xlu2 %3131  ;;  %vm3133_vm15 = vcmask 1006592   ;;  %v2840_v56 = vld [vmem:[%s7695_s19 + $0x30] sm:$0xff] }
 0x8b7   : > { %3009 = vmatpush.msrb.mxu3 %v2968_v3  ;;  %v2841_v3 = vld [vmem:[%s7695_s19 + $0x38] sm:$0xff] }
 0x8b8   : > { %v3031_v7 = vsel %vm3030_vm12, %v5888_v63, %v5889_v62 }
 0x8b9   : > { %3120 = vmatpush.msra.mxu3 %v6917_v2  ;;  %3053 = vmatpush.msra.mxu0 %v3031_v7  ;;  %v2838_v2 = vld [vmem:[%s7695_s19 + $0x20] sm:$0xff] }
 0x8ba   : > { %5559 = vmatmul.msk.f32.vlgmr.msrb.gmra.mxu2 %vm7619_vm2, %v2836_v5  ;;  %5560 = vmatmul.msk.f32.vlgmr.msrb.gmra.mxu3 %vm7619_vm2, %v2836_v5  ;;  %v2842_v5 = vld [vmem:[%s7695_s19 + $0x40] sm:$0xff] }
 0x8bb   : > { %3214 = vmatpush.msrb.mxu2 %v3192_v12  ;;  %5561 = vmatmul.msk.f32.vlgmr.msra.gmra.mxu0 %vm7619_vm2, %v2837_v9  ;;  %v6971_v7 = vld [vmem:[%s6312_s9] sm:$0x3] }
 0x8bd   : > { %v3190_v13 = vpop.permute.xlu0 %3189  ;;  %v3029_v14 = vpop.permute.xlu1 %3028 }
 0x8be   : > { %v3193_v8 = vsel %vm3191_vm11, %v5894_v55, %v3190_v13  ;;  %v3032_v15 = vsel %vm3030_vm12, %v5889_v62, %v3029_v14  ;;  %v5907_v16 = vpop.permute.xlu2 %5906  ;;  %vm7699_vm12 = vcmask 392192  }
 0x8bf   : > { %3073 = vmatpush.msra.mxu1 %v3032_v15  ;;  %3234 = vmatpush.msrb.mxu3 %v3193_v8  ;;  %v5909_v48 = vunpack.i.h.bf16 %v5907_v16  ;;  %v5908_v49 = vunpack.i.l.bf16 %v5907_v16  ;;  %vm7700_vm11 = vmmov %vm7699_vm12 }
 0x8c0   : > { %5562 = vmatmul.msk.f32.vlgmr.msra.gmra.mxu1 %vm7619_vm2, %v2837_v9 }
 0x8c1   : > { %v3247_v57 = vsel %vm7699_vm12, %v5908_v49, %v5909_v48  ;;  %v3248_v58 = vsel %vm7700_vm11, %v5909_v48, %v6689_v61 }
 0x8c2   : > { %5563 = vmatmul.msk.f32.vlgmr.msra.gmra.mxu2 %vm7619_vm2, %v2838_v2  ;;  %5564 = vmatmul.msk.f32.vlgmr.msra.gmra.mxu3 %vm7619_vm2, %v2838_v2 }
 0x8c5   : > { %v5902_v20 = vpop.permute.xlu0 %5901  ;;  %v5897_v23 = vpop.permute.xlu1 %5896 }
 0x8c6   : > { %v5904_v32 = vunpack.i.h.bf16 %v5902_v20  ;;  %v5903_v34 = vunpack.i.l.bf16 %v5902_v20  ;;  %v5899_v36 = vunpack.i.h.bf16 %v5897_v23  ;;  %v5898_v44 = vunpack.i.l.bf16 %v5897_v23 }
 0x8c8   : > { %v3134_v53 = vsel %vm3133_vm15, %v5898_v44, %v5899_v36  ;;  %v3135_v54 = vsel %vm3133_vm15, %v5899_v36, %v3132_v0  ;;  %v3303_v55 = vsel %vm3302_vm14, %v5903_v34, %v5904_v32  ;;  %vm2899_vm15 = vcmp.ge.s32.totalorder %v6971_v7, 5 }
 0x8c9   : > { %3156 = vmatpush.msrb.mxu0 %v3134_v53  ;;  %3176 = vmatpush.msrb.mxu1 %v3135_v54  ;;  %v2900_v14 = vsel %vm2899_vm15, 1, %v6265_v1  ;;  %v3746_v53 = vld [vmem:[%s7709_s17] sm:$0xff]  ;;  %s7740_s17 = sld [smem:[#allocation26_spill]] }
 0x8ca   : > { %3325 = vmatpush.msra.mxu2 %v3303_v55  ;;  %5565 = vmatmul.msk.f32.vlgmr.msrb.gmra.mxu0 %vm7619_vm2, %v2839_v51  ;;  %v2901_v15 = vperm.slane %v2900_v14, 0  ;;  %v2902_v2 = vperm.slane %v2900_v14, 1 }
 0x8cb   : > { %5566 = vmatmul.msk.f32.vlgmr.msrb.gmra.mxu1 %vm7619_vm2, %v2839_v51  ;;  %5567 = vmatmul.msk.f32.vlgmr.msrb.gmra.mxu2 %vm7619_vm2, %v2840_v56 }
 0x8cc   : > { %5568 = vmatmul.msk.f32.vlgmr.msrb.gmra.mxu3 %vm7619_vm2, %v2840_v56  ;;  %3269 = vmatpush.msra.mxu0 %v3247_v57  ;;  %vm6977_vm12 = vcmp.eq.s32.totalorder %v2901_v15, 1  ;;  %vm6981_vm11 = vcmp.eq.s32.totalorder %v2902_v2, 1 }
 0x8cd   : > { %3289 = vmatpush.msra.mxu1 %v3248_v58  ;;  %v3301_v62 = vpop.permute.xlu1 %3300 }
 0x8ce   : > { %v3304_v63 = vsel %vm3302_vm14, %v5904_v32, %v3301_v62  ;;  %vm3014_vm14 = vcmp.lt.s32.totalorder %v6971_v7, 11 }
 0x8cf   : > { %3345 = vmatpush.msra.mxu3 %v3304_v63  ;;  %v3015_v8 = vsel %vm3014_vm14, 1, %v6265_v1 }
 0x8d0   : > { %v3016_v16 = vperm.slane %v3015_v8, 0  ;;  %v3017_v32 = vperm.slane %v3015_v8, 1 }
 0x8d2   : > { %5569 = vmatmul.msk.f32.vlgmr.msra.gmra.mxu0 %vm7619_vm2, %v2841_v3  ;;  %vm6991_vm15 = vcmp.eq.s32.totalorder %v3017_v32, 1 }
 0x8d3   : > { %5571 = vmatmul.msk.f32.vlgmr.msra.gmra.mxu2 %vm7619_vm2, %v2842_v5  ;;  %5570 = vmatmul.msk.f32.vlgmr.msra.gmra.mxu1 %vm7619_vm2, %v2841_v3 }
 0x8d4   : > { %5572 = vmatmul.msk.f32.vlgmr.msra.gmra.mxu3 %vm7619_vm2, %v2842_v5  ;;  %vm6985_vm2 = vcmp.eq.s32.totalorder %v3016_v16, 1 }
 0x91d   : > { %v2935_v9 = vpop.f32.mrf.mxu0  ;;  %v2955_v13 = vpop.f32.mrf.mxu1 }
 0x935   : > { %v2876_v0 = vpop.f32.mrf.mxu2  ;;  %v2896_v12 = vpop.f32.mrf.mxu3 }
 0x936   : > { %v2905_v51 = vsel %vm6977_vm12, %v2876_v0, 0.0  ;;  %v2906_v54 = vsel %vm6981_vm11, %v2896_v12, 0.0 }
 0x937   : > { %v2958_v56 = vadd.f32 %v2935_v9, %v2905_v51  ;;  %v2959_v58 = vadd.f32 %v2955_v13, %v2906_v54 }
 0x938   : > { %v3055_v44 = vpop.f32.mrf.mxu0 }
 0x939   : > { %v3078_v0 = vsel %vm6977_vm12, %v3055_v44, 0.0 }
 0x93d   : > { %v2991_v20 = vpop.f32.mrf.mxu2  ;;  %v3011_v23 = vpop.f32.mrf.mxu3 }
 0x93e   : > { %v3075_v49 = vpop.f32.mrf.mxu1  ;;  %v3020_v55 = vsel %vm6985_vm2, %v2991_v20, 0.0  ;;  %v3021_v57 = vsel %vm6991_vm15, %v3011_v23, 0.0 }
 0x93f   : > { %v3022_v3 = vadd.f32 %v3020_v55, %v2958_v56  ;;  %v3023_v5 = vadd.f32 %v3021_v57, %v2959_v58  ;;  %v3079_v14 = vsel %vm6981_vm11, %v3075_v49, 0.0 }
 0x941   : > { %v3080_v12 = vadd.f32 %v3078_v0, %v3022_v3  ;;  %v3081_v2 = vadd.f32 %v3079_v14, %v3023_v5 }
 0x945   : > { %v3102_v62 = vpop.f32.mrf.mxu2  ;;  %v3122_v63 = vpop.f32.mrf.mxu3 }
 0x946   : > { %v3125_v16 = vadd.f32 %v3102_v62, %v3080_v12  ;;  %v3126_v9 = vadd.f32 %v3122_v63, %v3081_v2 }
 0x947   : > { %v3158_v8 = vpop.f32.mrf.mxu0 }
 0x948   : > { %v3178_v15 = vpop.f32.mrf.mxu1  ;;  %v3181_v20 = vsel %vm6985_vm2, %v3158_v8, 0.0  ;;  %v3358_v8 = vpop.permute.xlu0 %3357 }
 0x949   : > { %v3182_v13 = vsel %vm6991_vm15, %v3178_v15, 0.0  ;;  %v3183_v51 = vadd.f32 %v3181_v20, %v3125_v16 }
 0x94a   : > { %v3184_v54 = vadd.f32 %v3182_v13, %v3126_v9 }
 0x94e   : > { %v3216_v23 = vpop.f32.mrf.mxu2 }
 0x94f   : > { %v3239_v32 = vsel %vm6977_vm12, %v3216_v23, 0.0  ;;  %v3236_v44 = vpop.f32.mrf.mxu3  ;;  %v3271_v57 = vpop.f32.mrf.mxu0  ;;  %vm7717_vm12 = vcmask 64512  }
 0x950   : > { %v3240_v49 = vsel %vm6981_vm11, %v3236_v44, 0.0  ;;  %v3241_v55 = vadd.f32 %v3239_v32, %v3183_v51  ;;  %v3291_v58 = vpop.f32.mrf.mxu1  ;;  %v3365_v44 = vld [vmem:[%s7710_s21 + $0x8] sm:$0xff]  ;;  %vm7718_vm11 = vmmov %vm7717_vm12 }
 0x951   : > { %v3242_v56 = vadd.f32 %v3240_v49, %v3184_v54 }
 0x952   : > { %v3294_v62 = vadd.f32 %v3271_v57, %v3241_v55 }
 0x953   : > { %v3295_v3 = vadd.f32 %v3291_v58, %v3242_v56  ;;  %v3369_v56 = vld [vmem:[%s7710_s21 + $0x28] sm:$0xff] }
 0x956   : > { %v3327_v63 = vpop.f32.mrf.mxu2 }
 0x957   : > { %v3350_v5 = vsel %vm6985_vm2, %v3327_v63, 0.0  ;;  %v3347_v0 = vpop.f32.mrf.mxu3  ;;  %vm7715_vm2 = vcmask 15360  }
 0x958   : > { %v3352_v34 = vadd.f32 %v3350_v5, %v3294_v62  ;;  %v3351_v14 = vsel %vm6991_vm15, %v3347_v0, 0.0  ;;  %vm7716_vm14 = vmmov %vm7715_vm2  ;;  %vm7719_vm15 = vcmask 1031168   ;;  %v3364_v0 = vld [vmem:[%s7710_s21] sm:$0xff] }
 0x959   : > { %v3353_v36 = vadd.f32 %v3351_v14, %v3295_v3  ;;  %vm7720_vm5 = vmmov %vm7719_vm15 }
 0x95a   : > { %v7017_v12 = vadd.f32 %v3358_v8, %v3352_v34 }
 0x95b   : > { %v7019_v15 = vadd.f32 %v3358_v8, %v3353_v36 }
 0x95c   : > { %v3362_v2 = vadd.f32 %v7017_v12, %v6614_v41 }
 0x95d   : > { %v3363_v48 = vadd.f32 %v7019_v15, %v6616_v42 }
 0x95f   : > { %v5920_v16 = vpack.i.bf16 %v3363_v48, %v3362_v2 }
 0x961   : > { %5921 = vrot.lane.b32.xlu0 %v5920_v16, %s7677_s5  ;;  %5916 = vrot.lane.b32.xlu2 %v5920_v16, %s7711_s3  ;;  %s7743_s3 = sld [smem:[#allocation25_spill]] }
 0x962   : > { %5911 = vrot.lane.b32.xlu1 %v5920_v16, %s7712_s14  ;;  %s7744_s14 = smov 32  }
 0x969   : > { %5936 = vrot.lane.b32.xlu0 %v5920_v16, %s7713_s24  ;;  %5931 = vrot.lane.b32.xlu2 %v5920_v16, %s7714_s1  ;;  %s7745_s24 = smov 96   ;;  %s6291_s1 = smov 7  }
 0x96a   : > { %5926 = vrot.lane.b32.xlu1 %v5920_v16, %s7678_s23 }
 0x972   : > { %3749 = vperm.xlu1 %5769, %v3746_v53   ;;  %v3366_v53 = vld [vmem:[%s7710_s21 + $0x10] sm:$0xff] }
 0x9bb   : > { %v5917_v9 = vpop.permute.xlu2 %5916 }
 0x9bc   : > { %v5919_v20 = vunpack.i.h.bf16 %v5917_v9  ;;  %v5918_v13 = vunpack.i.l.bf16 %v5917_v9 }
 0x9be   : > { %v3430_v23 = vsel %vm7715_vm2, %v5833_v47, %v5918_v13  ;;  %v3431_v32 = vsel %vm7716_vm14, %v5918_v13, %v5919_v20  ;;  %v3367_v47 = vld [vmem:[%s7710_s21 + $0x18] sm:$0xff]  ;;  %vm7721_vm2 = vmmov %vm7718_vm11 }
 0x9bf   : > { %3452 = vmatpush.msrb.mxu2 %v3430_v23  ;;  %3472 = vmatpush.msrb.mxu3 %v3431_v32  ;;  %vm7722_vm14 = vmmov %vm7721_vm2  ;;  %v3368_v32 = vld [vmem:[%s7710_s21 + $0x20] sm:$0xff] }
 0x9c0   : > { %5575 = vmatmul.msk.f32.vlgmr.msrb.gmra.mxu2 %vm7717_vm12, %v3365_v44  ;;  %5576 = vmatmul.msk.f32.vlgmr.msrb.gmra.mxu3 %vm7718_vm11, %v3365_v44  ;;  %vm7723_vm12 = vmmov %vm7721_vm2  ;;  %v3370_v44 = vld [vmem:[%s7710_s21 + $0x30] sm:$0xff] }
 0x9c1   : > { %3554 = vmatpush.msra.mxu2 %v3362_v2  ;;  %3574 = vmatpush.msra.mxu3 %v3363_v48  ;;  %vm7724_vm11 = vmmov %vm7721_vm2 }
 0x9c2   : > { %vm7735_vm13 = vmmov %vm7724_vm11 }
 0x9c3   : > { %v5932_v51 = vpop.permute.xlu2 %5931 }
 0x9c4   : > { %v5934_v49 = vunpack.i.h.bf16 %v5932_v51  ;;  %v5933_v54 = vunpack.i.l.bf16 %v5932_v51 }
 0x9c6   : > { %v3640_v55 = vsel %vm7719_vm15, %v5933_v54, %v5934_v49  ;;  %v3641_v43 = vsel %vm7720_vm5, %v5934_v49, %v6826_v4  ;;  %vm7725_vm5 = vcmask 23552  }
 0x9c7   : > { %3662 = vmatpush.msrb.mxu2 %v3640_v55  ;;  %3682 = vmatpush.msrb.mxu3 %v3641_v43  ;;  %vm7726_vm15 = vmmov %vm7725_vm5 }
 0x9c8   : > { %5579 = vmatmul.msk.f32.vlgmr.msra.gmra.mxu2 %vm7721_vm2, %v3367_v47  ;;  %5580 = vmatmul.msk.f32.vlgmr.msra.gmra.mxu3 %vm7722_vm14, %v3367_v47  ;;  %vm7727_vm2 = vcmask 7168  }
 0x9c9   : > { %vm7728_vm14 = vmmov %vm7727_vm2 }
 0x9d0   : > { %5583 = vmatmul.msk.f32.vlgmr.msrb.gmra.mxu2 %vm7723_vm12, %v3369_v56  ;;  %5584 = vmatmul.msk.f32.vlgmr.msrb.gmra.mxu3 %vm7724_vm11, %v3369_v56  ;;  %vm7729_vm12 = vmmov %vm7724_vm11 }
 0x9d3   : > { %v5922_v57 = vpop.permute.xlu0 %5921 }
 0x9d4   : > { %v5924_v58 = vunpack.i.h.bf16 %v5922_v57  ;;  %v5923_v62 = vunpack.i.l.bf16 %v5922_v57  ;;  %v5912_v63 = vpop.permute.xlu1 %5911 }
 0x9d5   : > { %v5914_v3 = vunpack.i.h.bf16 %v5912_v63  ;;  %v5913_v5 = vunpack.i.l.bf16 %v5912_v63 }
 0x9d6   : > { %v3485_v14 = vsel %vm7727_vm2, %v6529_v19, %v5923_v62  ;;  %v3486_v8 = vsel %vm7728_vm14, %v5923_v62, %v5924_v58  ;;  %vm7732_vm2 = vcmask 1022976  }
 0x9d7   : > { %v3377_v4 = vsel %vm7725_vm5, %v5808_v29, %v5913_v5  ;;  %v3378_v34 = vsel %vm7726_vm15, %v5913_v5, %v5914_v3  ;;  %vm7730_vm5 = vcmask 1039360   ;;  %vm7733_vm14 = vmmov %vm7732_vm2 }
 0x9d8   : > { %3399 = vmatpush.msrb.mxu0 %v3377_v4  ;;  %3419 = vmatpush.msrb.mxu1 %v3378_v34  ;;  %vm7731_vm15 = vmmov %vm7730_vm5 }
 0x9d9   : > { %5573 = vmatmul.msk.f32.vlgmr.msrb.gmra.mxu0 %vm7729_vm12, %v3364_v0  ;;  %5574 = vmatmul.msk.f32.vlgmr.msrb.gmra.mxu1 %vm7724_vm11, %v3364_v0  ;;  %vm7734_vm12 = vmmov %vm7724_vm11 }
 0x9da   : > { %3507 = vmatpush.msra.mxu0 %v3485_v14  ;;  %3527 = vmatpush.msra.mxu1 %v3486_v8 }
 0x9db   : > { %v5937_v36 = vpop.permute.xlu0 %5936 }
 0x9dc   : > { %v5939_v25 = vunpack.i.h.bf16 %v5937_v36  ;;  %v5938_v29 = vunpack.i.l.bf16 %v5937_v36  ;;  %v5927_v2 = vpop.permute.xlu1 %5926 }
 0x9dd   : > { %v5929_v48 = vunpack.i.h.bf16 %v5927_v2  ;;  %v5928_v16 = vunpack.i.l.bf16 %v5927_v2 }
 0x9de   : > { %v3695_v13 = vsel %vm7732_vm2, %v5938_v29, %v5939_v25  ;;  %v3696_v23 = vsel %vm7733_vm14, %v5939_v25, %v6720_v50 }
 0x9df   : > { %v3585_v9 = vsel %vm7730_vm5, %v5928_v16, %v5929_v48  ;;  %v3586_v20 = vsel %vm7731_vm15, %v5929_v48, %v6537_v24  ;;  %vm7736_vm5 = vmmov %vm7724_vm11 }
 0x9e0   : > { %3607 = vmatpush.msrb.mxu0 %v3585_v9  ;;  %3627 = vmatpush.msrb.mxu1 %v3586_v20  ;;  %vm7737_vm15 = vmmov %vm7736_vm5 }
 0x9e1   : > { %5577 = vmatmul.msk.f32.vlgmr.msra.gmra.mxu0 %vm7734_vm12, %v3366_v53  ;;  %5578 = vmatmul.msk.f32.vlgmr.msra.gmra.mxu1 %vm7724_vm11, %v3366_v53  ;;  %vm7738_vm2 = vmmov %vm7736_vm5  ;;  %vm7750_vm12 = vcmask 392192  }
 0x9e2   : > { %3717 = vmatpush.msra.mxu0 %v3695_v13  ;;  %3737 = vmatpush.msra.mxu1 %v3696_v23  ;;  %vm7749_vm14 = vmmov %vm7738_vm2 }
 0x9e3   : > { %vm7751_vm11 = vmmov %vm7750_vm12 }
 0x9e9   : > { %5581 = vmatmul.msk.f32.vlgmr.msrb.gmra.mxu0 %vm7735_vm13, %v3368_v32  ;;  %5582 = vmatmul.msk.f32.vlgmr.msrb.gmra.mxu1 %vm7736_vm5, %v3368_v32  ;;  %vm7748_vm13 = vmmov %vm7738_vm2  ;;  %vm7752_vm5 = vcmask 130048  }
 0x9f1   : > { %5585 = vmatmul.msk.f32.vlgmr.msra.gmra.mxu0 %vm7737_vm15, %v3370_v44  ;;  %5586 = vmatmul.msk.f32.vlgmr.msra.gmra.mxu1 %vm7738_vm2, %v3370_v44  ;;  %vm7753_vm15 = vmmov %vm7752_vm5 }
 0xa43   : > { %v3454_v51 = vpop.f32.mrf.mxu2  ;;  %v3474_v50 = vpop.f32.mrf.mxu3 }
 0xa44   : > { %v3477_v62 = vsel %vm6841_vm0, %v3454_v51, 0.0  ;;  %v3478_v63 = vsel %vm6850_vm3, %v3474_v50, 0.0  ;;  %vm7739_vm0 = vnez %v7686_v11 }
 0xa4b   : > { %v3556_v55 = vpop.f32.mrf.mxu2  ;;  %v3576_v43 = vpop.f32.mrf.mxu3 }
 0xa53   : > { %v3664_v25 = vpop.f32.mrf.mxu2  ;;  %v3684_v29 = vpop.f32.mrf.mxu3 }
 0xa54   : > { %v3687_v16 = vsel %vm6854_vm4, %v3664_v25, 0.0  ;;  %v3688_v53 = vsel %vm7739_vm0, %v3684_v29, 0.0  ;;  %vm7746_vm4 = vcmask 261120   ;;  %vm7754_vm0 = vmmov %vm7738_vm2 }
 0xa55   : > { %vm7747_vm3 = vmmov %vm7746_vm4 }
 0xa56   : > { %v3401_v49 = vpop.f32.mrf.mxu0  ;;  %v3421_v54 = vpop.f32.mrf.mxu1 }
 0xa57   : > { %v3424_v57 = vsel %vm6747_vm6, %v3401_v49, 0.0  ;;  %v3425_v58 = vsel %vm6751_vm1, %v3421_v54, 0.0  ;;  %vm7741_vm1 = vnez %v7674_v28  ;;  %vm7742_vm6 = vnez %v7672_v27  ;;  %v3750_v49 = vpop.permute.xlu1 %3749  ;;  %v4122_v27 = vld [vmem:[%s7740_s17] sm:$0xff]  ;;  %s6292_s17 = smov 121  }
 0xa58   : > { %v3479_v0 = vadd.f32 %v3477_v62, %v3424_v57  ;;  %v3480_v4 = vadd.f32 %v3478_v63, %v3425_v58 }
 0xa5e   : > { %v3509_v47 = vpop.f32.mrf.mxu0  ;;  %v3529_v56 = vpop.f32.mrf.mxu1 }
 0xa5f   : > { %v3532_v3 = vsel %vm6552_vm7, %v3509_v47, 0.0  ;;  %v3533_v5 = vsel %vm6556_vm8, %v3529_v56, 0.0  ;;  %v3755_v47 = vld [vmem:[%s7743_s3 + $0x8] sm:$0xff] }
 0xa60   : > { %v3534_v34 = vadd.f32 %v3532_v3, %v3479_v0  ;;  %v3535_v18 = vadd.f32 %v3533_v5, %v3480_v4 }
 0xa62   : > { %v3579_v30 = vadd.f32 %v3556_v55, %v3534_v34  ;;  %v3580_v36 = vadd.f32 %v3576_v43, %v3535_v18 }
 0xa66   : > { %v3609_v14 = vpop.f32.mrf.mxu0  ;;  %v3629_v8 = vpop.f32.mrf.mxu1 }
 0xa67   : > { %v3632_v22 = vsel %vm6564_vm9, %v3609_v14, 0.0  ;;  %v3633_v21 = vsel %vm6568_vm10, %v3629_v8, 0.0  ;;  %v3754_v14 = vld [vmem:[%s7743_s3] sm:$0xff] }
 0xa68   : > { %v3634_v2 = vadd.f32 %v3632_v22, %v3579_v30  ;;  %v3635_v48 = vadd.f32 %v3633_v21, %v3580_v36  ;;  %v3756_v21 = vld [vmem:[%s7743_s3 + $0x10] sm:$0xff] }
 0xa6a   : > { %v3689_v9 = vadd.f32 %v3687_v16, %v3634_v2  ;;  %v3690_v20 = vadd.f32 %v3688_v53, %v3635_v48 }
 0xa6e   : > { %v3719_v13 = vpop.f32.mrf.mxu0  ;;  %v3739_v23 = vpop.f32.mrf.mxu1 }
 0xa6f   : > { %v3742_v32 = vsel %vm7741_vm1, %v3719_v13, 0.0  ;;  %v3743_v44 = vsel %vm7742_vm6, %v3739_v23, 0.0  ;;  %vm7755_vm1 = vmmov %vm7754_vm0  ;;  %v3757_v23 = vld [vmem:[%s7743_s3 + $0x18] sm:$0xff] }
 0xa70   : > { %v3744_v51 = vadd.f32 %v3742_v32, %v3689_v9  ;;  %v3745_v50 = vadd.f32 %v3743_v44, %v3690_v20  ;;  %vm7756_vm6 = vmmov %vm7754_vm0  ;;  %v3758_v32 = vld [vmem:[%s7743_s3 + $0x20] sm:$0xff]  ;;  %v3760_v44 = vld [vmem:[%s7743_s3 + $0x30] sm:$0xff] }
 0xa72   : > { %v3752_v52 = vadd.f32 %v3750_v49, %v3744_v51  ;;  %v3753_v54 = vadd.f32 %v3750_v49, %v3745_v50 }
 0xa74   : > { %v5950_v55 = vpack.i.bf16 %v3753_v54, %v3752_v52 }
 0xa76   : > { %5951 = vrot.lane.b32.xlu1 %v5950_v55, %s7696_s6  ;;  %5946 = vrot.lane.b32.xlu0 %v5950_v55, %s7689_s8  ;;  %s6290_s6 = smov 105  }
 0xa77   : > { %5941 = vrot.lane.b32.xlu2 %v5950_v55, %s7744_s14  ;;  %s6293_s14 = smov 23  }
 0xa7e   : > { %5966 = vrot.lane.b32.xlu1 %v5950_v55, %s7745_s24  ;;  %5961 = vrot.lane.b32.xlu0 %v5950_v55, %s7694_s11  ;;  %s6289_s11 = smov 119   ;;  %s6294_s24 = smov 9  }
 0xa7f   : > { %5956 = vrot.lane.b32.xlu2 %v5950_v55, %s7690_s13 }
 0xa87   : > { %4125 = vperm.xlu2 %5758, %v4122_v27  }
 0xad1   : > { %v5942_v28 = vpop.permute.xlu2 %5941 }
 0xad2   : > { %v5944_v11 = vunpack.i.h.bf16 %v5942_v28  ;;  %v5943_v43 = vunpack.i.l.bf16 %v5942_v28 }
 0xad4   : > { %v3767_v56 = vsel %vm7746_vm4, %v5858_v35, %v5943_v43  ;;  %v3768_v57 = vsel %vm7747_vm3, %v5943_v43, %v5944_v11  ;;  %vm7757_vm4 = vcmask 916480  }
 0xad5   : > { %3789 = vmatpush.msra.mxu2 %v3767_v56  ;;  %3809 = vmatpush.msra.mxu3 %v3768_v57  ;;  %vm7758_vm3 = vmmov %vm7757_vm4 }
 0xad6   : > { %5587 = vmatmul.msk.f32.vlgmr.msra.gmra.mxu2 %vm7748_vm13, %v3755_v47  ;;  %5588 = vmatmul.msk.f32.vlgmr.msra.gmra.mxu3 %vm7749_vm14, %v3755_v47  ;;  %vm7759_vm13 = vcmask 785408  }
 0xad7   : > { %vm7760_vm14 = vmmov %vm7759_vm13 }
 0xad9   : > { %v5957_v63 = vpop.permute.xlu2 %5956 }
 0xada   : > { %v5959_v8 = vunpack.i.h.bf16 %v5957_v63  ;;  %v5958_v22 = vunpack.i.l.bf16 %v5957_v63 }
 0xadc   : > { %v3968_v30 = vsel %vm7758_vm3, %v5959_v8, %v6602_v17  ;;  %vm7769_vm3 = vmmov %vm7754_vm0 }
 0xae8   : > { %v5952_v58 = vpop.permute.xlu1 %5951  ;;  %v5947_v62 = vpop.permute.xlu0 %5946 }
 0xae9   : > { %v5954_v3 = vunpack.i.h.bf16 %v5952_v58  ;;  %v5953_v5 = vunpack.i.l.bf16 %v5952_v58  ;;  %v5949_v0 = vunpack.i.h.bf16 %v5947_v62  ;;  %v5948_v4 = vunpack.i.l.bf16 %v5947_v62 }
 0xaeb   : > { %v3818_v33 = vsel %vm7750_vm12, %v6689_v61, %v5953_v5  ;;  %v3819_v35 = vsel %vm7751_vm11, %v5953_v5, %v5954_v3  ;;  %v3869_v34 = vsel %vm7752_vm5, %v6592_v10, %v5948_v4  ;;  %v3870_v18 = vsel %vm7753_vm15, %v5948_v4, %v5949_v0  ;;  %vm7763_vm5 = vmmov %vm7754_vm0 }
 0xaec   : > { %3840 = vmatpush.msrb.mxu0 %v3818_v33  ;;  %3860 = vmatpush.msrb.mxu1 %v3819_v35  ;;  %v3967_v61 = vsel %vm7757_vm4, %v5958_v22, %v5959_v8  ;;  %vm7761_vm12 = vcmask 654336   ;;  %vm7764_vm15 = vmmov %vm7754_vm0  ;;  %v4126_v8 = vpop.permute.xlu2 %4125 }
 0xaed   : > { %3891 = vmatpush.msrb.mxu2 %v3869_v34  ;;  %3911 = vmatpush.msrb.mxu3 %v3870_v18  ;;  %vm7762_vm11 = vmmov %vm7761_vm12 }
 0xaee   : > { %5589 = vmatmul.msk.f32.vlgmr.msrb.gmra.mxu0 %vm7738_vm2, %v3754_v14  ;;  %5590 = vmatmul.msk.f32.vlgmr.msrb.gmra.mxu1 %vm7754_vm0, %v3754_v14  ;;  %vm7765_vm2 = vmmov %vm7754_vm0 }
 0xaef   : > { %5591 = vmatmul.msk.f32.vlgmr.msrb.gmra.mxu2 %vm7755_vm1, %v3756_v21  ;;  %5592 = vmatmul.msk.f32.vlgmr.msrb.gmra.mxu3 %vm7756_vm6, %v3756_v21  ;;  %vm7766_vm1 = vmmov %vm7754_vm0 }
 0xaf0   : > { %3936 = vmatpush.msra.mxu0 %v3752_v52  ;;  %3956 = vmatpush.msra.mxu1 %v3753_v54  ;;  %v5967_v36 = vpop.permute.xlu1 %5966  ;;  %v5962_v25 = vpop.permute.xlu0 %5961  ;;  %vm7767_vm6 = vmmov %vm7754_vm0 }
 0xaf1   : > { %3989 = vmatpush.msra.mxu2 %v3967_v61  ;;  %4009 = vmatpush.msra.mxu3 %v3968_v30  ;;  %v5969_v29 = vunpack.i.h.bf16 %v5967_v36  ;;  %v5968_v2 = vunpack.i.l.bf16 %v5967_v36  ;;  %v5964_v48 = vunpack.i.h.bf16 %v5962_v25  ;;  %v5963_v16 = vunpack.i.l.bf16 %v5962_v25  ;;  %vm7768_vm4 = vmmov %vm7754_vm0  ;;  %v4650_v36 = vld [vmem:[%s6442_s20] sm:$0xff] }
 0xaf2   : > { %v7165_v25 = vpack.i.bf16 %v6787_v26, %v7019_v15 }
 0xaf3   : > { %v4020_v53 = vsel %vm7759_vm13, %v5968_v2, %v5969_v29  ;;  %v4021_v9 = vsel %vm7760_vm14, %v5969_v29, %v6895_v59  ;;  %v4073_v20 = vsel %vm7761_vm12, %v5963_v16, %v5964_v48  ;;  %v4074_v13 = vsel %vm7762_vm11, %v5964_v48, %v6731_v60  ;;  %v3759_v59 = vld [vmem:[%s7743_s3 + $0x28] sm:$0xff]  ;;  %vm7773_vm12 = vmmov %vm7754_vm0 }
 0xaf4   : > { %4042 = vmatpush.msrb.mxu0 %v4020_v53  ;;  %4062 = vmatpush.msrb.mxu1 %v4021_v9  ;;  %v7169_v29 = vpack.i.bf16 %v6610_v39, %v6789_v31  ;;  %v7179_v2 = vpack.i.bf16 %v6789_v31, %v6787_v26  ;;  %v7189_v48 = vpack.i.bf16 %v7019_v15, %v7017_v12  ;;  %vm7771_vm13 = vcmask 916480   ;;  %vm7774_vm11 = vmmov %vm7754_vm0 }
 0xaf5   : > { %4095 = vmatpush.msrb.mxu2 %v4073_v20  ;;  %4115 = vmatpush.msrb.mxu3 %v4074_v13  ;;  %v7197_v16 = vpack.i.bf16 %v6612_v40, %v6610_v39  ;;  %vm7772_vm14 = vmmov %vm7771_vm13 }
 0xaf6   : > { %5593 = vmatmul.msk.f32.vlgmr.msra.gmra.mxu0 %vm7763_vm5, %v3757_v23  ;;  %5594 = vmatmul.msk.f32.vlgmr.msra.gmra.mxu1 %vm7764_vm15, %v3757_v23  ;;  %vm4326_vm5 = vcmask 56320   ;;  %vm7775_vm15 = vmmov %vm7754_vm0 }
 0xaf7   : > { %5595 = vmatmul.msk.f32.vlgmr.msra.gmra.mxu2 %vm7765_vm2, %v3758_v32  ;;  %5596 = vmatmul.msk.f32.vlgmr.msra.gmra.mxu3 %vm7754_vm0, %v3758_v32  ;;  %vm4147_vm2 = vcmask 973824  }
 0xafe   : > { %5597 = vmatmul.msk.f32.vlgmr.msrb.gmra.mxu0 %vm7766_vm1, %v3759_v59  ;;  %5598 = vmatmul.msk.f32.vlgmr.msrb.gmra.mxu1 %vm7767_vm6, %v3759_v59  ;;  %vm7776_vm1 = vmmov %vm7754_vm0  ;;  %vm4262_vm6 = vcmask 859136  }
 0xaff   : > { %5599 = vmatmul.msk.f32.vlgmr.msrb.gmra.mxu2 %vm7768_vm4, %v3760_v44  ;;  %5600 = vmatmul.msk.f32.vlgmr.msrb.gmra.mxu3 %vm7769_vm3, %v3760_v44  ;;  %vm7777_vm4 = vmmov %vm7754_vm0 }
 0xb00   : > { %vm7778_vm3 = vmmov %vm7754_vm0 }
 0xb59   : > { %v3791_v60 = vpop.f32.mrf.mxu2  ;;  %v3811_v51 = vpop.f32.mrf.mxu3 }
 0xb6b   : > { %v3842_v50 = vpop.f32.mrf.mxu0  ;;  %v3862_v49 = vpop.f32.mrf.mxu1 }
 0xb6c   : > { %v3863_v55 = vadd.f32 %v3862_v49, %v3811_v51  ;;  %v3843_v11 = vadd.f32 %v3842_v50, %v3791_v60 }
 0xb72   : > { %v3893_v52 = vpop.f32.mrf.mxu2  ;;  %v3913_v54 = vpop.f32.mrf.mxu3 }
 0xb73   : > { %v3938_v27 = vpop.f32.mrf.mxu0  ;;  %v3958_v28 = vpop.f32.mrf.mxu1  ;;  %v3916_v43 = vadd.f32 %v3893_v52, %v3843_v11  ;;  %v3917_v47 = vadd.f32 %v3913_v54, %v3863_v55 }
 0xb75   : > { %v3961_v58 = vadd.f32 %v3938_v27, %v3916_v43  ;;  %v3962_v62 = vadd.f32 %v3958_v28, %v3917_v47 }
 0xb7a   : > { %v3991_v56 = vpop.f32.mrf.mxu2  ;;  %v4011_v57 = vpop.f32.mrf.mxu3 }
 0xb7b   : > { %v4014_v63 = vadd.f32 %v3991_v56, %v3961_v58  ;;  %v4015_v3 = vadd.f32 %v4011_v57, %v3962_v62  ;;  %v4044_v5 = vpop.f32.mrf.mxu0  ;;  %v4064_v0 = vpop.f32.mrf.mxu1 }
 0xb7d   : > { %v4067_v4 = vadd.f32 %v4044_v5, %v4014_v63  ;;  %v4068_v33 = vadd.f32 %v4064_v0, %v4015_v3 }
 0xb82   : > { %v4097_v35 = vpop.f32.mrf.mxu2  ;;  %v4117_v34 = vpop.f32.mrf.mxu3 }
 0xb83   : > { %v4120_v18 = vadd.f32 %v4097_v35, %v4067_v4  ;;  %v4121_v14 = vadd.f32 %v4117_v34, %v4068_v33 }
 0xb85   : > { %v7144_v22 = vadd.f32 %v4126_v8, %v4120_v18  ;;  %v7146_v21 = vadd.f32 %v4126_v8, %v4121_v14 }
 0xb87   : > { %4145 = vrot.lane.b32.xlu1 %v7146_v21, %s6289_s11  ;;  %v5975_v61 = vpack.i.bf16 %v7146_v21, %v7144_v22  ;;  %v5970_v30 = vpack.i.bf16 %v7144_v22, %v6266_v6 }
 0xb89   : > { %5976 = vrot.lane.b32.xlu2 %v5975_v61, %s7690_s13  ;;  %5971 = vrot.lane.b32.xlu0 %v5970_v30, %s6289_s11  ;;  %s6295_s11 = smov 17  }
 0xb8f   : > { %4260 = vrot.lane.b32.xlu1 %v7146_v21, %s6290_s6 }
 0xb91   : > { %5986 = vrot.lane.b32.xlu2 %v5970_v30, %s6291_s1  ;;  %5981 = vrot.lane.b32.xlu0 %v5970_v30, %s6290_s6  ;;  %s6296_s6 = smov 15  }
 0xb97   : > { %5991 = vrot.lane.b32.xlu1 %v5975_v61, %s6292_s17 }
 0xb99   : > { %4427 = vrot.lane.b32.xlu2 %v6266_v6, %s6292_s17  ;;  %4324 = vrot.lane.b32.xlu0 %v7146_v21, %s6291_s1  ;;  %s7770_s1 = sld [smem:[#allocation27_spill]]  ;;  %s6297_s17 = smov 113  }
 0xb9f   : > { %4485 = vrot.lane.b32.xlu1 %v6266_v6, %s6293_s14  ;;  %v4131_v13 = vld [vmem:[%s7770_s1 + $0x8] sm:$0xff]  ;;  %v4133_v51 = vld [vmem:[%s7770_s1 + $0x18] sm:$0xff]  ;;  %v4130_v28 = vld [vmem:[%s7770_s1] sm:$0xff] }
 0xba0   : > { %v4132_v62 = vld [vmem:[%s7770_s1 + $0x10] sm:$0xff]  ;;  %v4135_v14 = vld [vmem:[%s7770_s1 + $0x28] sm:$0xff]  ;;  %v4134_v30 = vld [vmem:[%s7770_s1 + $0x20] sm:$0xff] }
 0xba1   : > { %6001 = vrot.lane.b32.xlu2 %v5975_v61, %s7689_s8  ;;  %5996 = vrot.lane.b32.xlu0 %v5975_v61, %s6293_s14  ;;  %s6298_s14 = smov 111  }
 0xba7   : > { %4596 = vrot.lane.b32.xlu1 %v6266_v6, %s6294_s24 }
 0xba9   : > { %4653 = vperm.xlu2 %5758, %v4650_v36   ;;  %6006 = vrot.lane.b32.xlu0 %v5975_v61, %s6294_s24 }
 0xbaf   : > { %4679 = vrot.lane.b32.xlu1 %v6612_v40, %s6295_s11 }
 0xbb1   : > { %6011 = vrot.lane.b32.xlu2 %v7165_v25, %s6295_s11  ;;  %6016 = vrot.lane.b32.xlu0 %v7169_v29, %s6295_s11 }
 0xbb7   : > { %6021 = vrot.lane.b32.xlu1 %v7165_v25, %s6296_s6 }
 0xbb9   : > { %6026 = vrot.lane.b32.xlu2 %v7169_v29, %s6296_s6  ;;  %6036 = vrot.lane.b32.xlu0 %v7179_v2, %s7689_s8 }
 0xbbf   : > { %4836 = vrot.lane.b32.xlu1 %v6612_v40, %s6296_s6 }
 0xbc1   : > { %6031 = vrot.lane.b32.xlu2 %v7189_v48, %s7689_s8  ;;  %6046 = vrot.lane.b32.xlu0 %v7189_v48, %s7677_s5 }
 0xbc7   : > { %6041 = vrot.lane.b32.xlu1 %v7197_v16, %s7689_s8 }
 0xbc9   : > { %6061 = vrot.lane.b32.xlu2 %v7197_v16, %s7677_s5  ;;  %6051 = vrot.lane.b32.xlu0 %v7179_v2, %s7677_s5 }
 0xbcf   : > { %6056 = vrot.lane.b32.xlu1 %v7165_v25, %s6297_s17 }
 0xbd1   : > { %5119 = vrot.lane.b32.xlu2 %v6612_v40, %s6297_s17  ;;  %6066 = vrot.lane.b32.xlu0 %v7169_v29, %s6297_s17 }
 0xbe3   : > { %v5977_v53 = vpop.permute.xlu2 %5976 }
 0xbe4   : > { %v5979_v9 = vunpack.i.h.bf16 %v5977_v53  ;;  %v5978_v20 = vunpack.i.l.bf16 %v5977_v53 }
 0xbe6   : > { %v4207_v23 = vsel %vm7771_vm13, %v6602_v17, %v5978_v20  ;;  %v4208_v32 = vsel %vm7772_vm14, %v5978_v20, %v5979_v9  ;;  %vm4429_vm13 = vcmask 990208   ;;  %vm7779_vm14 = vmmov %vm7754_vm0  ;;  %v4137_v20 = vld [vmem:[%s7770_s1 + $0x38] sm:$0xff] }
 0xbe7   : > { %4229 = vmatpush.msra.mxu2 %v4207_v23  ;;  %4249 = vmatpush.msra.mxu3 %v4208_v32  ;;  %v4136_v32 = vld [vmem:[%s7770_s1 + $0x30] sm:$0xff] }
 0xbe8   : > { %5603 = vmatmul.msk.f32.vlgmr.msra.gmra.mxu2 %vm7773_vm12, %v4131_v13  ;;  %5604 = vmatmul.msk.f32.vlgmr.msra.gmra.mxu3 %vm7774_vm11, %v4131_v13  ;;  %vm7780_vm12 = vmmov %vm7754_vm0  ;;  %vm7781_vm11 = vcmask 130048  }
 0xbeb   : > { %v5987_v59 = vpop.permute.xlu2 %5986 }
 0xbec   : > { %v5989_v44 = vunpack.i.h.bf16 %v5987_v59  ;;  %v5988_v60 = vunpack.i.l.bf16 %v5987_v59 }
 0xbee   : > { %v4327_v50 = vsel %vm4326_vm5, %v5988_v60, %v5989_v44 }
 0xbef   : > { %4349 = vmatpush.msrb.mxu2 %v4327_v50 }
 0xbf0   : > { %5607 = vmatmul.msk.f32.vlgmr.msrb.gmra.mxu2 %vm7775_vm15, %v4133_v51  ;;  %vm7782_vm15 = vmmov %vm7781_vm11 }
 0xbf3   : > { %v4428_v27 = vpop.permute.xlu2 %4427 }
 0xbf9   : > { %v4146_v49 = vpop.permute.xlu1 %4145 }
 0xbfb   : > { %v5972_v52 = vpop.permute.xlu0 %5971  ;;  %v6002_v5 = vpop.permute.xlu2 %6001 }
 0xbfc   : > { %v5974_v54 = vunpack.i.h.bf16 %v5972_v52  ;;  %v5973_v55 = vunpack.i.l.bf16 %v5972_v52  ;;  %v6004_v4 = vunpack.i.h.bf16 %v6002_v5  ;;  %v6003_v33 = vunpack.i.l.bf16 %v6002_v5  ;;  %v4138_v52 = vld [vmem:[%s7770_s1 + $0x40] sm:$0xff] }
 0xbfe   : > { %v4148_v11 = vsel %vm4147_vm2, %v5973_v55, %v5974_v54  ;;  %v4149_v43 = vsel %vm4147_vm2, %v5974_v54, %v4146_v49  ;;  %v4544_v36 = vsel %vm7782_vm15, %v6004_v4, %v6592_v10  ;;  %vm7784_vm2 = vmmov %vm7754_vm0  ;;  %vm4195_vm15 = vcmp.ge.s32.totalorder %v6971_v7, 7 }
 0xbff   : > { %4170 = vmatpush.msra.mxu0 %v4148_v11  ;;  %4190 = vmatpush.msra.mxu1 %v4149_v43  ;;  %v4196_v43 = vsel %vm4195_vm15, 1, %v6265_v1 }
 0xc00   : > { %5601 = vmatmul.msk.f32.vlgmr.msra.gmra.mxu0 %vm7754_vm0, %v4130_v28  ;;  %5602 = vmatmul.msk.f32.vlgmr.msra.gmra.mxu1 %vm7776_vm1, %v4130_v28 }
 0xc01   : > { %v4261_v47 = vpop.permute.xlu1 %4260 }
 0xc03   : > { %v5982_v56 = vpop.permute.xlu0 %5981 }
 0xc04   : > { %v5984_v57 = vunpack.i.h.bf16 %v5982_v56  ;;  %v5983_v58 = vunpack.i.l.bf16 %v5982_v56  ;;  %v4197_v56 = vperm.slane %v4196_v43, 0 }
 0xc06   : > { %v4263_v63 = vsel %vm4262_vm6, %v5983_v58, %v5984_v57  ;;  %v4264_v3 = vsel %vm4262_vm6, %v5984_v57, %v4261_v47  ;;  %vm7785_vm6 = vmmov %vm7776_vm1 }
 0xc07   : > { %4285 = vmatpush.msrb.mxu0 %v4263_v63  ;;  %4305 = vmatpush.msrb.mxu1 %v4264_v3 }
 0xc08   : > { %5605 = vmatmul.msk.f32.vlgmr.msrb.gmra.mxu0 %vm7777_vm4, %v4132_v62  ;;  %5606 = vmatmul.msk.f32.vlgmr.msrb.gmra.mxu1 %vm7778_vm3, %v4132_v62  ;;  %vm7786_vm4 = vmmov %vm7776_vm1  ;;  %v4198_v62 = vperm.slane %v4196_v43, 1 }
 0xc09   : > { %4416 = vmatpush.msra.mxu1 %v7146_v21  ;;  %4396 = vmatpush.msra.mxu0 %v7144_v22  ;;  %v5992_v0 = vpop.permute.xlu1 %5991  ;;  %v4543_v22 = vsel %vm7781_vm11, %v6003_v33, %v6004_v4  ;;  %vm7787_vm3 = vmmov %vm7776_vm1 }
 0xc0a   : > { %v5994_v35 = vunpack.i.h.bf16 %v5992_v0  ;;  %v5993_v34 = vunpack.i.l.bf16 %v5992_v0  ;;  %vm7790_vm11 = vmmov %vm7776_vm1 }
 0xc0b   : > { %v4325_v18 = vpop.permute.xlu0 %4324 }
 0xc0c   : > { %v4328_v8 = vsel %vm4326_vm5, %v5989_v44, %v4325_v18  ;;  %v4430_v61 = vsel %vm4429_vm13, %v5993_v34, %v5994_v35  ;;  %v4431_v21 = vsel %vm4429_vm13, %v5994_v35, %v4428_v27  ;;  %vm7783_vm5 = vmmov %vm7754_vm0  ;;  %vm4487_vm0 = vcmask 187392  }
 0xc0d   : > { %4369 = vmatpush.msrb.mxu3 %v4328_v8  ;;  %4452 = vmatpush.msra.mxu2 %v4430_v61  ;;  %vm4598_vm13 = vcmask 72704  }
 0xc0e   : > { %5608 = vmatmul.msk.f32.vlgmr.msrb.gmra.mxu3 %vm7779_vm14, %v4133_v51  ;;  %5611 = vmatmul.msk.f32.vlgmr.msra.gmra.mxu2 %vm7780_vm12, %v4135_v14  ;;  %vm7788_vm14 = vmmov %vm7776_vm1 }
 0xc0f   : > { %4472 = vmatpush.msra.mxu3 %v4431_v21  ;;  %4565 = vmatpush.msrb.mxu2 %v4543_v22  ;;  %vm7789_vm12 = vmmov %vm7776_vm1 }
 0xc10   : > { %5609 = vmatmul.msk.f32.vlgmr.msra.gmra.mxu0 %vm7783_vm5, %v4134_v30  ;;  %5610 = vmatmul.msk.f32.vlgmr.msra.gmra.mxu1 %vm7784_vm2, %v4134_v30  ;;  %vm4310_vm5 = vcmp.lt.s32.totalorder %v6971_v7, 9  ;;  %vm7252_vm2 = vcmp.eq.s32.totalorder %v4197_v56, 1 }
 0xc11   : > { %4585 = vmatpush.msrb.mxu3 %v4544_v36  ;;  %v4486_v53 = vpop.permute.xlu1 %4485  ;;  %v4311_v47 = vsel %vm4310_vm5, 1, %v6265_v1 }
 0xc12   : > { %v4312_v58 = vperm.slane %v4311_v47, 0  ;;  %v4313_v33 = vperm.slane %v4311_v47, 1 }
 0xc13   : > { %v5997_v9 = vpop.permute.xlu0 %5996 }
 0xc14   : > { %v5999_v13 = vunpack.i.h.bf16 %v5997_v9  ;;  %v5998_v23 = vunpack.i.l.bf16 %v5997_v9 }
 0xc16   : > { %5612 = vmatmul.msk.f32.vlgmr.msra.gmra.mxu3 %vm7776_vm1, %v4135_v14  ;;  %5615 = vmatmul.msk.f32.vlgmr.msrb.gmra.mxu2 %vm7785_vm6, %v4137_v20  ;;  %v4488_v59 = vsel %vm4487_vm0, %v5998_v23, %v5999_v13  ;;  %v4489_v44 = vsel %vm4487_vm0, %v5999_v13, %v4486_v53  ;;  %vm7256_vm0 = vcmp.eq.s32.totalorder %v4312_v58, 1  ;;  %vm7262_vm1 = vcmp.eq.s32.totalorder %v4198_v62, 1 }
 0xc17   : > { %4510 = vmatpush.msrb.mxu0 %v4488_v59  ;;  %4530 = vmatpush.msrb.mxu1 %v4489_v44  ;;  %vm7270_vm6 = vcmp.eq.s32.totalorder %v4313_v33, 1 }
 0xc18   : > { %5613 = vmatmul.msk.f32.vlgmr.msrb.gmra.mxu0 %vm7786_vm4, %v4136_v32  ;;  %5614 = vmatmul.msk.f32.vlgmr.msrb.gmra.mxu1 %vm7787_vm3, %v4136_v32  ;;  %vm4693_vm4 = vcmask 138240   ;;  %vm4850_vm3 = vcmask 121856  }
 0xc19   : > { %v4597_v49 = vpop.permute.xlu1 %4596 }
 0xc1b   : > { %v6007_v60 = vpop.permute.xlu0 %6006 }
 0xc1c   : > { %v6009_v51 = vunpack.i.h.bf16 %v6007_v60  ;;  %v6008_v50 = vunpack.i.l.bf16 %v6007_v60 }
 0xc1e   : > { %5616 = vmatmul.msk.f32.vlgmr.msrb.gmra.mxu3 %vm7788_vm14, %v4137_v20  ;;  %v4599_v54 = vsel %vm4598_vm13, %v6008_v50, %v6009_v51  ;;  %v4600_v55 = vsel %vm4598_vm13, %v6009_v51, %v4597_v49  ;;  %vm7799_vm13 = vcmask 261120  }
 0xc1f   : > { %4621 = vmatpush.msra.mxu0 %v4599_v54  ;;  %4641 = vmatpush.msra.mxu1 %v4600_v55  ;;  %vm7800_vm14 = vmmov %vm7799_vm13 }
 0xc20   : > { %5617 = vmatmul.msk.f32.vlgmr.msra.gmra.mxu0 %vm7789_vm12, %v4138_v52  ;;  %5618 = vmatmul.msk.f32.vlgmr.msra.gmra.mxu1 %vm7790_vm11, %v4138_v52  ;;  %vm7801_vm12 = vcmask 130048  }
 0xc21   : > { %vm7802_vm11 = vmmov %vm7801_vm12 }
 0xc22   : > { %vm7803_vm15 = vmmov %vm7802_vm11 }
 0xc23   : > { %vm7804_vm5 = vmmov %vm7802_vm11 }
 0xc6b   : > { %v4231_v11 = vpop.f32.mrf.mxu2  ;;  %v4251_v0 = vpop.f32.mrf.mxu3 }
 0xc73   : > { %v4351_v4 = vpop.f32.mrf.mxu2 }
 0xc74   : > { %v4374_v22 = vsel %vm7252_vm2, %v4351_v4, 0.0 }
 0xc7d   : > { %v4172_v27 = vpop.f32.mrf.mxu0  ;;  %v4192_v28 = vpop.f32.mrf.mxu1 }
 0xc7e   : > { %v4201_v7 = vsel %vm7252_vm2, %v4172_v27, 0.0  ;;  %v4202_v18 = vsel %vm7262_vm1, %v4192_v28, 0.0 }
 0xc7f   : > { %v4254_v34 = vadd.f32 %v4231_v11, %v4201_v7  ;;  %v4255_v30 = vadd.f32 %v4251_v0, %v4202_v18 }
 0xc85   : > { %v4287_v57 = vpop.f32.mrf.mxu0  ;;  %v4307_v63 = vpop.f32.mrf.mxu1 }
 0xc86   : > { %v4316_v35 = vsel %vm7256_vm0, %v4287_v57, 0.0  ;;  %v4317_v36 = vsel %vm7270_vm6, %v4307_v63, 0.0  ;;  %v4654_v63 = vpop.permute.xlu2 %4653 }
 0xc87   : > { %v4318_v21 = vadd.f32 %v4316_v35, %v4254_v34  ;;  %v4319_v23 = vadd.f32 %v4317_v36, %v4255_v30 }
 0xc89   : > { %v4376_v20 = vadd.f32 %v4374_v22, %v4318_v21 }
 0xc8d   : > { %v4398_v14 = vpop.f32.mrf.mxu0  ;;  %v4418_v61 = vpop.f32.mrf.mxu1 }
 0xc8e   : > { %v4421_v59 = vadd.f32 %v4398_v14, %v4376_v20  ;;  %v6012_v18 = vpop.permute.xlu2 %6011  ;;  %v6017_v14 = vpop.permute.xlu0 %6016 }
 0xc91   : > { %v4371_v53 = vpop.f32.mrf.mxu3  ;;  %v4454_v9 = vpop.f32.mrf.mxu2 }
 0xc92   : > { %v4375_v13 = vsel %vm7262_vm1, %v4371_v53, 0.0  ;;  %v4477_v32 = vsel %vm7256_vm0, %v4454_v9, 0.0 }
 0xc93   : > { %v4377_v60 = vadd.f32 %v4375_v13, %v4319_v23  ;;  %v4479_v49 = vadd.f32 %v4477_v32, %v4421_v59 }
 0xc95   : > { %v4512_v44 = vpop.f32.mrf.mxu0  ;;  %v4532_v50 = vpop.f32.mrf.mxu1  ;;  %v4422_v55 = vadd.f32 %v4418_v61, %v4377_v60 }
 0xc96   : > { %v4535_v51 = vsel %vm7252_vm2, %v4512_v44, 0.0  ;;  %v4536_v47 = vsel %vm7262_vm1, %v4532_v50, 0.0  ;;  %v7328_v8 = vpop.permute.xlu2 %6026  ;;  %v4680_v61 = vpop.permute.xlu1 %4679  ;;  %vm7805_vm2 = vmmov %vm7804_vm5 }
 0xc97   : > { %v4537_v52 = vadd.f32 %v4535_v51, %v4479_v49  ;;  %v7330_v21 = vpop.permute.xlu0 %6036  ;;  %vm7807_vm1 = vmmov %vm7799_vm13 }
 0xc99   : > { %v4474_v54 = vpop.f32.mrf.mxu3  ;;  %v4567_v28 = vpop.f32.mrf.mxu2 }
 0xc9a   : > { %v4478_v27 = vsel %vm7270_vm6, %v4474_v54, 0.0  ;;  %v4590_v43 = vadd.f32 %v4567_v28, %v4537_v52  ;;  %v6014_v52 = vunpack.i.h.bf16 %v6012_v18  ;;  %v6013_v54 = vunpack.i.l.bf16 %v6012_v18 }
 0xc9b   : > { %v4480_v11 = vadd.f32 %v4478_v27, %v4422_v55  ;;  %v6018_v55 = vunpack.i.l.bf16 %v6017_v14 }
 0xc9d   : > { %v4623_v56 = vpop.f32.mrf.mxu0  ;;  %v4643_v58 = vpop.f32.mrf.mxu1  ;;  %v4538_v3 = vadd.f32 %v4536_v47, %v4480_v11 }
 0xc9e   : > { %v4646_v57 = vsel %vm7256_vm0, %v4623_v56, 0.0  ;;  %v4647_v7 = vsel %vm7270_vm6, %v4643_v58, 0.0  ;;  %v7334_v30 = vpop.permute.xlu1 %6021  ;;  %v6019_v56 = vunpack.i.h.bf16 %v6017_v14  ;;  %vm7806_vm0 = vmmov %vm7805_vm2 }
 0xc9f   : > { %v4648_v62 = vadd.f32 %v4646_v57, %v4590_v43  ;;  %v6023_v18 = vunpack.i.l.bf16 %v7334_v30  ;;  %vm7808_vm6 = vmmov %vm7807_vm1 }
 0xca1   : > { %v7290_v0 = vadd.f32 %v4654_v63, %v4648_v62  ;;  %v4587_v4 = vpop.f32.mrf.mxu3 }
 0xca2   : > { %v4591_v33 = vadd.f32 %v4587_v4, %v4538_v3 }
 0xca3   : > { %v6080_v35 = vpack.i.bf16 %v7290_v0, %v6266_v6 }
 0xca4   : > { %v4649_v1 = vadd.f32 %v4647_v7, %v4591_v33  ;;  %v4697_v7 = vsel %vm4693_vm4, %v6014_v52, %v6018_v55  ;;  %v4658_v33 = vld [vmem:[%s6447_s27] sm:$0xff]  ;;  %v6038_v55 = vunpack.i.l.bf16 %v7330_v21 }
 0xca5   : > { %6081 = vrot.lane.b32.xlu2 %v6080_v35, %s6296_s6  ;;  %6071 = vrot.lane.b32.xlu0 %v6080_v35, %s6295_s11 }
 0xca6   : > { %v7298_v5 = vadd.f32 %v4654_v63, %v4649_v1 }
 0xca8   : > { %v6075_v34 = vpack.i.bf16 %v7017_v12, %v7298_v5  ;;  %v6120_v6 = vpack.i.bf16 %v7298_v5, %v7290_v0 }
 0xcaa   : > { %6076 = vrot.lane.b32.xlu1 %v6075_v34, %s6295_s11 }
 0xcad   : > { %6111 = vrot.lane.b32.xlu2 %v7197_v16, %s7678_s23  ;;  %6086 = vrot.lane.b32.xlu0 %v6075_v34, %s6296_s6 }
 0xcb2   : > { %6106 = vrot.lane.b32.xlu1 %v7165_v25, %s6298_s14  ;;  %v5358_v25 = vld [vmem:[%s6452_s4] sm:$0xff] }
 0xcb5   : > { %6121 = vrot.lane.b32.xlu2 %v6120_v6, %s7677_s5  ;;  %6091 = vrot.lane.b32.xlu0 %v6120_v6, %s7689_s8  ;;  %s921_s5 = sand.u32 1, %s6225_s16   ;;  %s5643_s8 = sshll.u32 %s6480_s0, 4 }
 0xcb6   : > { %s5373_s6 = scalar_lea.sflag [#allocation3], %s921_s5 }
 0xcba   : > { %6126 = vrot.lane.b32.xlu1 %v6080_v35, %s6297_s17 }
 0xcbd   : > { %6131 = vrot.lane.b32.xlu2 %v6075_v34, %s6297_s17  ;;  %6096 = vrot.lane.b32.xlu0 %v7189_v48, %s7678_s23 }
 0xcc2   : > { %6136 = vrot.lane.b32.xlu1 %v6120_v6, %s7678_s23 }
 0xcc5   : > { %6146 = vrot.lane.b32.xlu2 %v6075_v34, %s6298_s14  ;;  %6101 = vrot.lane.b32.xlu0 %v7179_v2, %s7678_s23  ;;  %v4695_v34 = vsel %vm4693_vm4, %v6019_v56, %v4680_v61  ;;  %s5384_s23 = scalar_lea.hbm %s6457_s12, %s5643_s8 }
 0xcc6   : > { %s5388_s11 = sshll.u32 %s5384_s23, 4  ;;  %s5389_s11 = int_to_ptr.hbm [resolvable:$true] %s5388_s11 }
 0xcc7   : > { %s6185_s17 = sshra.s32 %s5389_s11, 4  ;;  %s6186_s17 = int_to_ptr.hbm [resolvable:$true] %s6185_s17 }
 0xcc8   : > { %p6192_p0 = scmp.lt.s32.totalorder %s6186_s17, %s6457_s12 }
 0xcca   : > { %6141 = vrot.lane.b32.xlu1 %v6080_v35, %s6298_s14 }
 0xccd   : > { %5278 = vrot.lane.b32.xlu2 %v6612_v40, %s6298_s14  ;;  %6116 = vrot.lane.b32.xlu0 %v7169_v29, %s6298_s14  ;;  %v7332_v29 = vpop.permute.xlu2 %6031  ;;  %s6187_s14 = scalar_lea.hbm %s6186_s17, 16 }
 0xcce   : > { %p6188_p11 = scmp.ne.s32.totalorder %s6186_s17, %s6187_s14 }
 0xcd0   : > { %p6189_p12 = pnand %p6188_p11, %p6497_p5 }
 0xcd2   : > { %6156 = vrot.lane.b32.xlu1 %v6120_v6, %s7690_s13  ;;  %v6024_v6 = vunpack.i.h.bf16 %v7334_v30  ;;  %p6190_p13 = pneg %p6189_p12 }
 0xcd5   : > { %6166 = vrot.lane.b32.xlu2 %v7197_v16, %s7690_s13  ;;  %6151 = vrot.lane.b32.xlu0 %v7189_v48, %s7690_s13  ;;  %v7336_v16 = vpop.permute.xlu0 %6046  ;;  %v7338_v22 = vpop.permute.xlu2 %6061 }
 0xcd6   : > { %v7340_v48 = vpop.permute.xlu1 %4836 }
 0xcda   : > { %6161 = vrot.lane.b32.xlu1 %v7179_v2, %s7690_s13  ;;  %s5482_s13 = sshll.u32 %s921_s5, 4 }
 0xcdb   : > { %s923_s24 = scalar_lea.vmem [#allocation2], %s5482_s13  ;;  %s6191_s13 = scalar_lea.hbm %s6457_s12, 32 }
 0xcdc   : > { %s5386_s0 = sshll.u32 %s923_s24, 4  ;;  %p6193_p1 = scmp.lt.s32.totalorder %s6191_s13, %s6187_s14  ;;  %s5387_s0 = int_to_ptr.vmem [resolvable:$true] %s5386_s0 }
 0xcdd   : > { %5361 = vperm.xlu0 %5747, %v5358_v25   ;;  %v7342_v2 = vpop.permute.xlu0 %6051  ;;  %v7344_v36 = vpop.permute.xlu2 %5119 }
 0xcde   : > { %v7346_v53 = vpop.permute.xlu1 %6041  ;;  %p6194_p2 = por %p6193_p1, %p6192_p0 }
 0xce0   : > { %p6195_p3 = pnand %p6194_p2, %p6190_p13 }
 0xce5   : > { %v7348_v20 = vpop.permute.xlu0 %6066 }
 0xce6   : > { %v7350_v13 = vpop.permute.xlu1 %6056 }
 0xcff   : > { %v6082_v9 = vpop.permute.xlu2 %6081 }
 0xd00   : > { %v6084_v43 = vunpack.i.h.bf16 %v6082_v9  ;;  %v6083_v47 = vunpack.i.l.bf16 %v6082_v9 }
 0xd02   : > { %v4857_v1 = vsel %vm4850_vm3, %v6083_v47, %v6084_v43  ;;  %v4853_v61 = vsel %vm4850_vm3, %v6083_v47, %v6024_v6 }
 0xd07   : > { %v7352_v32 = vpop.permute.xlu2 %6111 }
 0xd0f   : > { %v7359_v62 = vpop.permute.xlu2 %6121 }
 0xd17   : > { %v6072_v23 = vpop.permute.xlu0 %6071 }
 0xd18   : > { %v6074_v59 = vunpack.i.h.bf16 %v6072_v23  ;;  %v6073_v44 = vunpack.i.l.bf16 %v6072_v23  ;;  %v6033_v23 = vunpack.i.l.bf16 %v7332_v29 }
 0xd1a   : > { %v4700_v60 = vsel %vm4693_vm4, %v6073_v44, %v6074_v59  ;;  %v4696_v57 = vsel %vm4693_vm4, %v6073_v44, %v6014_v52  ;;  %v4694_v4 = vsel %vm4693_vm4, %v6073_v44, %v6019_v56  ;;  %v6043_v56 = vunpack.i.l.bf16 %v7346_v53 }
 0xd1b   : > { %4725 = vmatpush.msra.mxu2 %v4700_v60  ;;  %v6029_v60 = vunpack.i.h.bf16 %v7328_v8 }
 0xd1c   : > { %v6077_v51 = vpop.permute.xlu1 %6076 }
 0xd1d   : > { %v6079_v50 = vunpack.i.h.bf16 %v6077_v51  ;;  %v6078_v49 = vunpack.i.l.bf16 %v6077_v51  ;;  %v6028_v51 = vunpack.i.l.bf16 %v7328_v8  ;;  %v4851_v8 = vsel %vm4850_vm3, %v6083_v47, %v6029_v60 }
 0xd1f   : > { %v6087_v27 = vpop.permute.xlu0 %6086  ;;  %v4698_v28 = vsel %vm4693_vm4, %v6073_v44, %v6079_v50  ;;  %v4701_v11 = vsel %vm4693_vm4, %v6074_v59, %v6078_v49  ;;  %v4699_v58 = vsel %vm4693_vm4, %v6079_v50, %v6013_v54  ;;  %v6034_v50 = vunpack.i.h.bf16 %v7332_v29  ;;  %vm7809_vm4 = vmmov %vm7806_vm0 }
 0xd20   : > { %4726 = vmatpush.msra.mxu2 %v4698_v28  ;;  %4745 = vmatpush.msra.mxu3 %v4701_v11  ;;  %v6089_v63 = vunpack.i.h.bf16 %v6087_v27  ;;  %v6088_v3 = vunpack.i.l.bf16 %v6087_v27  ;;  %v6039_v54 = vunpack.i.h.bf16 %v7330_v21  ;;  %v4854_v29 = vsel %vm4850_vm3, %v6024_v6, %v6028_v51  ;;  %v7387_v27 = vpop.permute.xlu2 %6131 }
 0xd21   : > { %v4775_v11 = vsel %vm7803_vm15, %v6592_v10, %v6033_v23  ;;  %v4776_v21 = vsel %vm7804_vm5, %v6033_v23, %v6034_v50  ;;  %v6054_v6 = vunpack.i.h.bf16 %v7342_v2  ;;  %vm7814_vm15 = vmmov %vm7807_vm1 }
 0xd22   : > { %4727 = vmatpush.msra.mxu2 %v4696_v57  ;;  %4746 = vmatpush.msra.mxu3 %v4699_v58  ;;  %v4855_v25 = vsel %vm4850_vm3, %v6083_v47, %v6089_v63  ;;  %v4858_v9 = vsel %vm4850_vm3, %v6084_v43, %v6088_v3  ;;  %v4856_v30 = vsel %vm4850_vm3, %v6089_v63, %v6023_v18  ;;  %v6044_v47 = vunpack.i.h.bf16 %v7346_v53  ;;  %v4660_v57 = vld [vmem:[%s6447_s27 + $0x10] sm:$0xff] }
 0xd23   : > { %v4852_v43 = vsel %vm4850_vm3, %v6029_v60, %v7340_v48  ;;  %v6124_v58 = vunpack.i.h.bf16 %v7359_v62  ;;  %v6123_v63 = vunpack.i.l.bf16 %v7359_v62  ;;  %v4773_v48 = vsel %vm7805_vm2, %v6592_v10, %v6038_v55  ;;  %vm7810_vm3 = vmmov %vm7806_vm0 }
 0xd24   : > { %v7364_v35 = vpop.permute.xlu1 %6106  ;;  %4728 = vmatpush.msra.mxu2 %v4694_v4  ;;  %4747 = vmatpush.msra.mxu3 %v4697_v7  ;;  %v4774_v3 = vsel %vm7806_vm0, %v6038_v55, %v6039_v54  ;;  %v6048_v53 = vunpack.i.l.bf16 %v7336_v16  ;;  %v6049_v4 = vunpack.i.h.bf16 %v7336_v16  ;;  %v6053_v16 = vunpack.i.l.bf16 %v7342_v2 }
 0xd25   : > { %5619 = vmatmul.msk.f32.vlgmr.msra.gmra.mxu2 %vm7799_vm13, %v4658_v33  ;;  %vm7811_vm13 = vcmask 7168   ;;  %v6068_v18 = vunpack.i.l.bf16 %v7348_v20  ;;  %v6059_v60 = vunpack.i.h.bf16 %v7350_v13 }
 0xd26   : > { %4882 = vmatpush.msrb.mxu2 %v4857_v1  ;;  %4748 = vmatpush.msra.mxu3 %v4695_v34  ;;  %v4936_v7 = vsel %vm7811_vm13, %v6529_v19, %v6123_v63  ;;  %v4659_v1 = vld [vmem:[%s6447_s27 + $0x8] sm:$0xff]  ;;  %v6134_v34 = vunpack.i.h.bf16 %v7387_v27  ;;  %vm7815_vm5 = vmmov %vm7811_vm13 }
 0xd27   : > { %v6092_v14 = vpop.permute.xlu0 %6091  ;;  %5620 = vmatmul.msk.f32.vlgmr.msra.gmra.mxu3 %vm7800_vm14, %v4658_v33  ;;  %vm7812_vm14 = vmmov %vm7811_vm13  ;;  %v4934_v2 = vsel %vm7815_vm5, %v6529_v19, %v6048_v53 }
 0xd28   : > { %4883 = vmatpush.msrb.mxu2 %v4855_v25  ;;  %v6094_v59 = vunpack.i.h.bf16 %v6092_v14  ;;  %v6093_v44 = vunpack.i.l.bf16 %v6092_v14  ;;  %4902 = vmatpush.msrb.mxu3 %v4858_v9  ;;  %v4937_v33 = vsel %vm7812_vm14, %v6123_v63, %v6124_v58  ;;  %v6058_v25 = vunpack.i.l.bf16 %v7350_v13  ;;  %v7430_v14 = vpop.permute.xlu2 %6146  ;;  %vm7816_vm2 = vmmov %vm7815_vm5 }
 0xd29   : > { %vm7817_vm0 = vmmov %vm7816_vm2 }
 0xd2a   : > { %4884 = vmatpush.msrb.mxu2 %v4853_v61  ;;  %4903 = vmatpush.msrb.mxu3 %v4856_v30  ;;  %v4777_v49 = vsel %vm7801_vm12, %v6592_v10, %v6093_v44  ;;  %v4778_v52 = vsel %vm7802_vm11, %v6093_v44, %v6094_v59  ;;  %vm5135_vm12 = vcmask 924672   ;;  %vm7813_vm11 = vmmov %vm7807_vm1  ;;  %v4935_v59 = vsel %vm7816_vm2, %v6048_v53, %v6049_v4  ;;  %v4662_v30 = vld [vmem:[%s6447_s27 + $0x20] sm:$0xff] }
 0xd2b   : > { %4802 = vmatpush.msrb.mxu0 %v4777_v49  ;;  %4822 = vmatpush.msrb.mxu1 %v4778_v52  ;;  %v6063_v61 = vunpack.i.l.bf16 %v7338_v22  ;;  %v5140_v51 = vsel %vm5135_vm12, %v6134_v34, %v6058_v25  ;;  %v6069_v49 = vunpack.i.h.bf16 %v7348_v20  ;;  %v4932_v52 = vsel %vm7817_vm0, %v6529_v19, %v6053_v16  ;;  %vm7822_vm14 = vmmov %vm7817_vm0 }
 0xd2c   : > { %4885 = vmatpush.msrb.mxu2 %v4851_v8  ;;  %4904 = vmatpush.msrb.mxu3 %v4854_v29  ;;  %v6127_v28 = vpop.permute.xlu1 %6126  ;;  %v5138_v13 = vsel %vm5135_vm12, %v6059_v60, %v6068_v18  ;;  %v6149_v34 = vunpack.i.h.bf16 %v7430_v14 }
 0xd2d   : > { %4803 = vmatpush.msrb.mxu0 %v4775_v11  ;;  %4823 = vmatpush.msrb.mxu1 %v4776_v21  ;;  %v6129_v62 = vunpack.i.h.bf16 %v6127_v28  ;;  %v4930_v29 = vsel %vm7822_vm14, %v6529_v19, %v6063_v61  ;;  %v6148_v11 = vunpack.i.l.bf16 %v7430_v14  ;;  %v5136_v21 = vsel %vm5135_vm12, %v6069_v49, %v7344_v36 }
 0xd2e   : > { %5008 = vmatpush.msra.mxu2 %v7290_v0  ;;  %4905 = vmatpush.msrb.mxu3 %v4852_v43  ;;  %v4661_v43 = vld [vmem:[%s6447_s27 + $0x18] sm:$0xff] }
 0xd2f   : > { %v7402_v0 = vpop.permute.xlu0 %6096  ;;  %4804 = vmatpush.msrb.mxu0 %v4773_v48  ;;  %4824 = vmatpush.msrb.mxu1 %v4774_v3  ;;  %v6114_v48 = vunpack.i.h.bf16 %v7352_v32  ;;  %v6113_v3 = vunpack.i.l.bf16 %v7352_v32 }
 0xd30   : > { %5009 = vmatpush.msra.mxu2 %v7017_v12  ;;  %5028 = vmatpush.msra.mxu3 %v7298_v5  ;;  %v4771_v12 = vsel %vm7809_vm4, %v6592_v10, %v6043_v56  ;;  %v4772_v5 = vsel %vm7810_vm3, %v6043_v56, %v6044_v47  ;;  %vm7819_vm4 = vmmov %vm7808_vm6  ;;  %vm7820_vm3 = vcmask 1039360   ;;  %v6099_v55 = vunpack.i.h.bf16 %v7402_v0  ;;  %v5279_v53 = vpop.permute.xlu2 %5278 }
 0xd31   : > { %5623 = vmatmul.msk.f32.vlgmr.msrb.gmra.mxu2 %vm7807_vm1, %v4660_v57  ;;  %5624 = vmatmul.msk.f32.vlgmr.msrb.gmra.mxu3 %vm7808_vm6, %v4660_v57  ;;  %vm7818_vm1 = vmmov %vm7817_vm0  ;;  %v6098_v8 = vunpack.i.l.bf16 %v7402_v0 }
 0xd32   : > { %5010 = vmatpush.msra.mxu2 %v6787_v26  ;;  %5029 = vmatpush.msra.mxu3 %v7019_v15  ;;  %v6133_v26 = vunpack.i.l.bf16 %v7387_v27  ;;  %v7422_v15 = vunpack.i.l.bf16 %v6127_v28  ;;  %vm7821_vm13 = vmmov %vm7820_vm3 }
 0xd33   : > { %4805 = vmatpush.msrb.mxu0 %v4771_v12  ;;  %4825 = vmatpush.msrb.mxu1 %v4772_v5  ;;  %vm7824_vm5 = vmmov %vm7819_vm4  ;;  %v6108_v5 = vunpack.i.l.bf16 %v7364_v35 }
 0xd34   : > { %v6137_v10 = vpop.permute.xlu1 %6136  ;;  %5011 = vmatpush.msra.mxu2 %v6610_v39  ;;  %5030 = vmatpush.msra.mxu3 %v6789_v31  ;;  %v5142_v9 = vsel %vm5135_vm12, %v6129_v62, %v6133_v26  ;;  %v6064_v39 = vunpack.i.h.bf16 %v7338_v22  ;;  %v5143_v50 = vsel %vm5135_vm12, %v6133_v26, %v7422_v15  ;;  %v4933_v22 = vsel %vm7818_vm1, %v6053_v16, %v6054_v6  ;;  %vm7825_vm2 = vmmov %vm7819_vm4 }
 0xd35   : > { %4961 = vmatpush.msra.mxu0 %v4936_v7  ;;  %4981 = vmatpush.msra.mxu1 %v4937_v33  ;;  %v6139_v31 = vunpack.i.h.bf16 %v6137_v10  ;;  %v6138_v23 = vunpack.i.l.bf16 %v6137_v10  ;;  %v5139_v58 = vsel %vm5135_vm12, %v6068_v18, %v7422_v15  ;;  %v5137_v4 = vsel %vm5135_vm12, %v7344_v36, %v7422_v15  ;;  %v4664_v7 = vld [vmem:[%s6447_s27 + $0x30] sm:$0xff]  ;;  %vm7833_vm14 = vmmov %vm7825_vm2 }
 0xd36   : > { %5621 = vmatmul.msk.f32.vlgmr.msrb.gmra.mxu0 %vm7813_vm11, %v4659_v1  ;;  %5622 = vmatmul.msk.f32.vlgmr.msrb.gmra.mxu1 %vm7814_vm15, %v4659_v1  ;;  %vm7823_vm11 = vmmov %vm7817_vm0  ;;  %vm5294_vm15 = vcmask 908288   ;;  %v6109_v10 = vunpack.i.h.bf16 %v7364_v35 }
 0xd37   : > { %5167 = vmatpush.msrb.mxu2 %v5142_v9  ;;  %4962 = vmatpush.msra.mxu0 %v4934_v2  ;;  %v6102_v44 = vpop.permute.xlu0 %6101  ;;  %v5060_v20 = vsel %vm7820_vm3, %v6138_v23, %v6139_v31  ;;  %v5061_v54 = vsel %vm7821_vm13, %v6139_v31, %v6537_v24  ;;  %v4931_v27 = vsel %vm7823_vm11, %v6063_v61, %v6064_v39  ;;  %vm7826_vm0 = vmmov %vm7820_vm3  ;;  %vm7834_vm11 = vcmask 916480  }
 0xd38   : > { %4982 = vmatpush.msra.mxu1 %v4935_v59  ;;  %5031 = vmatpush.msra.mxu3 %v6612_v40  ;;  %v5141_v40 = vsel %vm5135_vm12, %v6058_v25, %v7422_v15  ;;  %v6104_v56 = vunpack.i.h.bf16 %v6102_v44  ;;  %v6103_v57 = vunpack.i.l.bf16 %v6102_v44  ;;  %v5058_v62 = vsel %vm7826_vm0, %v6098_v8, %v6099_v55  ;;  %vm7827_vm1 = vmmov %vm7826_vm0  ;;  %v4663_v25 = vld [vmem:[%s6447_s27 + $0x28] sm:$0xff]  ;;  %v6167_v61 = vpop.permute.xlu2 %6166  ;;  %v4665_v8 = vld [vmem:[%s6447_s27 + $0x38] sm:$0xff] }
 0xd39   : > { %5168 = vmatpush.msrb.mxu2 %v5140_v51  ;;  %4963 = vmatpush.msra.mxu0 %v4932_v52  ;;  %v5059_v12 = vsel %vm7827_vm1, %v6099_v55, %v6537_v24  ;;  %vm7830_vm3 = vmmov %vm7826_vm0  ;;  %v5299_v16 = vsel %vm5294_vm15, %v6149_v34, %v6108_v5 }
 0xd3a   : > { %5187 = vmatpush.msrb.mxu3 %v5143_v50  ;;  %4983 = vmatpush.msra.mxu1 %v4933_v22  ;;  %v5054_v36 = vsel %vm7830_vm3, %v6113_v3, %v6114_v48  ;;  %vm7831_vm12 = vmmov %vm7826_vm0  ;;  %v6169_v22 = vunpack.i.h.bf16 %v6167_v61 }
 0xd3b   : > { %5627 = vmatmul.msk.f32.vlgmr.msra.gmra.mxu2 %vm7808_vm6, %v4662_v30  ;;  %5628 = vmatmul.msk.f32.vlgmr.msra.gmra.mxu3 %vm7819_vm4, %v4662_v30  ;;  %vm7828_vm6 = vmmov %vm7826_vm0  ;;  %v5055_v15 = vsel %vm7831_vm12, %v6114_v48, %v6537_v24  ;;  %v4666_v30 = vld [vmem:[%s6447_s27 + $0x40] sm:$0xff] }
 0xd3c   : > { %5169 = vmatpush.msrb.mxu2 %v5138_v13  ;;  %5188 = vmatpush.msrb.mxu3 %v5141_v40  ;;  %v6142_v28 = vpop.permute.xlu1 %6141  ;;  %v5056_v32 = vsel %vm7828_vm6, %v6103_v57, %v6104_v56  ;;  %vm7829_vm4 = vmmov %vm7826_vm0  ;;  %v6168_v13 = vunpack.i.l.bf16 %v6167_v61 }
 0xd3d   : > { %4964 = vmatpush.msra.mxu0 %v4930_v29  ;;  %4984 = vmatpush.msra.mxu1 %v4931_v27  ;;  %v6144_v47 = vunpack.i.h.bf16 %v6142_v28  ;;  %v6143_v19 = vunpack.i.l.bf16 %v6142_v28  ;;  %v5057_v33 = vsel %vm7829_vm4, %v6104_v56, %v6537_v24  ;;  %vm7832_vm13 = vmmov %vm7825_vm2 }
 0xd3e   : > { %5170 = vmatpush.msrb.mxu2 %v5136_v21  ;;  %5189 = vmatpush.msrb.mxu3 %v5139_v58 }
 0xd3f   : > { %5085 = vmatpush.msrb.mxu0 %v5060_v20  ;;  %5105 = vmatpush.msrb.mxu1 %v5061_v54  ;;  %v6117_v63 = vpop.permute.xlu0 %6116  ;;  %v5301_v0 = vsel %vm5294_vm15, %v6144_v47, %v6148_v11  ;;  %v5302_v26 = vsel %vm5294_vm15, %v6148_v11, %v6143_v19  ;;  %v5300_v2 = vsel %vm5294_vm15, %v6108_v5, %v6143_v19 }
 0xd40   : > { %5625 = vmatmul.msk.f32.vlgmr.msra.gmra.mxu0 %vm7824_vm5, %v4661_v43  ;;  %5626 = vmatmul.msk.f32.vlgmr.msra.gmra.mxu1 %vm7825_vm2, %v4661_v43  ;;  %v6118_v1 = vunpack.i.l.bf16 %v6117_v63  ;;  %v6119_v9 = vunpack.i.h.bf16 %v6117_v63  ;;  %vm7835_vm5 = vmmov %vm7825_vm2  ;;  %v5296_v49 = vsel %vm5294_vm15, %v5279_v53, %v6143_v19 }
 0xd41   : > { %5086 = vmatpush.msrb.mxu0 %v5058_v62  ;;  %5106 = vmatpush.msrb.mxu1 %v5059_v12  ;;  %vm7836_vm2 = vmmov %vm7834_vm11 }
 0xd42   : > { %5190 = vmatpush.msrb.mxu3 %v5137_v4  ;;  %5326 = vmatpush.msra.mxu2 %v5301_v0  ;;  %v5297_v35 = vsel %vm5294_vm15, %v6109_v10, %v6118_v1  ;;  %v5298_v24 = vsel %vm5294_vm15, %v6118_v1, %v6143_v19  ;;  %vm7837_vm0 = vmmov %vm7835_vm5  ;;  %v5295_v60 = vsel %vm5294_vm15, %v6119_v9, %v5279_v53 }
 0xd43   : > { %5087 = vmatpush.msrb.mxu0 %v5056_v32  ;;  %5107 = vmatpush.msrb.mxu1 %v5057_v33  ;;  %vm7838_vm1 = vmmov %vm7836_vm2 }
 0xd44   : > { %5631 = vmatmul.msk.f32.vlgmr.msrb.gmra.mxu2 %vm7832_vm13, %v4664_v7  ;;  %5632 = vmatmul.msk.f32.vlgmr.msrb.gmra.mxu3 %vm7833_vm14, %v4664_v7  ;;  %v6157_v6 = vpop.permute.xlu1 %6156  ;;  %vm7839_vm6 = vmmov %vm7838_vm1 }
 0xd45   : > { %5088 = vmatpush.msrb.mxu0 %v5054_v36  ;;  %5108 = vmatpush.msrb.mxu1 %v5055_v15  ;;  %v6159_v18 = vunpack.i.h.bf16 %v6157_v6  ;;  %v6158_v14 = vunpack.i.l.bf16 %v6157_v6  ;;  %vm7840_vm4 = vmmov %vm7837_vm0 }
 0xd46   : > { %5346 = vmatpush.msra.mxu3 %v5302_v26  ;;  %5327 = vmatpush.msra.mxu2 %v5299_v16  ;;  %vm7841_vm3 = vmmov %vm7837_vm0 }
 0xd47   : > { %v6152_v39 = vpop.permute.xlu0 %6151  ;;  %v5221_v31 = vsel %vm7834_vm11, %v6158_v14, %v6159_v18  ;;  %v5222_v44 = vsel %vm7836_vm2, %v6159_v18, %v6602_v17  ;;  %vm7842_vm12 = vmmov %vm7838_vm1 }
 0xd48   : > { %5347 = vmatpush.msra.mxu3 %v5300_v2  ;;  %5629 = vmatmul.msk.f32.vlgmr.msrb.gmra.mxu0 %vm7835_vm5, %v4663_v25  ;;  %v6154_v23 = vunpack.i.h.bf16 %v6152_v39  ;;  %v6153_v59 = vunpack.i.l.bf16 %v6152_v39  ;;  %vm7843_vm13 = vmmov %vm7838_vm1 }
 0xd49   : > { %5630 = vmatmul.msk.f32.vlgmr.msrb.gmra.mxu1 %vm7837_vm0, %v4663_v25  ;;  %5328 = vmatpush.msra.mxu2 %v5297_v35  ;;  %vm7844_vm15 = vmmov %vm7838_vm1 }
 0xd4a   : > { %5348 = vmatpush.msra.mxu3 %v5298_v24  ;;  %5246 = vmatpush.msra.mxu0 %v5221_v31  ;;  %v5219_v51 = vsel %vm7838_vm1, %v6153_v59, %v6154_v23  ;;  %v5220_v50 = vsel %vm7839_vm6, %v6154_v23, %v6602_v17  ;;  %v5215_v29 = vsel %vm7844_vm15, %v6168_v13, %v6169_v22  ;;  %vm7845_vm14 = vmmov %vm7838_vm1 }
 0xd4b   : > { %5329 = vmatpush.msra.mxu2 %v5295_v60  ;;  %5266 = vmatpush.msra.mxu1 %v5222_v44  ;;  %v5216_v27 = vsel %vm7845_vm14, %v6169_v22, %v6602_v17  ;;  %vm7846_vm11 = vmmov %vm7837_vm0 }
 0xd4c   : > { %5349 = vmatpush.msra.mxu3 %v5296_v49  ;;  %5247 = vmatpush.msra.mxu0 %v5219_v51  ;;  %v6162_v52 = vpop.permute.xlu1 %6161  ;;  %vm7847_vm5 = vmmov %vm7837_vm0 }
 0xd4d   : > { %5267 = vmatpush.msra.mxu1 %v5220_v50  ;;  %v6164_v40 = vunpack.i.h.bf16 %v6162_v52  ;;  %v6163_v20 = vunpack.i.l.bf16 %v6162_v52  ;;  %5635 = vmatmul.msk.f32.vlgmr.msra.gmra.mxu2 %vm7840_vm4, %v4666_v30 }
 0xd4e   : > { %5636 = vmatmul.msk.f32.vlgmr.msra.gmra.mxu3 %vm7841_vm3, %v4666_v30 }
 0xd4f   : > { %v5217_v54 = vsel %vm7842_vm12, %v6163_v20, %v6164_v40  ;;  %v5218_v55 = vsel %vm7843_vm13, %v6164_v40, %v6602_v17  ;;  %v5362_v51 = vpop.permute.xlu0 %5361 }
 0xd50   : > { %5248 = vmatpush.msra.mxu0 %v5217_v54  ;;  %5268 = vmatpush.msra.mxu1 %v5218_v55 }
 0xd52   : > { %5249 = vmatpush.msra.mxu0 %v5215_v29  ;;  %5269 = vmatpush.msra.mxu1 %v5216_v27 }
 0xd53   : > { %5633 = vmatmul.msk.f32.vlgmr.msra.gmra.mxu0 %vm7846_vm11, %v4665_v8  ;;  %5634 = vmatmul.msk.f32.vlgmr.msra.gmra.mxu1 %vm7847_vm5, %v4665_v8 }
 0xda8   : > { %v4730_v28 = vpop.f32.mrf.mxu2 }
 0xda9   : > { %v4753_v57 = vsel %vm6552_vm7, %v4730_v28, 0.0 }
 0xdaa   : > { %v4750_v11 = vpop.f32.mrf.mxu3 }
 0xdab   : > { %v4754_v58 = vsel %vm6556_vm8, %v4750_v11, 0.0 }
 0xdb3   : > { %v4807_v21 = vpop.f32.mrf.mxu0  ;;  %v4827_v43 = vpop.f32.mrf.mxu1 }
 0xdb4   : > { %v4887_v47 = vpop.f32.mrf.mxu2  ;;  %v4907_v56 = vpop.f32.mrf.mxu3  ;;  %v4830_v63 = vadd.f32 %v4807_v21, %v4753_v57  ;;  %v4831_v0 = vadd.f32 %v4827_v43, %v4754_v58 }
 0xdb5   : > { %v4910_v53 = vsel %vm6564_vm9, %v4887_v47, 0.0  ;;  %v4911_v62 = vsel %vm6568_vm10, %v4907_v56, 0.0 }
 0xdb6   : > { %v4912_v4 = vadd.f32 %v4910_v53, %v4830_v63  ;;  %v4913_v7 = vadd.f32 %v4911_v62, %v4831_v0 }
 0xdbd   : > { %v4966_v19 = vpop.f32.mrf.mxu0  ;;  %v4986_v17 = vpop.f32.mrf.mxu1 }
 0xdbe   : > { %v5013_v48 = vpop.f32.mrf.mxu2  ;;  %v5033_v3 = vpop.f32.mrf.mxu3  ;;  %v4989_v12 = vsel %vm6552_vm7, %v4966_v19, 0.0  ;;  %v4990_v5 = vsel %vm6556_vm8, %v4986_v17, 0.0 }
 0xdbf   : > { %v4991_v32 = vadd.f32 %v4989_v12, %v4912_v4  ;;  %v4992_v33 = vadd.f32 %v4990_v5, %v4913_v7 }
 0xdc1   : > { %v5036_v36 = vadd.f32 %v5013_v48, %v4991_v32  ;;  %v5037_v15 = vadd.f32 %v5033_v3, %v4992_v33 }
 0xdc5   : > { %v5090_v1 = vpop.f32.mrf.mxu0 }
 0xdc6   : > { %v5110_v34 = vpop.f32.mrf.mxu1  ;;  %v5113_v26 = vsel %vm6564_vm9, %v5090_v1, 0.0 }
 0xdc7   : > { %v5114_v10 = vsel %vm6568_vm10, %v5110_v34, 0.0  ;;  %v5172_v6 = vpop.f32.mrf.mxu2  ;;  %v5192_v16 = vpop.f32.mrf.mxu3  ;;  %v5115_v25 = vadd.f32 %v5113_v26, %v5036_v36 }
 0xdc8   : > { %v5116_v18 = vadd.f32 %v5114_v10, %v5037_v15  ;;  %v5195_v14 = vsel %vm6552_vm7, %v5172_v6, 0.0  ;;  %v5196_v9 = vsel %vm6556_vm8, %v5192_v16, 0.0 }
 0xdc9   : > { %v5197_v35 = vadd.f32 %v5195_v14, %v5115_v25 }
 0xdca   : > { %v5198_v2 = vadd.f32 %v5196_v9, %v5116_v18 }
 0xdd0   : > { %v5251_v24 = vpop.f32.mrf.mxu0  ;;  %v5271_v39 = vpop.f32.mrf.mxu1 }
 0xdd1   : > { %v5274_v31 = vadd.f32 %v5251_v24, %v5197_v35  ;;  %v5275_v23 = vadd.f32 %v5271_v39, %v5198_v2  ;;  %v5331_v59 = vpop.f32.mrf.mxu2  ;;  %v5351_v44 = vpop.f32.mrf.mxu3 }
 0xdd2   : > { %v5354_v37 = vsel %vm6564_vm9, %v5331_v59, 0.0  ;;  %v5355_v38 = vsel %vm6568_vm10, %v5351_v44, 0.0 }
 0xdd3   : > { %v5356_v61 = vadd.f32 %v5354_v37, %v5274_v31  ;;  %v5357_v60 = vadd.f32 %v5355_v38, %v5275_v23 }
 0xdd5   : > { %v5364_v50 = vadd.f32 %v5362_v51, %v5356_v61  ;;  %v5365_v30 = vadd.f32 %v5362_v51, %v5357_v60 }
 0xdd7   : > { %v5366_v49 = vadd.f32 %v5364_v50, %v6614_v41  ;;  %v5367_v52 = vadd.f32 %v5365_v30, %v6616_v42 }
 0xdd9   : > { %v5368_v45 = vmax.f32 %v5366_v49, 0.0  ;;  %v5369_v46 = vmax.f32 %v5367_v52, 0.0 }
 0xddb   : > { %5370 = vst [vmem:[%s923_s24] sm:$0xff] %v5368_v45 }
 0xddc   : > { %5371 = vst [vmem:[%s923_s24 + $0x8] sm:$0xff] %v5369_v46 }
 0xddd   : > { %6198 = shalt.err (!%p6195_p3)
}
 0xdde   : > { %5644 = dma.vmem_to_hbm [thread:$0]  (%p6497_p5), %s5387_s0, 256, %s5389_s11, %s5373_s6  }
 0xddf PF: > { %p5650_p4 = scmp.ge.s32.totalorder %s6233_s22, 2  ;;  %s5400_s5 = sand.u32 1, %s6221_s15  }
 0xde0   : > { %s5401_s8 = scalar_lea.sflag [#allocation3], %s5400_s5 }
 0xde1   : > { %p5647_p7 = pnand %p5650_p4, %p6501_p6 }
 0xde3   : > { %p5648_p8 = pneg %p5647_p7 }
 0xde5   : > { %6216 = dma.done.wait (%p5648_p8), %s5401_s8, 256  }
 0xde6   : > { %6218 = vsyncadd (%p5648_p8), %s5401_s8, 4294967040  ;;  %p71_p9 = scmp.ge.s32.totalorder %s6484_s26, 4   ;;  %s7848_s15 = smov %s6225_s16 }
 0xde7   : > { %s7849_s16 = smov %s6229_s18  ;;  %s7850_s18 = smov %s6495_s2 }
 0xde8   : > { %s7851_s22 = smov %s6484_s26  ;;  %73 = sbr.rel (!%p71_p9) target bundleno = 65 (0x41), region = 205 }
 0xded   :  { %5407 = vsyncpa [#allocation3], 1 }
 0xdee   :  { %5409 = vsyncpa [#allocation3 + $0x1], 1 }

</bundles_post_ra>
